<compile_context>
chip_gen: v7x
topology: tpu7x:2x2x1
jax: 0.10.0
libtpu: 0.0.40
codegen_flags: <defaults>
</compile_context>

<pallas_src>
import functools

import jax
import jax.numpy as jnp
from jax import lax
from jax.experimental import pallas as pl
from jax.experimental.pallas import tpu as pltpu

EPS = 1e-5


# ------------------------------ in-kernel helpers ------------------------------

def _store_vpad_reflect(vpad_ref, img_hwc, h):
    """Write img (H, W, C) with a 1-row vertical reflection halo into the (H+2, W, C) scratch.

    The cast to the scratch dtype (bf16 in production mode) happens exactly once, here.
    All stores are offset only in the leading (untiled) dim, so they are plain dense stores.
    """
    img = img_hwc.astype(vpad_ref.dtype)
    vpad_ref[1:h + 1, :, :] = img
    vpad_ref[0:1, :, :] = img[1:2, :, :]                   # padded row 0   = row 1
    vpad_ref[h + 1:h + 2, :, :] = img[h - 2:h - 1, :, :]   # padded row H+1 = row H-2


def _conv3x3(vp, w_ref, is_col0, is_colL, h, w, c):
    """3x3 reflect-padded conv as 3 tap-concatenated (H*W, 3C) @ (3C, C) MXU matmuls.

    `vp` is the vertically reflect-padded tile (H+2, W, C) already in the compute dtype.
    The horizontal reflection is applied on the fly: sublane rolls give the +/-1 column
    shifts and the pre-hoisted edge masks fix the two reflected edge columns.  The center
    tap (dx=1) is `vp` itself — no third full-tile copy.  For each of the 3 row taps the
    three column shifts are concatenated along channels so the MXU sees a 3C-deep
    contraction (f32 accumulation).
    """
    left = jnp.where(is_col0, vp[:, 1:2, :], pltpu.roll(vp, shift=1, axis=1))        # dx = 0
    right = jnp.where(is_colL, vp[:, w - 2:w - 1, :], pltpu.roll(vp, shift=w - 1, axis=1))  # dx = 2

    acc = None
    for dy in range(3):
        op = jnp.concatenate(
            [left[dy:dy + h], vp[dy:dy + h], right[dy:dy + h]], axis=-1
        ).reshape(h * w, 3 * c)
        part = jnp.dot(op, w_ref[dy], preferred_element_type=jnp.float32)
        acc = part if acc is None else acc + part
    return acc


def _instance_norm(y, inv_hw):
    """Affine-free InstanceNorm over the H*W axis.

    Two-pass (mean-subtracted) variance in f32 — robust against the cancellation issues of
    the single-pass E[x^2]-mean^2 form.  Biased variance, eps=1e-5, like nn.InstanceNorm2d.
    """
    mean = jnp.sum(y, axis=0, keepdims=True) * inv_hw
    d = y - mean
    var = jnp.sum(d * d, axis=0, keepdims=True) * inv_hw
    return d * lax.rsqrt(var + EPS)


# --------------------------------- fused kernel ---------------------------------

def _resnet_block_kernel(x_ref, w1_ref, w2_ref, o_ref, vpad_ref):
    """Fused ResnetBlock: conv3x3(reflect) + IN + ReLU + conv3x3(reflect) + IN + residual.

    One grid step = one image.  The intermediate activation is written (with its vertical
    reflection halo) into `vpad_ref` and consumed by the second conv directly from VMEM —
    no HBM round-trip.  Conv biases are dropped: a per-channel constant cancels exactly
    under affine-free InstanceNorm.
    """
    _, h, w, c = x_ref.shape
    inv_hw = 1.0 / float(h * w)

    # Hoisted column-edge masks for the on-the-fly horizontal reflection (reused by both convs).
    col = lax.broadcasted_iota(jnp.int32, (h + 2, w, c), 1)
    is_col0 = col == 0
    is_colL = col == w - 1

    # ---- conv1 -> InstanceNorm -> ReLU
    _store_vpad_reflect(vpad_ref, x_ref[0], h)
    y1 = _conv3x3(vpad_ref[...], w1_ref, is_col0, is_colL, h, w, c)
    y1 = jnp.maximum(_instance_norm(y1, inv_hw), 0.0)

    # ---- conv2 -> InstanceNorm -> residual add (intermediate stays in VMEM)
    _store_vpad_reflect(vpad_ref, y1.reshape(h, w, c), h)
    y2 = _conv3x3(vpad_ref[...], w2_ref, is_col0, is_colL, h, w, c)
    y2 = _instance_norm(y2, inv_hw)

    # Re-read the (still VMEM-resident) input block for the residual instead of keeping it
    # live across both convs — frees vregs/VMEM during the matmul-heavy phase.
    o_ref[0] = x_ref[0] + y2.reshape(h, w, c)


# ----------------------------------- wrappers ------------------------------------

def _vmem_limit_bytes():
    """Per-generation scoped VMEM limit: ~75% of physical capacity, capped at 100 MiB.

    v5e/v6e (128 MiB/TC) -> 96 MiB; v7x (64 MiB/TC) -> 48 MiB, leaving headroom for the
    double-buffered I/O blocks, the halo scratch and the in-kernel temporaries.
    """
    cap = 128 * 1024 * 1024
    try:
        info = pltpu.get_tpu_info()
        cap = int(getattr(info, "vmem_capacity_bytes", cap))
    except Exception:
        pass
    return min((cap * 3) // 4, 100 * 1024 * 1024)


def resnet_block_forward_nhwc(x_nhwc, w1_hwio, b1, w2_hwio, b2, *,
                              compute_dtype=jnp.float32):
    """NHWC entry point (no layout transposes).  x: (N, H, W, C) f32 -> (N, H, W, C) f32."""
    # Biases accepted for parity with Conv2d(bias=True) but skipped: they cancel exactly
    # under affine-free InstanceNorm, so adding them is pure wasted VPU work + DMA.
    del b1, b2
    n, h, w, c = x_nhwc.shape
    assert h >= 2 and w >= 2, "ReflectionPad2d(1) requires spatial dims >= 2"

    # Weights in (ky, kx*Cin, Cout) layout so each of the 3 per-conv dots contracts over 3C.
    w1_taps = w1_hwio.reshape(3, 3 * c, c).astype(compute_dtype)
    w2_taps = w2_hwio.reshape(3, 3 * c, c).astype(compute_dtype)

    return pl.pallas_call(
        _resnet_block_kernel,
        out_shape=jax.ShapeDtypeStruct((n, h, w, c), jnp.float32),
        grid_spec=pltpu.PrefetchScalarGridSpec(
            num_scalar_prefetch=0,
            grid=(n,),
            in_specs=[
                pl.BlockSpec((1, h, w, c), lambda i: (i, 0, 0, 0)),
                pl.BlockSpec((3, 3 * c, c), lambda i: (0, 0, 0)),
                pl.BlockSpec((3, 3 * c, c), lambda i: (0, 0, 0)),
            ],
            out_specs=pl.BlockSpec((1, h, w, c), lambda i: (i, 0, 0, 0)),
            # Halo scratch in the compute dtype (bf16 in production mode) — halves the
            # largest VMEM consumer and the vld traffic feeding the MXU.
            scratch_shapes=[pltpu.VMEM((h + 2, w, c), compute_dtype)],
        ),
        compiler_params=pltpu.CompilerParams(
            dimension_semantics=("parallel",),
            vmem_limit_bytes=_vmem_limit_bytes(),
        ),
    )(x_nhwc, w1_taps, w2_taps)


def resnet_block_forward(x_nchw, w1_hwio, b1, w2_hwio, b2, *,
                         compute_dtype=jnp.float32):
    """PyTorch-layout wrapper.  x: (N, C, H, W) f32 -> (N, C, H, W) f32."""
    x_nhwc = jnp.transpose(x_nchw, (0, 2, 3, 1))
    out = resnet_block_forward_nhwc(x_nhwc, w1_hwio, b1, w2_hwio, b2,
                                    compute_dtype=compute_dtype)
    return jnp.transpose(out, (0, 3, 1, 2))


# ------------------------------ pure-JAX reference -------------------------------

def _ref_forward(x_nchw, w1_hwio, b1, w2_hwio, b2, compute_dtype=jnp.float32):
    """Reference: reflect-pad conv (WITH bias) + affine-free InstanceNorm + ReLU, twice."""
    x = jnp.transpose(x_nchw, (0, 2, 3, 1))

    def conv(x_, w_, b_):
        xp = jnp.pad(x_, ((0, 0), (1, 1), (1, 1), (0, 0)), mode="reflect")
        y = lax.conv_general_dilated(
            xp.astype(compute_dtype), w_.astype(compute_dtype), (1, 1), "VALID",
            dimension_numbers=("NHWC", "HWIO", "NHWC"),
            preferred_element_type=jnp.float32)
        return y + b_

    def inorm(y):
        m = y.mean(axis=(1, 2), keepdims=True)
        v = ((y - m) ** 2).mean(axis=(1, 2), keepdims=True)
        return (y - m) * lax.rsqrt(v + EPS)

    hmid = jnp.maximum(inorm(conv(x, w1_hwio, b1)), 0.0)
    out = x + inorm(conv(hmid, w2_hwio, b2))
    return jnp.transpose(out, (0, 3, 1, 2))


# -------------------------------------- main --------------------------------------

if __name__ == "__main__":
    N, C, H, W = 2, 4, 16, 16
    key = jax.random.PRNGKey(0)
    kx, k1, k2, kb1, kb2 = jax.random.split(key, 5)

    x = jax.random.normal(kx, (N, C, H, W), dtype=jnp.float32)
    # conv weights in HWIO layout (kh, kw, in, out); equivalent to torch (out,in,kh,kw) permuted.
    w1 = jax.random.normal(k1, (3, 3, C, C), dtype=jnp.float32) * 0.1
    w2 = jax.random.normal(k2, (3, 3, C, C), dtype=jnp.float32) * 0.1
    b1 = jax.random.normal(kb1, (C,), dtype=jnp.float32) * 0.1
    b2 = jax.random.normal(kb2, (C,), dtype=jnp.float32) * 0.1

    # ---- full-precision mode: exact parity with the PyTorch module (bias in the reference
    #      but not in the kernel -> proves the bias cancels under affine-free InstanceNorm).
    out_f32 = jax.block_until_ready(jax.jit(resnet_block_forward)(x, w1, b1, w2, b2))
    ref_f32 = _ref_forward(x, w1, b1, w2, b2)
    assert out_f32.shape == (N, C, H, W)
    assert jnp.allclose(out_f32, ref_f32, atol=2e-4, rtol=2e-4), "f32 mismatch vs reference"

    # ---- bf16-operand mode (MXU-friendly production setting): compare against a reference
    #      that feeds the convs the same bf16 operands (stats / residual math stays f32).
    fwd_bf16 = jax.jit(functools.partial(resnet_block_forward, compute_dtype=jnp.bfloat16))
    out_bf16 = jax.block_until_ready(fwd_bf16(x, w1, b1, w2, b2))
    ref_bf16 = _ref_forward(x, w1, b1, w2, b2, compute_dtype=jnp.bfloat16)
    assert jnp.allclose(out_bf16, ref_bf16, atol=5e-3, rtol=5e-3), "bf16 mismatch vs reference"

    print("KERNEL_OK")
</pallas_src>

<mosaic_0001>
module attributes {stable_mosaic.version = 11 : i64} {
  func.func @_resnet_block_kernel(%arg0: i32, %arg1: memref<1x16x16x4xf32, #tpu.memory_space<vmem>>, %arg2: memref<3x12x4xf32, #tpu.memory_space<vmem>>, %arg3: memref<3x12x4xf32, #tpu.memory_space<vmem>>, %arg4: memref<1x16x16x4xf32, #tpu.memory_space<vmem>>, %arg5: memref<18x16x4xf32, #tpu.memory_space<vmem>>) attributes {dimension_semantics = [#tpu.dimension_semantics<parallel>], iteration_bounds = array<i64: 2>, scalar_prefetch = 0 : i64, scratch_operands = 1 : i64, tpu.core_type = #tpu.core_type<tc>, window_params = [{transform_indices = @transform_0, window_bounds = array<i64: 1, 16, 16, 4>}, {pipeline_mode = #tpu.pipeline_mode<synchronous>, transform_indices = @transform_1, window_bounds = array<i64: 3, 12, 4>}, {pipeline_mode = #tpu.pipeline_mode<synchronous>, transform_indices = @transform_2, window_bounds = array<i64: 3, 12, 4>}, {transform_indices = @transform_3, window_bounds = array<i64: 1, 16, 16, 4>}]} {
    %0 = tpu.iota {dimensions = array<i32: 1>} : vector<18x16x4xi32>
    %c0_i32 = arith.constant 0 : i32
    %1 = vector.broadcast %c0_i32 : i32 to vector<18x16x4xi32>
    %2 = arith.cmpi eq, %0, %1 : vector<18x16x4xi32>
    %c15_i32 = arith.constant 15 : i32
    %3 = vector.broadcast %c15_i32 : i32 to vector<18x16x4xi32>
    %4 = arith.cmpi eq, %0, %3 : vector<18x16x4xi32>
    %c0 = arith.constant 0 : index
    %c0_0 = arith.constant 0 : index
    %c0_1 = arith.constant 0 : index
    %c0_2 = arith.constant 0 : index
    %5 = vector.load %arg1[%c0, %c0_0, %c0_1, %c0_2] : memref<1x16x16x4xf32, #tpu.memory_space<vmem>>, vector<1x16x16x4xf32>
    %6 = vector.shape_cast %5 : vector<1x16x16x4xf32> to vector<16x16x4xf32>
    %c1 = arith.constant 1 : index
    %c0_3 = arith.constant 0 : index
    %c0_4 = arith.constant 0 : index
    %7 = vector.load %arg5[%c1, %c0_3, %c0_4] : memref<18x16x4xf32, #tpu.memory_space<vmem>>, vector<16x16x4xf32>
    tpu.vector_store %arg5[%c1, %c0_3, %c0_4], %6 {strides = array<i32>} : memref<18x16x4xf32, #tpu.memory_space<vmem>>, vector<16x16x4xf32>,
    %8 = vector.extract_strided_slice %6 {offsets = [1, 0, 0], sizes = [1, 16, 4], strides = [1, 1, 1]} : vector<16x16x4xf32> to vector<1x16x4xf32>
    %c0_5 = arith.constant 0 : index
    %c0_6 = arith.constant 0 : index
    %c0_7 = arith.constant 0 : index
    %9 = vector.load %arg5[%c0_5, %c0_6, %c0_7] : memref<18x16x4xf32, #tpu.memory_space<vmem>>, vector<1x16x4xf32>
    tpu.vector_store %arg5[%c0_5, %c0_6, %c0_7], %8 {strides = array<i32>} : memref<18x16x4xf32, #tpu.memory_space<vmem>>, vector<1x16x4xf32>,
    %10 = vector.extract_strided_slice %6 {offsets = [14, 0, 0], sizes = [1, 16, 4], strides = [1, 1, 1]} : vector<16x16x4xf32> to vector<1x16x4xf32>
    %c17 = arith.constant 17 : index
    %c0_8 = arith.constant 0 : index
    %c0_9 = arith.constant 0 : index
    %11 = vector.load %arg5[%c17, %c0_8, %c0_9] : memref<18x16x4xf32, #tpu.memory_space<vmem>>, vector<1x16x4xf32>
    tpu.vector_store %arg5[%c17, %c0_8, %c0_9], %10 {strides = array<i32>} : memref<18x16x4xf32, #tpu.memory_space<vmem>>, vector<1x16x4xf32>,
    %c0_10 = arith.constant 0 : index
    %c0_11 = arith.constant 0 : index
    %c0_12 = arith.constant 0 : index
    %12 = vector.load %arg5[%c0_10, %c0_11, %c0_12] : memref<18x16x4xf32, #tpu.memory_space<vmem>>, vector<18x16x4xf32>
    %13 = vector.extract_strided_slice %12 {offsets = [0, 1, 0], sizes = [18, 1, 4], strides = [1, 1, 1]} : vector<18x16x4xf32> to vector<18x1x4xf32>
    %c1_i32 = arith.constant 1 : i32
    %14 = tpu.dynamic_rotate %12 by %c1_i32 dim 1 : vector<18x16x4xf32>, i32 -> vector<18x16x4xf32>
    %15 = vector.shape_cast %13 : vector<18x1x4xf32> to vector<18x1x4xf32>
    %16 = vector.broadcast %15 : vector<18x1x4xf32> to vector<18x16x4xf32>
    %17 = arith.select %2, %16, %14 : vector<18x16x4xi1>, vector<18x16x4xf32>
    %18 = vector.extract_strided_slice %12 {offsets = [0, 14, 0], sizes = [18, 1, 4], strides = [1, 1, 1]} : vector<18x16x4xf32> to vector<18x1x4xf32>
    %c15_i32_13 = arith.constant 15 : i32
    %19 = tpu.dynamic_rotate %12 by %c15_i32_13 dim 1 : vector<18x16x4xf32>, i32 -> vector<18x16x4xf32>
    %20 = vector.shape_cast %18 : vector<18x1x4xf32> to vector<18x1x4xf32>
    %21 = vector.broadcast %20 : vector<18x1x4xf32> to vector<18x16x4xf32>
    %22 = arith.select %4, %21, %19 : vector<18x16x4xi1>, vector<18x16x4xf32>
    %23 = vector.extract_strided_slice %17 {offsets = [0, 0, 0], sizes = [16, 16, 4], strides = [1, 1, 1]} : vector<18x16x4xf32> to vector<16x16x4xf32>
    %24 = vector.extract_strided_slice %12 {offsets = [0, 0, 0], sizes = [16, 16, 4], strides = [1, 1, 1]} : vector<18x16x4xf32> to vector<16x16x4xf32>
    %25 = vector.extract_strided_slice %22 {offsets = [0, 0, 0], sizes = [16, 16, 4], strides = [1, 1, 1]} : vector<18x16x4xf32> to vector<16x16x4xf32>
    %26 = tpu.concatenate %23, %24, %25 in 2 : vector<16x16x4xf32>, vector<16x16x4xf32>, vector<16x16x4xf32> -> vector<16x16x12xf32>
    %27 = vector.shape_cast %26 : vector<16x16x12xf32> to vector<256x12xf32>
    %c0_14 = arith.constant 0 : index
    %c0_15 = arith.constant 0 : index
    %c0_16 = arith.constant 0 : index
    %28 = vector.load %arg2[%c0_14, %c0_15, %c0_16] : memref<3x12x4xf32, #tpu.memory_space<vmem>>, vector<1x12x4xf32>
    %29 = vector.shape_cast %28 : vector<1x12x4xf32> to vector<12x4xf32>
    %cst = arith.constant dense<0.000000e+00> : vector<256x4xf32>
    %30 = tpu.matmul %27, %29, %cst {dimension_numbers = #tpu.dot_dimension_numbers<[1], [0], [0], [1], [0, 0, 1, 1], [], []>} : vector<256x12xf32>, vector<12x4xf32>, vector<256x4xf32> -> vector<256x4xf32>
    %31 = vector.extract_strided_slice %17 {offsets = [1, 0, 0], sizes = [16, 16, 4], strides = [1, 1, 1]} : vector<18x16x4xf32> to vector<16x16x4xf32>
    %32 = vector.extract_strided_slice %12 {offsets = [1, 0, 0], sizes = [16, 16, 4], strides = [1, 1, 1]} : vector<18x16x4xf32> to vector<16x16x4xf32>
    %33 = vector.extract_strided_slice %22 {offsets = [1, 0, 0], sizes = [16, 16, 4], strides = [1, 1, 1]} : vector<18x16x4xf32> to vector<16x16x4xf32>
    %34 = tpu.concatenate %31, %32, %33 in 2 : vector<16x16x4xf32>, vector<16x16x4xf32>, vector<16x16x4xf32> -> vector<16x16x12xf32>
    %35 = vector.shape_cast %34 : vector<16x16x12xf32> to vector<256x12xf32>
    %c1_17 = arith.constant 1 : index
    %c0_18 = arith.constant 0 : index
    %c0_19 = arith.constant 0 : index
    %36 = vector.load %arg2[%c1_17, %c0_18, %c0_19] : memref<3x12x4xf32, #tpu.memory_space<vmem>>, vector<1x12x4xf32>
    %37 = vector.shape_cast %36 : vector<1x12x4xf32> to vector<12x4xf32>
    %cst_20 = arith.constant dense<0.000000e+00> : vector<256x4xf32>
    %38 = tpu.matmul %35, %37, %cst_20 {dimension_numbers = #tpu.dot_dimension_numbers<[1], [0], [0], [1], [0, 0, 1, 1], [], []>} : vector<256x12xf32>, vector<12x4xf32>, vector<256x4xf32> -> vector<256x4xf32>
    %39 = arith.addf %30, %38 : vector<256x4xf32>
    %40 = vector.extract_strided_slice %17 {offsets = [2, 0, 0], sizes = [16, 16, 4], strides = [1, 1, 1]} : vector<18x16x4xf32> to vector<16x16x4xf32>
    %41 = vector.extract_strided_slice %12 {offsets = [2, 0, 0], sizes = [16, 16, 4], strides = [1, 1, 1]} : vector<18x16x4xf32> to vector<16x16x4xf32>
    %42 = vector.extract_strided_slice %22 {offsets = [2, 0, 0], sizes = [16, 16, 4], strides = [1, 1, 1]} : vector<18x16x4xf32> to vector<16x16x4xf32>
    %43 = tpu.concatenate %40, %41, %42 in 2 : vector<16x16x4xf32>, vector<16x16x4xf32>, vector<16x16x4xf32> -> vector<16x16x12xf32>
    %44 = vector.shape_cast %43 : vector<16x16x12xf32> to vector<256x12xf32>
    %c2 = arith.constant 2 : index
    %c0_21 = arith.constant 0 : index
    %c0_22 = arith.constant 0 : index
    %45 = vector.load %arg2[%c2, %c0_21, %c0_22] : memref<3x12x4xf32, #tpu.memory_space<vmem>>, vector<1x12x4xf32>
    %46 = vector.shape_cast %45 : vector<1x12x4xf32> to vector<12x4xf32>
    %cst_23 = arith.constant dense<0.000000e+00> : vector<256x4xf32>
    %47 = tpu.matmul %44, %46, %cst_23 {dimension_numbers = #tpu.dot_dimension_numbers<[1], [0], [0], [1], [0, 0, 1, 1], [], []>} : vector<256x12xf32>, vector<12x4xf32>, vector<256x4xf32> -> vector<256x4xf32>
    %48 = arith.addf %39, %47 : vector<256x4xf32>
    %cst_24 = arith.constant dense<0.000000e+00> : vector<4xf32>
    %49 = vector.multi_reduction <add>, %48, %cst_24 [0] : vector<256x4xf32> to vector<4xf32>
    %50 = vector.shape_cast %49 : vector<4xf32> to vector<1x4xf32>
    %cst_25 = arith.constant 3.906250e-03 : f32
    %51 = vector.broadcast %cst_25 : f32 to vector<1x4xf32>
    %52 = arith.mulf %50, %51 : vector<1x4xf32>
    %53 = vector.broadcast %52 : vector<1x4xf32> to vector<256x4xf32>
    %54 = arith.subf %48, %53 : vector<256x4xf32>
    %55 = arith.mulf %54, %54 : vector<256x4xf32>
    %cst_26 = arith.constant dense<0.000000e+00> : vector<4xf32>
    %56 = vector.multi_reduction <add>, %55, %cst_26 [0] : vector<256x4xf32> to vector<4xf32>
    %57 = vector.shape_cast %56 : vector<4xf32> to vector<1x4xf32>
    %cst_27 = arith.constant 3.906250e-03 : f32
    %58 = vector.broadcast %cst_27 : f32 to vector<1x4xf32>
    %59 = arith.mulf %57, %58 : vector<1x4xf32>
    %cst_28 = arith.constant 9.99999974E-6 : f32
    %60 = vector.broadcast %cst_28 : f32 to vector<1x4xf32>
    %61 = arith.addf %59, %60 : vector<1x4xf32>
    %62 = math.rsqrt %61 : vector<1x4xf32>
    %63 = vector.broadcast %62 : vector<1x4xf32> to vector<256x4xf32>
    %64 = arith.mulf %54, %63 : vector<256x4xf32>
    %cst_29 = arith.constant 0.000000e+00 : f32
    %65 = vector.broadcast %cst_29 : f32 to vector<256x4xf32>
    %66 = arith.maximumf %64, %65 : vector<256x4xf32>
    %67 = vector.shape_cast %66 : vector<256x4xf32> to vector<16x16x4xf32>
    %c1_30 = arith.constant 1 : index
    %c0_31 = arith.constant 0 : index
    %c0_32 = arith.constant 0 : index
    %68 = vector.load %arg5[%c1_30, %c0_31, %c0_32] : memref<18x16x4xf32, #tpu.memory_space<vmem>>, vector<16x16x4xf32>
    tpu.vector_store %arg5[%c1_30, %c0_31, %c0_32], %67 {strides = array<i32>} : memref<18x16x4xf32, #tpu.memory_space<vmem>>, vector<16x16x4xf32>,
    %69 = vector.extract_strided_slice %67 {offsets = [1, 0, 0], sizes = [1, 16, 4], strides = [1, 1, 1]} : vector<16x16x4xf32> to vector<1x16x4xf32>
    %c0_33 = arith.constant 0 : index
    %c0_34 = arith.constant 0 : index
    %c0_35 = arith.constant 0 : index
    %70 = vector.load %arg5[%c0_33, %c0_34, %c0_35] : memref<18x16x4xf32, #tpu.memory_space<vmem>>, vector<1x16x4xf32>
    tpu.vector_store %arg5[%c0_33, %c0_34, %c0_35], %69 {strides = array<i32>} : memref<18x16x4xf32, #tpu.memory_space<vmem>>, vector<1x16x4xf32>,
    %71 = vector.extract_strided_slice %67 {offsets = [14, 0, 0], sizes = [1, 16, 4], strides = [1, 1, 1]} : vector<16x16x4xf32> to vector<1x16x4xf32>
    %c17_36 = arith.constant 17 : index
    %c0_37 = arith.constant 0 : index
    %c0_38 = arith.constant 0 : index
    %72 = vector.load %arg5[%c17_36, %c0_37, %c0_38] : memref<18x16x4xf32, #tpu.memory_space<vmem>>, vector<1x16x4xf32>
    tpu.vector_store %arg5[%c17_36, %c0_37, %c0_38], %71 {strides = array<i32>} : memref<18x16x4xf32, #tpu.memory_space<vmem>>, vector<1x16x4xf32>,
    %c0_39 = arith.constant 0 : index
    %c0_40 = arith.constant 0 : index
    %c0_41 = arith.constant 0 : index
    %73 = vector.load %arg5[%c0_39, %c0_40, %c0_41] : memref<18x16x4xf32, #tpu.memory_space<vmem>>, vector<18x16x4xf32>
    %74 = vector.extract_strided_slice %73 {offsets = [0, 1, 0], sizes = [18, 1, 4], strides = [1, 1, 1]} : vector<18x16x4xf32> to vector<18x1x4xf32>
    %c1_i32_42 = arith.constant 1 : i32
    %75 = tpu.dynamic_rotate %73 by %c1_i32_42 dim 1 : vector<18x16x4xf32>, i32 -> vector<18x16x4xf32>
    %76 = vector.shape_cast %74 : vector<18x1x4xf32> to vector<18x1x4xf32>
    %77 = vector.broadcast %76 : vector<18x1x4xf32> to vector<18x16x4xf32>
    %78 = arith.select %2, %77, %75 : vector<18x16x4xi1>, vector<18x16x4xf32>
    %79 = vector.extract_strided_slice %73 {offsets = [0, 14, 0], sizes = [18, 1, 4], strides = [1, 1, 1]} : vector<18x16x4xf32> to vector<18x1x4xf32>
    %c15_i32_43 = arith.constant 15 : i32
    %80 = tpu.dynamic_rotate %73 by %c15_i32_43 dim 1 : vector<18x16x4xf32>, i32 -> vector<18x16x4xf32>
    %81 = vector.shape_cast %79 : vector<18x1x4xf32> to vector<18x1x4xf32>
    %82 = vector.broadcast %81 : vector<18x1x4xf32> to vector<18x16x4xf32>
    %83 = arith.select %4, %82, %80 : vector<18x16x4xi1>, vector<18x16x4xf32>
    %84 = vector.extract_strided_slice %78 {offsets = [0, 0, 0], sizes = [16, 16, 4], strides = [1, 1, 1]} : vector<18x16x4xf32> to vector<16x16x4xf32>
    %85 = vector.extract_strided_slice %73 {offsets = [0, 0, 0], sizes = [16, 16, 4], strides = [1, 1, 1]} : vector<18x16x4xf32> to vector<16x16x4xf32>
    %86 = vector.extract_strided_slice %83 {offsets = [0, 0, 0], sizes = [16, 16, 4], strides = [1, 1, 1]} : vector<18x16x4xf32> to vector<16x16x4xf32>
    %87 = tpu.concatenate %84, %85, %86 in 2 : vector<16x16x4xf32>, vector<16x16x4xf32>, vector<16x16x4xf32> -> vector<16x16x12xf32>
    %88 = vector.shape_cast %87 : vector<16x16x12xf32> to vector<256x12xf32>
    %c0_44 = arith.constant 0 : index
    %c0_45 = arith.constant 0 : index
    %c0_46 = arith.constant 0 : index
    %89 = vector.load %arg3[%c0_44, %c0_45, %c0_46] : memref<3x12x4xf32, #tpu.memory_space<vmem>>, vector<1x12x4xf32>
    %90 = vector.shape_cast %89 : vector<1x12x4xf32> to vector<12x4xf32>
    %cst_47 = arith.constant dense<0.000000e+00> : vector<256x4xf32>
    %91 = tpu.matmul %88, %90, %cst_47 {dimension_numbers = #tpu.dot_dimension_numbers<[1], [0], [0], [1], [0, 0, 1, 1], [], []>} : vector<256x12xf32>, vector<12x4xf32>, vector<256x4xf32> -> vector<256x4xf32>
    %92 = vector.extract_strided_slice %78 {offsets = [1, 0, 0], sizes = [16, 16, 4], strides = [1, 1, 1]} : vector<18x16x4xf32> to vector<16x16x4xf32>
    %93 = vector.extract_strided_slice %73 {offsets = [1, 0, 0], sizes = [16, 16, 4], strides = [1, 1, 1]} : vector<18x16x4xf32> to vector<16x16x4xf32>
    %94 = vector.extract_strided_slice %83 {offsets = [1, 0, 0], sizes = [16, 16, 4], strides = [1, 1, 1]} : vector<18x16x4xf32> to vector<16x16x4xf32>
    %95 = tpu.concatenate %92, %93, %94 in 2 : vector<16x16x4xf32>, vector<16x16x4xf32>, vector<16x16x4xf32> -> vector<16x16x12xf32>
    %96 = vector.shape_cast %95 : vector<16x16x12xf32> to vector<256x12xf32>
    %c1_48 = arith.constant 1 : index
    %c0_49 = arith.constant 0 : index
    %c0_50 = arith.constant 0 : index
    %97 = vector.load %arg3[%c1_48, %c0_49, %c0_50] : memref<3x12x4xf32, #tpu.memory_space<vmem>>, vector<1x12x4xf32>
    %98 = vector.shape_cast %97 : vector<1x12x4xf32> to vector<12x4xf32>
    %cst_51 = arith.constant dense<0.000000e+00> : vector<256x4xf32>
    %99 = tpu.matmul %96, %98, %cst_51 {dimension_numbers = #tpu.dot_dimension_numbers<[1], [0], [0], [1], [0, 0, 1, 1], [], []>} : vector<256x12xf32>, vector<12x4xf32>, vector<256x4xf32> -> vector<256x4xf32>
    %100 = arith.addf %91, %99 : vector<256x4xf32>
    %101 = vector.extract_strided_slice %78 {offsets = [2, 0, 0], sizes = [16, 16, 4], strides = [1, 1, 1]} : vector<18x16x4xf32> to vector<16x16x4xf32>
    %102 = vector.extract_strided_slice %73 {offsets = [2, 0, 0], sizes = [16, 16, 4], strides = [1, 1, 1]} : vector<18x16x4xf32> to vector<16x16x4xf32>
    %103 = vector.extract_strided_slice %83 {offsets = [2, 0, 0], sizes = [16, 16, 4], strides = [1, 1, 1]} : vector<18x16x4xf32> to vector<16x16x4xf32>
    %104 = tpu.concatenate %101, %102, %103 in 2 : vector<16x16x4xf32>, vector<16x16x4xf32>, vector<16x16x4xf32> -> vector<16x16x12xf32>
    %105 = vector.shape_cast %104 : vector<16x16x12xf32> to vector<256x12xf32>
    %c2_52 = arith.constant 2 : index
    %c0_53 = arith.constant 0 : index
    %c0_54 = arith.constant 0 : index
    %106 = vector.load %arg3[%c2_52, %c0_53, %c0_54] : memref<3x12x4xf32, #tpu.memory_space<vmem>>, vector<1x12x4xf32>
    %107 = vector.shape_cast %106 : vector<1x12x4xf32> to vector<12x4xf32>
    %cst_55 = arith.constant dense<0.000000e+00> : vector<256x4xf32>
    %108 = tpu.matmul %105, %107, %cst_55 {dimension_numbers = #tpu.dot_dimension_numbers<[1], [0], [0], [1], [0, 0, 1, 1], [], []>} : vector<256x12xf32>, vector<12x4xf32>, vector<256x4xf32> -> vector<256x4xf32>
    %109 = arith.addf %100, %108 : vector<256x4xf32>
    %cst_56 = arith.constant dense<0.000000e+00> : vector<4xf32>
    %110 = vector.multi_reduction <add>, %109, %cst_56 [0] : vector<256x4xf32> to vector<4xf32>
    %111 = vector.shape_cast %110 : vector<4xf32> to vector<1x4xf32>
    %cst_57 = arith.constant 3.906250e-03 : f32
    %112 = vector.broadcast %cst_57 : f32 to vector<1x4xf32>
    %113 = arith.mulf %111, %112 : vector<1x4xf32>
    %114 = vector.broadcast %113 : vector<1x4xf32> to vector<256x4xf32>
    %115 = arith.subf %109, %114 : vector<256x4xf32>
    %116 = arith.mulf %115, %115 : vector<256x4xf32>
    %cst_58 = arith.constant dense<0.000000e+00> : vector<4xf32>
    %117 = vector.multi_reduction <add>, %116, %cst_58 [0] : vector<256x4xf32> to vector<4xf32>
    %118 = vector.shape_cast %117 : vector<4xf32> to vector<1x4xf32>
    %cst_59 = arith.constant 3.906250e-03 : f32
    %119 = vector.broadcast %cst_59 : f32 to vector<1x4xf32>
    %120 = arith.mulf %118, %119 : vector<1x4xf32>
    %cst_60 = arith.constant 9.99999974E-6 : f32
    %121 = vector.broadcast %cst_60 : f32 to vector<1x4xf32>
    %122 = arith.addf %120, %121 : vector<1x4xf32>
    %123 = math.rsqrt %122 : vector<1x4xf32>
    %124 = vector.broadcast %123 : vector<1x4xf32> to vector<256x4xf32>
    %125 = arith.mulf %115, %124 : vector<256x4xf32>
    %c0_61 = arith.constant 0 : index
    %c0_62 = arith.constant 0 : index
    %c0_63 = arith.constant 0 : index
    %c0_64 = arith.constant 0 : index
    %126 = vector.load %arg1[%c0_61, %c0_62, %c0_63, %c0_64] : memref<1x16x16x4xf32, #tpu.memory_space<vmem>>, vector<1x16x16x4xf32>
    %127 = vector.shape_cast %126 : vector<1x16x16x4xf32> to vector<16x16x4xf32>
    %128 = vector.shape_cast %125 : vector<256x4xf32> to vector<16x16x4xf32>
    %129 = arith.addf %127, %128 : vector<16x16x4xf32>
    %c0_65 = arith.constant 0 : index
    %c0_66 = arith.constant 0 : index
    %c0_67 = arith.constant 0 : index
    %c0_68 = arith.constant 0 : index
    %130 = vector.load %arg4[%c0_65, %c0_66, %c0_67, %c0_68] : memref<1x16x16x4xf32, #tpu.memory_space<vmem>>, vector<1x16x16x4xf32>
    %131 = vector.shape_cast %130 : vector<1x16x16x4xf32> to vector<16x16x4xf32>
    %132 = vector.shape_cast %129 : vector<16x16x4xf32> to vector<1x16x16x4xf32>
    tpu.vector_store %arg4[%c0_65, %c0_66, %c0_67, %c0_68], %132 {strides = array<i32>} : memref<1x16x16x4xf32, #tpu.memory_space<vmem>>, vector<1x16x16x4xf32>,
    return
  }
  func.func @transform_0(%arg0: i32) -> (i32, i32, i32, i32) {
    %c0_i32 = arith.constant 0 : i32
    %c0_i32_0 = arith.constant 0 : i32
    %c0_i32_1 = arith.constant 0 : i32
    %c0_i32_2 = arith.constant 0 : i32
    return %arg0, %c0_i32, %c0_i32_0, %c0_i32_1 : i32, i32, i32, i32
  }
  func.func @transform_1(%arg0: i32) -> (i32, i32, i32) {
    %c0_i32 = arith.constant 0 : i32
    %c0_i32_0 = arith.constant 0 : i32
    %c0_i32_1 = arith.constant 0 : i32
    %c0_i32_2 = arith.constant 0 : i32
    return %c0_i32, %c0_i32_0, %c0_i32_1 : i32, i32, i32
  }
  func.func @transform_2(%arg0: i32) -> (i32, i32, i32) {
    %c0_i32 = arith.constant 0 : i32
    %c0_i32_0 = arith.constant 0 : i32
    %c0_i32_1 = arith.constant 0 : i32
    %c0_i32_2 = arith.constant 0 : i32
    return %c0_i32, %c0_i32_0, %c0_i32_1 : i32, i32, i32
  }
  func.func @transform_3(%arg0: i32) -> (i32, i32, i32, i32) {
    %c0_i32 = arith.constant 0 : i32
    %c0_i32_0 = arith.constant 0 : i32
    %c0_i32_1 = arith.constant 0 : i32
    %c0_i32_2 = arith.constant 0 : i32
    return %arg0, %c0_i32, %c0_i32_0, %c0_i32_1 : i32, i32, i32, i32
  }
}

</mosaic_0001>

<bundles_post_ra>
// kernel: resnet_block_forward.1
= control target key start
LH: loop header
LB: loop body
LE: loop exit
PB: predicated region body
PF: predicated region fallthrough
CT: control target
= control target key end

     0   :  { %8 = vsyncpa [#allocation4], 0  ;;  %s8967_s0 = inlined_call_operand.hbm [shape: f32[2,16,16,4], index: 0, kind: input, shape index: {}]   ;;  %s8968_s1 = inlined_call_operand.hbm [shape: f32[3,12,4], index: 1, kind: input, shape index: {}]   ;;  %s8969_s2 = inlined_call_operand.hbm [shape: f32[3,12,4], index: 2, kind: input, shape index: {}]   ;;  %s8970_s3 = inlined_call_operand.hbm [shape: f32[2,16,16,4], index: 3, kind: output, shape index: {}]  }
   0x1   :  { %10 = vsyncpa [#allocation4 + $0x1], 0 }
   0x2   :  { %11 = vsyncpa [#allocation7], 0 }
   0x3   :  { %12 = vsyncpa [#allocation5], 0 }
   0x4   :  { %14 = vsyncpa [#allocation5 + $0x1], 0  ;;  %s5386_s12 = smov 0   ;;  %s5388_s13 = smov 0  }
   0x5   :  { %s5390_s14 = smov 0   ;;  %s5392_s15 = smov 0  }
   0x6 LB: > { %s5407_s16 = sadd.s32 4294967295, %s5354_s15   ;;  %s4223_s17 = sadd.s32 4294967294, %s5354_s15   ;;  %s5354_s15 = sphi %s5392_s15, %s9166_s15   ;;  %s5350_s14 = sphi %s5390_s14, %s9165_s14   ;;  %s5346_s13 = sphi %s5388_s13, %s9164_s13   ;;  %s5342_s12 = sphi %s5386_s12, %s9163_s12  }
   0x7   : > { %p40_p0 = scmp.ne.s32.totalorder %s5346_s13, %s5342_s12  ;;  %p8971_p1 = scmp.eq.s32.totalorder %s5407_s16, 0 }
   0x8   : > { %p112_p3 = scmp.eq.s32.totalorder %s4223_s17, 1  ;;  %p4224_p5 = scmp.ge.s32.totalorder %s5354_s15, 1 }
   0x9   : > { %p5416_p4 = por %p8971_p1, %p40_p0  ;;  %p119_p7 = scmp.lt.s32.totalorder %s5354_s15, 3 }
   0xa   : > { %p5421_p6 = por %p112_p3, %p40_p0  ;;  %s5356_s21 = smov [#allocation6]  }
   0xb   : > { %s8976_s18 = scalar_select %p5416_p4, 1, 0 }
   0xc   : > { %s8977_s19 = scalar_select %p5421_p6, 1, 0 }
   0xd   : > { %p5426_p8 = pnand %p4224_p5, %p119_p7  ;;  %s131_s22 = sshll.u32 %s5356_s21, 4  ;;  %s5430_s22 = int_to_ptr.vmem [resolvable:$true] %s131_s22 }
   0xe   : > { %s5357_s24 = smov [#allocation8]   ;;  %s5198_s28 = scalar_lea.hbm %s8968_s1, 768 }
   0xf   : > { %p5133_p9 = pneg %p5426_p8  ;;  %s144_s25 = sshll.u32 %s5357_s24, 4  ;;  %s5441_s25 = int_to_ptr.vmem [resolvable:$true] %s144_s25 }
  0x10   : > { %p5199_p12 = scmp.ne.s32.totalorder %s8968_s1, %s5198_s28  ;;  %p5205_p5 = scmp.lt.u32.totalorder %s5198_s28, %s8968_s1 }
  0x11   : > { %p5437_p11 = pnand %p5133_p9, %p8971_p1 }
  0x13   : > { %p5200_p13 = pneg %p5437_p11 }
  0x15   : > { %p5201_p0 = pnand %p5200_p13, %p5199_p12 }
  0x17   : > { %p5202_p3 = pneg %p5201_p0 }
  0x19   : > { %p5207_p7 = pnand %p5205_p5, %p5202_p3 }
  0x1b   : > { %5210 = shalt.err (!%p5207_p7)
}
  0x1c   : > { %s5211_s6 = scalar_lea.vmem %s5430_s22, 768  ;;  %p5219_p2 = scmp.lt.s32.totalorder %s5430_s22, %s5430_s22 }
  0x1d   : > { %p5212_p9 = scmp.ne.s32.totalorder %s5430_s22, %s5211_s6  ;;  %p5220_p12 = scmp.lt.s32.totalorder %s5211_s6, %s5211_s6 }
  0x1f   : > { %p5214_p10 = pnand %p5212_p9, %p5200_p13  ;;  %p5221_p0 = por %p5220_p12, %p5219_p2 }
  0x21   : > { %p5215_p1 = pneg %p5214_p10 }
  0x23   : > { %p5222_p6 = pnand %p5221_p0, %p5215_p1 }
  0x25   : > { %5225 = shalt.err (!%p5222_p6)
}
  0x26   : > { %s5358_s7 = smov 128   ;;  %s5359_s8 = smov 8  }
  0x27   : > { %5136 = dma.hbm_to_vmem [thread:$0]  (!%p5437_p11), %s8968_s1, 768, %s5430_s22, [#allocation7], %s5358_s7, %s5358_s7, %s5359_s8  }
  0x28   : > { %s5226_s21 = scalar_lea.hbm %s8969_s2, 768 }
  0x29   : > { %p5227_p1 = scmp.ne.s32.totalorder %s8969_s2, %s5226_s21  ;;  %p5233_p10 = scmp.lt.u32.totalorder %s5226_s21, %s8969_s2 }
  0x2b   : > { %p5229_p2 = pnand %p5227_p1, %p5200_p13 }
  0x2d   : > { %p5230_p6 = pneg %p5229_p2 }
  0x2f   : > { %p5235_p3 = pnand %p5233_p10, %p5230_p6 }
  0x31   : > { %5238 = shalt.err (!%p5235_p3)
}
  0x32   : > { %s5239_s22 = scalar_lea.vmem %s5441_s25, 768  ;;  %p5247_p12 = scmp.lt.s32.totalorder %s5441_s25, %s5441_s25 }
  0x33   : > { %p5240_p5 = scmp.ne.s32.totalorder %s5441_s25, %s5239_s22  ;;  %p5248_p0 = scmp.lt.s32.totalorder %s5239_s22, %s5239_s22 }
  0x35   : > { %p5242_p7 = pnand %p5240_p5, %p5200_p13  ;;  %p5249_p1 = por %p5248_p0, %p5247_p12 }
  0x37   : > { %p5243_p9 = pneg %p5242_p7 }
  0x39   : > { %p5250_p2 = pnand %p5249_p1, %p5243_p9 }
  0x3b   : > { %5253 = shalt.err (!%p5250_p2)
}
  0x3c   : > { %5139 = dma.hbm_to_vmem [thread:$0]  (!%p5437_p11), %s8969_s2, 768, %s5441_s25, [#allocation7], %s5358_s7, %s5358_s7, %s5359_s8  }
  0x3d   : > { %s5502_s23 = sadd.s32 1, %s5354_s15   ;;  %s27_s4 = sadd.s32 1, %s5350_s14 }
  0x3e   : > { %s24_s5 = ssub.s32 %s5354_s15, %s5502_s23  ;;  %p34_p13 = scmp.ne.s32.totalorder %s5350_s14, %s5346_s13 }
  0x3f   : > { %p25_p6 = scmp.eq.s32.totalorder %s24_s5, 0  ;;  %p35_p10 = scmp.eq.s32.totalorder %s5354_s15, 0 }
  0x40   : > { %p8980_p3 = scmp.eq.s32.totalorder %s5407_s16, 1  ;;  %p5150_p7 = scmp.lt.s32.totalorder %s5354_s15, 2 }
  0x41   : > { %s5518_s9 = scalar_select %p25_p6, %s5350_s14, %s27_s4  }
  0x42   : > { %p5512_p5 = por %p8980_p3, %p34_p13  ;;  %p36_p9 = por %p35_p10, %p34_p13 }
  0x43   : > { %s158_s10 = sand.u32 1, %s5350_s14   ;;  %s4439_s25 = sshll.u32 %s5354_s15, 12 }
  0x44   : > { %s8981_s6 = scalar_select %p5512_p5, 1, 0 }
  0x45   : > { %s4228_s11 = sshll.u32 %s158_s10, 8  ;;  %s5525_s24 = scalar_lea.hbm %s8967_s0, %s4439_s25 }
  0x46   : > { %s162_s26 = scalar_lea.vmem [#allocation3], %s4228_s11  ;;  %p5529_p11 = pnand %p5150_p7, %p36_p9 }
  0x47   : > { %s169_s27 = sshll.u32 %s162_s26, 4  ;;  %s5533_s22 = scalar_lea.sflag [#allocation4], %s158_s10  ;;  %s5527_s27 = int_to_ptr.vmem [resolvable:$true] %s169_s27 }
  0x48   : > { %s5254_s29 = scalar_lea.hbm %s5525_s24, 4096  ;;  %p5256_p0 = pneg %p5529_p11 }
  0x49   : > { %p5255_p12 = scmp.ne.s32.totalorder %s5525_s24, %s5254_s29  ;;  %s5259_s5 = scalar_lea.hbm %s8967_s0, 8192 }
  0x4a   : > { %p5260_p13 = scmp.lt.u32.totalorder %s5525_s24, %s8967_s0  ;;  %p5261_p6 = scmp.lt.u32.totalorder %s5259_s5, %s5254_s29 }
  0x4b   : > { %p5257_p1 = pnand %p5256_p0, %p5255_p12  ;;  %p5263_p3 = scmp.lt.u32.totalorder %s5254_s29, %s5525_s24 }
  0x4c   : > { %p5262_p10 = por %p5261_p6, %p5260_p13 }
  0x4d   : > { %p5258_p2 = pneg %p5257_p1 }
  0x4e   : > { %p5264_p7 = por %p5263_p3, %p5262_p10 }
  0x50   : > { %p5265_p9 = pnand %p5264_p7, %p5258_p2 }
  0x52   : > { %5268 = shalt.err (!%p5265_p9)
}
  0x53   : > { %s5269_s10 = scalar_lea.vmem %s5527_s27, 4096  ;;  %s5360_s17 = smov [#allocation3]  }
  0x54   : > { %p5270_p12 = scmp.ne.s32.totalorder %s5527_s27, %s5269_s10  ;;  %s5274_s21 = sshll.u32 %s5360_s17, 4  ;;  %s5275_s21 = int_to_ptr.vmem [resolvable:$false] %s5274_s21 }
  0x55   : > { %s5276_s26 = scalar_lea.vmem %s5275_s21, 8192  ;;  %p5277_p4 = scmp.lt.s32.totalorder %s5527_s27, %s5275_s21 }
  0x56   : > { %p5272_p1 = pnand %p5270_p12, %p5256_p0  ;;  %p5278_p13 = scmp.lt.s32.totalorder %s5276_s26, %s5269_s10 }
  0x58   : > { %p5273_p5 = pneg %p5272_p1  ;;  %p5279_p6 = por %p5278_p13, %p5277_p4 }
  0x5a   : > { %p5280_p10 = pnand %p5279_p6, %p5273_p5 }
  0x5c   : > { %5283 = shalt.err (!%p5280_p10)
}
  0x5d   : > { %5143 = dma.hbm_to_vmem [thread:$0]  (!%p5529_p11), %s5525_s24, 4096, %s5527_s27, %s5533_s22, %s5358_s7, %s5358_s7, %s5359_s8  }
  0x5e   : > { %181 = sbr.rel (%p5426_p8) target bundleno = 1590 (0x636), region = 32 }
  0x65   : > { %s5567_s29 = sand.u32 1, %s5346_s13   ;;  %p8983_p4 = scmp.ne.s32.totalorder %s8976_s18, 0 }
  0x66   : > { %s4232_s30 = sshll.u32 %s5567_s29, 8  ;;  %s184_s4 = scalar_lea.sflag [#allocation4], %s5567_s29 }
  0x67   : > { %s5573_s28 = scalar_lea.vmem [#allocation3], %s4232_s30 }
  0x68   : > { %5329 = dma.done.wait (%p8983_p4), %s184_s4, 4096  }
  0x69   : > { %5331 = vsyncadd (%p8983_p4), %s184_s4, 4294963200  ;;  %p8984_p5 = scmp.eq.s32.totalorder %s5407_s16, 0 }
  0x6b   : > { %5333 = dma.done.wait (%p8984_p5), [#allocation7], 1536   ;;  %p8985_p8 = pmov %p8984_p5 }
  0x6c   : > { %vm258_vm0 = vcmask 31744   ;;  %v228_v0 = vld [vmem:[%s5573_s28 + $0x18] sm:$0xff]  ;;  %v225_v1 = vld [vmem:[%s5573_s28] sm:$0xff]  ;;  %v230_v2 = vld [vmem:[%s5573_s28 + $0x28] sm:$0xff]  ;;  %v218_v6 = vlaneseq  ;;  %s5361_s18 = smov 4   ;;  %s5362_s20 = smov 8  }
  0x6d   : > { %5335 = vsyncadd (%p8985_p8), [#allocation7], 4294965760  ;;  %262 = vst.msk [vmem:[#allocation2 + $0x28] sm:$0xff] %vm258_vm0, %v228_v0  ;;  %v226_v3 = vld [vmem:[%s5573_s28 + $0x8] sm:$0xff]  ;;  %v227_v4 = vld [vmem:[%s5573_s28 + $0x10] sm:$0xff]  ;;  %vm1137_vm3 = vcmask 1043456  }
  0x6e   : > { %292 = vst.msk [vmem:[#allocation2 + $0x8] sm:$0xff] %vm258_vm0, %v228_v0  ;;  %259 = vst.msk [vmem:[#allocation2 + $0x10] sm:$0xff] %vm258_vm0, %v225_v1  ;;  %v229_v5 = vld [vmem:[%s5573_s28 + $0x20] sm:$0xff]  ;;  %v231_v7 = vld [vmem:[%s5573_s28 + $0x30] sm:$0xff]  ;;  %v5618_v19 = vshrl.u32 %v218_v6, 7  ;;  %vm5363_vm4 = vmmov 1  }
  0x6f   : > { %264 = vst.msk [vmem:[#allocation2 + $0x38] sm:$0xff] %vm258_vm0, %v230_v2  ;;  %260 = vst.msk [vmem:[#allocation2 + $0x18] sm:$0xff] %vm258_vm0, %v226_v3  ;;  %v232_v8 = vld [vmem:[%s5573_s28 + $0x38] sm:$0xff]  ;;  %v233_v9 = vld [vmem:[%s5573_s28 + $0x40] sm:$0xff]  ;;  %vm982_vm8 = vcmask 64512   ;;  %vm1040_vm9 = vcmask 97280  }
  0x70   : > { %261 = vst.msk [vmem:[#allocation2 + $0x20] sm:$0xff] %vm258_vm0, %v227_v4  ;;  %291 = vst.msk [vmem:[#allocation2] sm:$0xff] %vm258_vm0, %v227_v4  ;;  %v234_v10 = vld [vmem:[%s5573_s28 + $0x48] sm:$0xff]  ;;  %v235_v11 = vld [vmem:[%s5573_s28 + $0x50] sm:$0xff]  ;;  %v5650_v32 = vsub.s32 6, %v5618_v19  ;;  %vm549_vm1 = vcmp.lt.s32.totalorder %v5618_v19, 7 }
  0x71   : > { %263 = vst.msk [vmem:[#allocation2 + $0x30] sm:$0xff] %vm258_vm0, %v229_v5  ;;  %265 = vst.msk [vmem:[#allocation2 + $0x40] sm:$0xff] %vm258_vm0, %v231_v7  ;;  %v236_v12 = vld [vmem:[%s5573_s28 + $0x58] sm:$0xff]  ;;  %v237_v13 = vld [vmem:[%s5573_s28 + $0x60] sm:$0xff]  ;;  %v5654_v33 = vadd.s32 8, %v5618_v19  ;;  %vm368_vm6 = vcmp.lt.s32.totalorder %v5618_v19, 1 }
  0x72   : > { %266 = vst.msk [vmem:[#allocation2 + $0x48] sm:$0xff] %vm258_vm0, %v232_v8  ;;  %267 = vst.msk [vmem:[#allocation2 + $0x50] sm:$0xff] %vm258_vm0, %v233_v9  ;;  %v238_v14 = vld [vmem:[%s5573_s28 + $0x68] sm:$0xff]  ;;  %v239_v15 = vld [vmem:[%s5573_s28 + $0x70] sm:$0xff]  ;;  %vm221_vm7 = vcmp.eq.s32.totalorder %v5618_v19, 0  ;;  %s8763_s7 = scalar_lea.vmem [#allocation9], %s4232_s30 }
  0x73   : > { %268 = vst.msk [vmem:[#allocation2 + $0x58] sm:$0xff] %vm258_vm0, %v234_v10  ;;  %269 = vst.msk [vmem:[#allocation2 + $0x60] sm:$0xff] %vm258_vm0, %v235_v11  ;;  %v240_v16 = vld [vmem:[%s5573_s28 + $0x78] sm:$0xff]  ;;  %v241_v17 = vld [vmem:[%s5573_s28 + $0x80] sm:$0xff]  ;;  %vm224_vm2 = vcmp.eq.s32.totalorder %v5654_v33, 15  ;;  %s4440_s8 = sshll.u32 %s5407_s16, 12 }
  0x74   : > { %270 = vst.msk [vmem:[#allocation2 + $0x68] sm:$0xff] %vm258_vm0, %v236_v12  ;;  %271 = vst.msk [vmem:[#allocation2 + $0x70] sm:$0xff] %vm258_vm0, %v237_v13  ;;  %v242_v18 = vld [vmem:[%s5573_s28 + $0x88] sm:$0xff]  ;;  %v243_v20 = vld [vmem:[%s5573_s28 + $0x90] sm:$0xff]  ;;  %s4131_s24 = sshll.u32 %s8763_s7, 4  ;;  %s8892_s5 = scalar_lea.hbm %s8970_s3, %s4440_s8  ;;  %s8906_s24 = int_to_ptr.vmem [resolvable:$true] %s4131_s24 }
  0x75   : > { %272 = vst.msk [vmem:[#allocation2 + $0x78] sm:$0xff] %vm258_vm0, %v238_v14  ;;  %273 = vst.msk [vmem:[#allocation2 + $0x80] sm:$0xff] %vm258_vm0, %v239_v15  ;;  %v244_v21 = vld [vmem:[%s5573_s28 + $0x98] sm:$0xff]  ;;  %v245_v22 = vld [vmem:[%s5573_s28 + $0xa0] sm:$0xff]  ;;  %s4118_s16 = scalar_lea.sflag [#allocation5], %s5567_s29  ;;  %s5284_s11 = scalar_lea.vmem %s8906_s24, 4096 }
  0x76   : > { %274 = vst.msk [vmem:[#allocation2 + $0x88] sm:$0xff] %vm258_vm0, %v240_v16  ;;  %275 = vst.msk [vmem:[#allocation2 + $0x90] sm:$0xff] %vm258_vm0, %v241_v17  ;;  %v246_v23 = vld [vmem:[%s5573_s28 + $0xa8] sm:$0xff]  ;;  %v247_v24 = vld [vmem:[%s5573_s28 + $0xb0] sm:$0xff]  ;;  %p5285_p11 = scmp.ne.s32.totalorder %s8906_s24, %s5284_s11  ;;  %p9160_p0 = scmp.ne.s32.totalorder %s8981_s6, 0 }
  0x77   : > { %276 = vst.msk [vmem:[#allocation2 + $0x98] sm:$0xff] %vm258_vm0, %v242_v18  ;;  %277 = vst.msk [vmem:[#allocation2 + $0xa0] sm:$0xff] %vm258_vm0, %v243_v20  ;;  %v248_v25 = vld [vmem:[%s5573_s28 + $0xb8] sm:$0xff]  ;;  %v5632_v26 = vld [vmem:[#allocation2 + $0x28] sm:$0xff]  ;;  %s5364_s25 = smov [#allocation9]  }
  0x78   : > { %278 = vst.msk [vmem:[#allocation2 + $0xa8] sm:$0xff] %vm258_vm0, %v244_v21  ;;  %279 = vst.msk [vmem:[#allocation2 + $0xb0] sm:$0xff] %vm258_vm0, %v245_v22  ;;  %v5634_v27 = vld [vmem:[#allocation2 + $0x10] sm:$0xff]  ;;  %736 = vrot.lane.b32.xlu1 %v5632_v26, %s5361_s18  ;;  %v5643_v28 = vld [vmem:[#allocation2 + $0x18] sm:$0xff]  ;;  %v533_v39 = vrot.slane %v5632_v26, 1  ;;  %v597_v47 = vrot.slane %v5632_v26, %v5650_v32  ;;  %p5286_p2 = pnand %p5285_p11, %p9160_p0  ;;  %s5288_s10 = sshll.u32 %s5364_s25, 4  ;;  %s5289_s10 = int_to_ptr.vmem [resolvable:$false] %s5288_s10 }
  0x79   : > { %280 = vst.msk [vmem:[#allocation2 + $0xb8] sm:$0xff] %vm258_vm0, %v246_v23  ;;  %281 = vst.msk [vmem:[#allocation2 + $0xc0] sm:$0xff] %vm258_vm0, %v247_v24  ;;  %730 = vrot.lane.b32.xlu0 %v5634_v27, %s5361_s18  ;;  %v5645_v29 = vld [vmem:[#allocation2 + $0x38] sm:$0xff]  ;;  %v514_v30 = vrot.slane %v5634_v27, 1  ;;  %v532_v31 = vrot.slane %v5643_v28, 1  ;;  %v5660_v34 = vld [vmem:[#allocation2 + $0x20] sm:$0xff]  ;;  %v593_v36 = vrot.slane %v5643_v28, %v5650_v32  ;;  %p5291_p7 = scmp.lt.s32.totalorder %s8906_s24, %s5289_s10 }
  0x7a   : > { %282 = vst.msk [vmem:[#allocation2 + $0xc8] sm:$0xff] %vm258_vm0, %v248_v25  ;;  %8986 = vst [vmem:[#allocation13_spill] sm:$0xff] %v5650_v32  ;;  %v515_v38 = vrot.slane %v5660_v34, 1  ;;  %v249_v40 = vld [vmem:[%s5573_s28 + $0xc0] sm:$0xff]  ;;  %v250_v41 = vld [vmem:[%s5573_s28 + $0xc8] sm:$0xff]  ;;  %v534_v53 = vrot.slane %v5645_v29, 1  ;;  %v601_v56 = vrot.slane %v5645_v29, %v5650_v32  ;;  %p5287_p3 = pneg %p5286_p2 }
  0x7b   : > { %8987 = vst [vmem:[#allocation14_spill] sm:$0xff] %v5654_v33  ;;  %v551_v35 = vsel %vm549_vm1, %v514_v30, %v532_v31  ;;  %v569_v37 = vsel %vm549_vm1, %v532_v31, %v514_v30  ;;  %v251_v42 = vld [vmem:[%s5573_s28 + $0xd0] sm:$0xff]  ;;  %283 = vst.msk [vmem:[#allocation2 + $0xd0] sm:$0xff] %vm258_vm0, %v249_v40  ;;  %v252_v44 = vld [vmem:[%s5573_s28 + $0xd8] sm:$0xff]  ;;  %s5290_s17 = scalar_lea.vmem %s5289_s10, 8192 }
  0x7c   : > { %740 = vrot.lane.b32.xlu1 %v5645_v29, %s5361_s18  ;;  %v5677_v43 = vld [vmem:[#allocation2 + $0x30] sm:$0xff]  ;;  %284 = vst.msk [vmem:[#allocation2 + $0xd8] sm:$0xff] %vm258_vm0, %v250_v41  ;;  %285 = vst.msk [vmem:[#allocation2 + $0xe0] sm:$0xff] %vm258_vm0, %v251_v42  ;;  %v253_v45 = vld [vmem:[%s5573_s28 + $0xe0] sm:$0xff]  ;;  %v661_v46 = vsel %vm224_vm2, %v593_v36, %v569_v37  ;;  %v570_v51 = vsel %vm549_vm1, %v533_v39, %v515_v38  ;;  %v552_v54 = vsel %vm549_vm1, %v515_v38, %v533_v39  ;;  %p5292_p9 = scmp.lt.s32.totalorder %s5290_s17, %s5284_s11 }
  0x7d   : > { %732 = vrot.lane.b32.xlu0 %v5643_v28, %s5361_s18  ;;  %286 = vst.msk [vmem:[#allocation2 + $0xe8] sm:$0xff] %vm258_vm0, %v252_v44  ;;  %287 = vst.msk [vmem:[#allocation2 + $0xf0] sm:$0xff] %vm258_vm0, %v253_v45  ;;  %v254_v48 = vld [vmem:[%s5573_s28 + $0xe8] sm:$0xff]  ;;  %v255_v49 = vld [vmem:[%s5573_s28 + $0xf0] sm:$0xff]  ;;  %v516_v52 = vrot.slane %v5677_v43, 1  ;;  %v663_v55 = vsel %vm224_vm2, %v597_v47, %v570_v51 }
  0x7e   : > { %294 = vst.msk [vmem:[#allocation2 + $0x110] sm:$0xff] %vm258_vm0, %v253_v45  ;;  %v256_v50 = vld [vmem:[%s5573_s28 + $0xf8] sm:$0xff]  ;;  %288 = vst.msk [vmem:[#allocation2 + $0xf8] sm:$0xff] %vm258_vm0, %v254_v48  ;;  %v5713_v58 = vld [vmem:[#allocation2 + $0x40] sm:$0xff]  ;;  %p5293_p12 = por %p5292_p9, %p5291_p7 }
  0x7f   : > { %295 = vst.msk [vmem:[#allocation2 + $0x118] sm:$0xff] %vm258_vm0, %v254_v48  ;;  %289 = vst.msk [vmem:[#allocation2 + $0x100] sm:$0xff] %vm258_vm0, %v255_v49  ;;  %v571_v57 = vsel %vm549_vm1, %v534_v53, %v516_v52  ;;  %v5715_v59 = vld [vmem:[#allocation2 + $0x48] sm:$0xff]  ;;  %v553_v60 = vsel %vm549_vm1, %v516_v52, %v534_v53  ;;  %v517_v62 = vrot.slane %v5713_v58, 1  ;;  %v5731_v2 = vld [vmem:[#allocation2 + $0x50] sm:$0xff] }
  0x80   : > { %858 = vrot.lane.b32.xlu1 %v551_v35, %s5362_s20  ;;  %290 = vst.msk [vmem:[#allocation2 + $0x108] sm:$0xff] %vm258_vm0, %v256_v50  ;;  %v665_v61 = vsel %vm224_vm2, %v601_v56, %v571_v57  ;;  %v535_v63 = vrot.slane %v5715_v59, 1  ;;  %v605_v0 = vrot.slane %v5715_v59, %v5650_v32  ;;  %v5733_v3 = vld [vmem:[#allocation2 + $0x58] sm:$0xff]  ;;  %v1038_v4 = vld [vmem:[#allocation6 + $0x10] sm:$0xff]  ;;  %v518_v8 = vrot.slane %v5731_v2, 1  ;;  %vm5745_vm5 = vmpackc.low %vm1137_vm3, %vm5363_vm4  ;;  %p5294_p1 = pnand %p5293_p12, %p5287_p3 }
  0x81   : > { %734 = vrot.lane.b32.xlu0 %v5660_v34, %s5361_s18  ;;  %v1039_v5 = vld [vmem:[#allocation6 + $0x18] sm:$0xf]  ;;  %v536_v9 = vrot.slane %v5733_v3, 1  ;;  %v609_v12 = vrot.slane %v5733_v3, %v5650_v32  ;;  %v5759_v14 = vld [vmem:[#allocation2 + $0x60] sm:$0xff]  ;;  %v5761_v15 = vld [vmem:[#allocation2 + $0x68] sm:$0xff] }
  0x82   : > { %v572_v1 = vsel %vm549_vm1, %v535_v63, %v517_v62  ;;  %v554_v6 = vsel %vm549_vm1, %v517_v62, %v535_v63  ;;  %v4957_v10 = vpack.c.bf16 %v1039_v5, %v1038_v4  ;;  %v519_v18 = vrot.slane %v5759_v14, 1  ;;  %v5779_v23 = vld [vmem:[#allocation2 + $0x70] sm:$0xff]  ;;  %v5781_v24 = vld [vmem:[#allocation2 + $0x78] sm:$0xff]  ;;  %v5799_v38 = vld [vmem:[#allocation2 + $0x80] sm:$0xff] }
  0x83   : > { %v667_v7 = vsel %vm224_vm2, %v605_v0, %v572_v1  ;;  %v573_v13 = vsel %vm549_vm1, %v536_v9, %v518_v8  ;;  %v555_v16 = vsel %vm549_vm1, %v518_v8, %v536_v9  ;;  %v537_v20 = vrot.slane %v5761_v15, 1  ;;  %v5801_v39 = vld [vmem:[#allocation2 + $0x88] sm:$0xff]  ;;  %v5819_v47 = vld [vmem:[#allocation2 + $0x90] sm:$0xff]  ;;  %v5821_v48 = vld [vmem:[#allocation2 + $0x98] sm:$0xff] }
  0x84   : > { %860 = vrot.lane.b32.xlu1 %v661_v46, %s5362_s20  ;;  %4959 = vmatprep.subr.msk.bf16.mxu0 %vm5745_vm5, %v4957_v10  ;;  %v669_v17 = vsel %vm224_vm2, %v609_v12, %v573_v13  ;;  %v613_v21 = vrot.slane %v5761_v15, %v5650_v32  ;;  %v520_v31 = vrot.slane %v5779_v23, 1  ;;  %v538_v35 = vrot.slane %v5781_v24, 1  ;;  %v1015_v49 = vld [vmem:[#allocation6] sm:$0xff]  ;;  %v1016_v50 = vld [vmem:[#allocation6 + $0x8] sm:$0xf] }
  0x85   : > { %738 = vrot.lane.b32.xlu0 %v5677_v43, %s5361_s18  ;;  %4962 = vmatpush3.bf16.msk.msra.mxu0 %vm5745_vm5, %v4957_v10  ;;  %v574_v22 = vsel %vm549_vm1, %v537_v20, %v519_v18  ;;  %v556_v25 = vsel %vm549_vm1, %v519_v18, %v537_v20  ;;  %v617_v36 = vrot.slane %v5781_v24, %v5650_v32  ;;  %v521_v42 = vrot.slane %v5799_v38, 1  ;;  %v5886_v18 = vld [vmem:[#allocation2 + $0xc8] sm:$0xff] }
  0x86   : > { %v671_v30 = vsel %vm224_vm2, %v613_v21, %v574_v22  ;;  %v575_v37 = vsel %vm549_vm1, %v538_v35, %v520_v31  ;;  %v557_v40 = vsel %vm549_vm1, %v520_v31, %v538_v35  ;;  %v539_v44 = vrot.slane %v5801_v39, 1  ;;  %v5904_v35 = vld [vmem:[#allocation2 + $0xd0] sm:$0xff] }
  0x87   : > { %v673_v41 = vsel %vm224_vm2, %v617_v36, %v575_v37  ;;  %v621_v45 = vrot.slane %v5801_v39, %v5650_v32  ;;  %v5831_v53 = vpack.c.bf16 %v1016_v50, %v1015_v49  ;;  %v625_v56 = vrot.slane %v5821_v48, %v5650_v32  ;;  %v5906_v36 = vld [vmem:[#allocation2 + $0xd8] sm:$0xff]  ;;  %v5926_v49 = vld [vmem:[#allocation2 + $0xe8] sm:$0xff] }
  0x88   : > { %864 = vrot.lane.b32.xlu1 %v663_v55, %s5362_s20  ;;  %v576_v46 = vsel %vm549_vm1, %v539_v44, %v521_v42  ;;  %v558_v51 = vsel %vm549_vm1, %v521_v42, %v539_v44  ;;  %v540_v55 = vrot.slane %v5821_v48, 1  ;;  %v544_v42 = vrot.slane %v5906_v36, 1 }
  0x89   : > { %862 = vrot.lane.b32.xlu0 %v552_v54, %s5362_s20  ;;  %v675_v52 = vsel %vm224_vm2, %v621_v45, %v576_v46  ;;  %v522_v54 = vrot.slane %v5819_v47, 1  ;;  %4965 = vmatprep.subr.msk.bf16.mxu0 %vm5745_vm5, %v5831_v53  ;;  %v641_v44 = vrot.slane %v5906_v36, %v5650_v32  ;;  %v5924_v46 = vld [vmem:[#allocation2 + $0xe0] sm:$0xff] }
  0x8b   : > { %v577_v57 = vsel %vm549_vm1, %v540_v55, %v522_v54  ;;  %v559_v62 = vsel %vm549_vm1, %v522_v54, %v540_v55  ;;  %v545_v54 = vrot.slane %v5926_v49, 1  ;;  %v645_v55 = vrot.slane %v5926_v49, %v5650_v32 }
  0x8c   : > { %868 = vrot.lane.b32.xlu1 %v665_v61, %s5362_s20  ;;  %v5846_v61 = vld [vmem:[#allocation2 + $0xa8] sm:$0xff]  ;;  %v677_v63 = vsel %vm224_vm2, %v625_v56, %v577_v57  ;;  %v5944_v57 = vld [vmem:[#allocation2 + $0xf0] sm:$0xff] }
  0x8d   : > { %866 = vrot.lane.b32.xlu0 %v553_v60, %s5362_s20  ;;  %v5844_v60 = vld [vmem:[#allocation2 + $0xa0] sm:$0xff]  ;;  %v541_v1 = vrot.slane %v5846_v61, 1  ;;  %v629_v4 = vrot.slane %v5846_v61, %v5650_v32 }
  0x8e   : > { %v523_v0 = vrot.slane %v5844_v60, 1 }
  0x90   : > { %744 = vrot.lane.b32.xlu1 %v5715_v59, %s5361_s18  ;;  %v578_v5 = vsel %vm549_vm1, %v541_v1, %v523_v0  ;;  %v560_v8 = vsel %vm549_vm1, %v523_v0, %v541_v1  ;;  %v528_v1 = vrot.slane %v5944_v57, 1 }
  0x91   : > { %742 = vrot.lane.b32.xlu0 %v5713_v58, %s5361_s18  ;;  %v679_v9 = vsel %vm224_vm2, %v629_v4, %v578_v5 }
  0x94   : > { %872 = vrot.lane.b32.xlu1 %v667_v7, %s5362_s20  ;;  %v5866_v7 = vld [vmem:[#allocation2 + $0xb8] sm:$0xff] }
  0x95   : > { %870 = vrot.lane.b32.xlu0 %v554_v6, %s5362_s20  ;;  %v5864_v6 = vld [vmem:[#allocation2 + $0xb0] sm:$0xff]  ;;  %v542_v12 = vrot.slane %v5866_v7, 1  ;;  %v633_v13 = vrot.slane %v5866_v7, %v5650_v32 }
  0x96   : > { %v524_v10 = vrot.slane %v5864_v6, 1 }
  0x98   : > { %748 = vrot.lane.b32.xlu1 %v5733_v3, %s5361_s18  ;;  %v561_v20 = vsel %vm549_vm1, %v524_v10, %v542_v12 }
  0x99   : > { %746 = vrot.lane.b32.xlu0 %v5731_v2, %s5361_s18 }
  0x9c   : > { %876 = vrot.lane.b32.xlu1 %v669_v17, %s5362_s20  ;;  %v5884_v17 = vld [vmem:[#allocation2 + $0xc0] sm:$0xff] }
  0x9d   : > { %874 = vrot.lane.b32.xlu0 %v555_v16, %s5362_s20  ;;  %v579_v16 = vsel %vm549_vm1, %v542_v12, %v524_v10  ;;  %v525_v22 = vrot.slane %v5884_v17, 1  ;;  %v5967_v10 = vld [vmem:[#allocation2 + $0x100] sm:$0xff]  ;;  %v5969_v12 = vld [vmem:[#allocation2 + $0x108] sm:$0xff] }
  0x9e   : > { %v681_v21 = vsel %vm224_vm2, %v633_v13, %v579_v16  ;;  %v351_v13 = vrot.slane %v5643_v28, 7  ;;  %v333_v16 = vrot.slane %v5634_v27, 7 }
  0xa0   : > { %752 = vrot.lane.b32.xlu1 %v5761_v15, %s5361_s18  ;;  %v388_v28 = vsel %vm368_vm6, %v351_v13, %v333_v16 }
  0xa1   : > { %750 = vrot.lane.b32.xlu0 %v5759_v14, %s5361_s18 }
  0xa4   : > { %880 = vrot.lane.b32.xlu1 %v671_v30, %s5362_s20  ;;  %v637_v30 = vrot.slane %v5886_v18, %v5650_v32 }
  0xa5   : > { %878 = vrot.lane.b32.xlu0 %v556_v25, %s5362_s20  ;;  %v543_v25 = vrot.slane %v5886_v18, 1 }
  0xa7   : > { %v580_v31 = vsel %vm549_vm1, %v543_v25, %v525_v22  ;;  %v562_v37 = vsel %vm549_vm1, %v525_v22, %v543_v25 }
  0xa8   : > { %756 = vrot.lane.b32.xlu1 %v5781_v24, %s5361_s18 }
  0xa9   : > { %754 = vrot.lane.b32.xlu0 %v5779_v23, %s5361_s18 }
  0xac   : > { %884 = vrot.lane.b32.xlu1 %v673_v41, %s5362_s20  ;;  %v526_v41 = vrot.slane %v5904_v35, 1 }
  0xad   : > { %882 = vrot.lane.b32.xlu0 %v557_v40, %s5362_s20  ;;  %v683_v40 = vsel %vm224_vm2, %v637_v30, %v580_v31  ;;  %v529_v30 = vrot.slane %v5967_v10, 1  ;;  %v547_v31 = vrot.slane %v5969_v12, 1 }
  0xae   : > { %v581_v45 = vsel %vm549_vm1, %v544_v42, %v526_v41  ;;  %v563_v50 = vsel %vm549_vm1, %v526_v41, %v544_v42 }
  0xb0   : > { %760 = vrot.lane.b32.xlu1 %v5801_v39, %s5361_s18 }
  0xb1   : > { %758 = vrot.lane.b32.xlu0 %v5799_v38, %s5361_s18 }
  0xb4   : > { %888 = vrot.lane.b32.xlu1 %v675_v52, %s5362_s20  ;;  %v527_v52 = vrot.slane %v5924_v46, 1 }
  0xb5   : > { %886 = vrot.lane.b32.xlu0 %v558_v51, %s5362_s20  ;;  %v685_v51 = vsel %vm224_vm2, %v641_v44, %v581_v45  ;;  %v584_v44 = vsel %vm549_vm1, %v547_v31, %v529_v30  ;;  %v5999_v45 = vld [vmem:[#allocation2] sm:$0xff] }
  0xb6   : > { %v582_v56 = vsel %vm549_vm1, %v545_v54, %v527_v52 }
  0xb7   : > { %v687_v0 = vsel %vm224_vm2, %v645_v55, %v582_v56  ;;  %v352_v55 = vrot.slane %v5632_v26, 7 }
  0xb8   : > { %764 = vrot.lane.b32.xlu1 %v5821_v48, %s5361_s18 }
  0xb9   : > { %762 = vrot.lane.b32.xlu0 %v5819_v47, %s5361_s18 }
  0xbc   : > { %892 = vrot.lane.b32.xlu1 %v677_v63, %s5362_s20  ;;  %v564_v63 = vsel %vm549_vm1, %v527_v52, %v545_v54  ;;  %v566_v52 = vsel %vm549_vm1, %v529_v30, %v547_v31  ;;  %v335_v30 = vrot.slane %v5677_v43, 7  ;;  %v353_v31 = vrot.slane %v5645_v29, 7 }
  0xbd   : > { %890 = vrot.lane.b32.xlu0 %v559_v62, %s5362_s20  ;;  %v5946_v62 = vld [vmem:[#allocation2 + $0xf8] sm:$0xff] }
  0xbe   : > { %v546_v4 = vrot.slane %v5946_v62, 1  ;;  %v649_v5 = vrot.slane %v5946_v62, %v5650_v32 }
  0xc0   : > { %768 = vrot.lane.b32.xlu1 %v5846_v61, %s5361_s18 }
  0xc1   : > { %766 = vrot.lane.b32.xlu0 %v5844_v60, %s5361_s18 }
  0xc4   : > { %896 = vrot.lane.b32.xlu1 %v679_v9, %s5362_s20  ;;  %v5965_v9 = vsub.s32 1, %v5618_v19 }
  0xc5   : > { %894 = vrot.lane.b32.xlu0 %v560_v8, %s5362_s20  ;;  %v583_v8 = vsel %vm549_vm1, %v546_v4, %v528_v1 }
  0xc8   : > { %772 = vrot.lane.b32.xlu1 %v5866_v7, %s5361_s18 }
  0xc9   : > { %770 = vrot.lane.b32.xlu0 %v5864_v6, %s5361_s18 }
  0xcc   : > { %900 = vrot.lane.b32.xlu1 %v681_v21, %s5362_s20  ;;  %v689_v21 = vsel %vm224_vm2, %v649_v5, %v583_v8  ;;  %v370_v5 = vsel %vm368_vm6, %v333_v16, %v351_v13  ;;  %v416_v8 = vrot.slane %v5660_v34, %v5965_v9 }
  0xcd   : > { %898 = vrot.lane.b32.xlu0 %v561_v20, %s5362_s20  ;;  %v565_v20 = vsel %vm549_vm1, %v528_v1, %v546_v4  ;;  %v513_v1 = vrot.slane %v5999_v45, 1 }
  0xd0   : > { %776 = vrot.lane.b32.xlu1 %v5886_v18, %s5361_s18 }
  0xd1   : > { %774 = vrot.lane.b32.xlu0 %v5884_v17, %s5361_s18 }
  0xd4   : > { %904 = vrot.lane.b32.xlu1 %v683_v40, %s5362_s20  ;;  %v653_v40 = vrot.slane %v5969_v12, %v5650_v32 }
  0xd5   : > { %902 = vrot.lane.b32.xlu0 %v562_v37, %s5362_s20  ;;  %v412_v37 = vrot.slane %v5634_v27, %v5965_v9 }
  0xd6   : > { %v691_v54 = vsel %vm224_vm2, %v653_v40, %v584_v44 }
  0xd7   : > { %v479_v27 = vsel %vm221_vm7, %v412_v37, %v388_v28  ;;  %v420_v37 = vrot.slane %v5677_v43, %v5965_v9  ;;  %v6053_v43 = vld [vmem:[#allocation2 + $0x110] sm:$0xff] }
  0xd8   : > { %780 = vrot.lane.b32.xlu1 %v5906_v36, %s5361_s18 }
  0xd9   : > { %778 = vrot.lane.b32.xlu0 %v5904_v35, %s5361_s18 }
  0xdc   : > { %908 = vrot.lane.b32.xlu1 %v685_v51, %s5362_s20  ;;  %v334_v51 = vrot.slane %v5660_v34, 7 }
  0xdd   : > { %906 = vrot.lane.b32.xlu0 %v563_v50, %s5362_s20  ;;  %v6001_v50 = vld [vmem:[#allocation2 + $0x8] sm:$0xff] }
  0xde   : > { %v531_v4 = vrot.slane %v6001_v50, 1  ;;  %v389_v26 = vsel %vm368_vm6, %v352_v55, %v334_v51  ;;  %v589_v34 = vrot.slane %v6001_v50, %v5650_v32  ;;  %v371_v13 = vsel %vm368_vm6, %v334_v51, %v352_v55 }
  0xdf   : > { %v481_v29 = vsel %vm221_vm7, %v416_v8, %v389_v26 }
  0xe0   : > { %784 = vrot.lane.b32.xlu1 %v5926_v49, %s5361_s18  ;;  %v568_v44 = vsel %vm549_vm1, %v531_v4, %v513_v1 }
  0xe1   : > { %782 = vrot.lane.b32.xlu0 %v5924_v46, %s5361_s18  ;;  %v659_v55 = vsel %vm224_vm2, %v589_v34, %v568_v44 }
  0xe4   : > { %912 = vrot.lane.b32.xlu1 %v687_v0, %s5362_s20 }
  0xe5   : > { %910 = vrot.lane.b32.xlu0 %v564_v63, %s5362_s20 }
  0xe8   : > { %788 = vrot.lane.b32.xlu1 %v5946_v62, %s5361_s18 }
  0xe9   : > { %786 = vrot.lane.b32.xlu0 %v5944_v57, %s5361_s18 }
  0xea   : > { %v737_v22 = vpop.permute.xlu1 %736 }
  0xeb   : > { %v731_v25 = vpop.permute.xlu0 %730 }
  0xec   : > { %916 = vrot.lane.b32.xlu1 %v689_v21, %s5362_s20  ;;  %v952_v56 = vsel %vm258_vm0, %v479_v27, %v731_v25  ;;  %v1621_v21 = vld [vmem:[#allocation6 + $0x20] sm:$0xff]  ;;  %v1622_v25 = vld [vmem:[#allocation6 + $0x28] sm:$0xf]  ;;  %v390_v27 = vsel %vm368_vm6, %v353_v31, %v335_v30 }
  0xed   : > { %914 = vrot.lane.b32.xlu0 %v565_v20, %s5362_s20  ;;  %v6047_v51 = vpack.c.bf16 %v1622_v25, %v1621_v21  ;;  %v483_v8 = vsel %vm221_vm7, %v420_v37, %v390_v27  ;;  %v354_v25 = vrot.slane %v5715_v59, 7 }
  0xee   : > { %v5993_v41 = vpop.permute.xlu1 %740 }
  0xef   : > { %v733_v42 = vpop.permute.xlu0 %732 }
  0xf0   : > { %1021 = vrot.lane.b32.xlu1 %v5969_v12, %s5361_s18  ;;  %v953_v16 = vsel %vm258_vm0, %v370_v5, %v733_v42  ;;  %v6055_v42 = vld [vmem:[#allocation2 + $0x118] sm:$0xff] }
  0xf1   : > { %1019 = vrot.lane.b32.xlu0 %v5967_v10, %s5361_s18 }
  0xf2   : > { %v859_v0 = vpop.permute.xlu1 %858 }
  0xf3   : > { %v735_v63 = vpop.permute.xlu0 %734  ;;  %v6021_v20 = vsel %vm982_vm8, %v952_v56, %v859_v0  ;;  %v955_v56 = vsel %vm258_vm0, %v371_v13, %v737_v22  ;;  %v372_v0 = vsel %vm368_vm6, %v335_v30, %v353_v31  ;;  %v530_v22 = vrot.slane %v6053_v43, 1 }
  0xf4   : > { %1029 = vrot.lane.b32.xlu1 %v691_v54, %s5362_s20  ;;  %4649 = vmatprep.mubr.msk.f32.mxu0 %vm1040_vm9, %v6021_v20  ;;  %v550_v54 = vsel %vm549_vm1, %v513_v1, %v531_v4  ;;  %v954_v5 = vsel %vm258_vm0, %v481_v29, %v735_v63  ;;  %v548_v63 = vrot.slane %v6055_v42, 1  ;;  %v957_v30 = vsel %vm258_vm0, %v372_v0, %v5993_v41 }
  0xf5   : > { %1027 = vrot.lane.b32.xlu0 %v566_v52, %s5362_s20  ;;  %v355_v0 = vrot.slane %v5733_v3, 7 }
  0xf6   : > { %v861_v40 = vpop.permute.xlu1 %860  ;;  %v585_v41 = vsel %vm549_vm1, %v548_v63, %v530_v22  ;;  %v567_v44 = vsel %vm549_vm1, %v530_v22, %v548_v63 }
  0xf7   : > { %v739_v28 = vpop.permute.xlu0 %738  ;;  %v6045_v52 = vsel %vm982_vm8, %v953_v16, %v861_v40  ;;  %v657_v16 = vrot.slane %v6055_v42, %v5650_v32  ;;  %v424_v40 = vrot.slane %v5713_v58, %v5965_v9 }
  0xf8   : > { %728 = vrot.lane.b32.xlu1 %v6001_v50, %s5361_s18  ;;  %4650 = vmatmul.mubr.msk.f32.vlgmr.msra.gmra.mrb[0].mxu0 %vm1040_vm9, %v6045_v52  ;;  %v956_v31 = vsel %vm258_vm0, %v483_v8, %v739_v28 }
  0xf9   : > { %726 = vrot.lane.b32.xlu0 %v5999_v45, %s5361_s18  ;;  %4968 = vmatpush3.bf16.msk.msra.mxu0 %vm5745_vm5, %v5831_v53  ;;  %v336_v53 = vrot.slane %v5713_v58, 7  ;;  %v693_v27 = vsel %vm224_vm2, %v657_v16, %v585_v41 }
  0xfa   : > { %v865_v21 = vpop.permute.xlu1 %864  ;;  %4971 = vmatprep.subr.msk.bf16.mxu0 %vm5745_vm5, %v6047_v51 }
  0xfb   : > { %v863_v26 = vpop.permute.xlu0 %862  ;;  %v6076_v4 = vsel %vm982_vm8, %v955_v56, %v865_v21  ;;  %v391_v28 = vsel %vm368_vm6, %v354_v25, %v336_v53  ;;  %v337_v56 = vrot.slane %v5731_v2, 7 }
  0xfc   : > { %v6073_v1 = vsel %vm982_vm8, %v954_v5, %v863_v26  ;;  %856 = vrot.lane.b32.xlu1 %v659_v55, %s5362_s20  ;;  %v373_v55 = vsel %vm368_vm6, %v336_v53, %v354_v25  ;;  %v428_v53 = vrot.slane %v5731_v2, %v5965_v9  ;;  %v356_v2 = vrot.slane %v5761_v15, 7 }
  0xfd   : > { %854 = vrot.lane.b32.xlu0 %v550_v54, %s5362_s20  ;;  %4652 = vmatprep.mubr.msk.f32.mxu0 %vm1040_vm9, %v6073_v1  ;;  %v485_v54 = vsel %vm221_vm7, %v424_v40, %v391_v28  ;;  %v392_v3 = vsel %vm368_vm6, %v355_v0, %v337_v56 }
  0xfe   : > { %4653 = vmatmul.mubr.msk.f32.gmra.mrb[2].mxu0 %vm1040_vm9, %v6076_v4  ;;  %v869_v13 = vpop.permute.xlu1 %868 }
  0xff   : > { %v867_v34 = vpop.permute.xlu0 %866  ;;  %v6100_v59 = vsel %vm982_vm8, %v957_v30, %v869_v13  ;;  %v338_v13 = vrot.slane %v5759_v14, 7 }
 0x100   : > { %v6097_v37 = vsel %vm982_vm8, %v956_v31, %v867_v34  ;;  %1604 = vrot.lane.b32.xlu1 %v6055_v42, %s5361_s18  ;;  %v487_v31 = vsel %vm221_vm7, %v428_v53, %v392_v3  ;;  %v374_v34 = vsel %vm368_vm6, %v337_v56, %v355_v0  ;;  %v339_v0 = vrot.slane %v5779_v23, 7 }
 0x101   : > { %4655 = vmatprep.mubr.msk.f32.mxu0 %vm1040_vm9, %v6097_v37  ;;  %1602 = vrot.lane.b32.xlu0 %v6053_v43, %s5361_s18  ;;  %v393_v15 = vsel %vm368_vm6, %v356_v2, %v338_v13  ;;  %v375_v56 = vsel %vm368_vm6, %v338_v13, %v356_v2  ;;  %v340_v2 = vrot.slane %v5799_v38, 7 }
 0x102   : > { %4656 = vmatmul.mubr.msk.f32.gmra.mrb[4].mxu0 %vm1040_vm9, %v6100_v59  ;;  %v745_v29 = vpop.permute.xlu1 %744 }
 0x103   : > { %v743_v58 = vpop.permute.xlu0 %742  ;;  %v959_v8 = vsel %vm258_vm0, %v373_v55, %v745_v29  ;;  %v432_v29 = vrot.slane %v5759_v14, %v5965_v9  ;;  %v357_v14 = vrot.slane %v5781_v24, 7 }
 0x104   : > { %1612 = vrot.lane.b32.xlu1 %v693_v27, %s5362_s20  ;;  %v958_v5 = vsel %vm258_vm0, %v485_v54, %v743_v58 }
 0x105   : > { %1610 = vrot.lane.b32.xlu0 %v567_v44, %s5362_s20  ;;  %v489_v55 = vsel %vm221_vm7, %v432_v29, %v393_v15  ;;  %v394_v24 = vsel %vm368_vm6, %v357_v14, %v339_v0  ;;  %v376_v13 = vsel %vm368_vm6, %v339_v0, %v357_v14  ;;  %v341_v14 = vrot.slane %v5819_v47, 7 }
 0x106   : > { %v873_v21 = vpop.permute.xlu1 %872 }
 0x107   : > { %v871_v26 = vpop.permute.xlu0 %870  ;;  %v6134_v63 = vsel %vm982_vm8, %v959_v8, %v873_v21 }
 0x108   : > { %v6131_v22 = vsel %vm982_vm8, %v958_v5, %v871_v26 }
 0x109   : > { %4658 = vmatprep.mubr.msk.f32.mxu0 %vm1040_vm9, %v6131_v22 }
 0x10a   : > { %4659 = vmatmul.mubr.msk.f32.gmra.mrb[6].mxu0 %vm1040_vm9, %v6134_v63  ;;  %v749_v30 = vpop.permute.xlu1 %748 }
 0x10b   : > { %v747_v25 = vpop.permute.xlu0 %746  ;;  %v961_v40 = vsel %vm258_vm0, %v374_v34, %v749_v30 }
 0x10c   : > { %v960_v16 = vsel %vm258_vm0, %v487_v31, %v747_v25  ;;  %v436_v25 = vrot.slane %v5779_v23, %v5965_v9  ;;  %v358_v23 = vrot.slane %v5801_v39, 7 }
 0x10e   : > { %v877_v28 = vpop.permute.xlu1 %876  ;;  %v491_v34 = vsel %vm221_vm7, %v436_v25, %v394_v24  ;;  %v395_v39 = vsel %vm368_vm6, %v358_v23, %v340_v2  ;;  %v377_v0 = vsel %vm368_vm6, %v340_v2, %v358_v23  ;;  %v342_v23 = vrot.slane %v5844_v60, 7 }
 0x10f   : > { %v875_v41 = vpop.permute.xlu0 %874  ;;  %v6156_v58 = vsel %vm982_vm8, %v961_v40, %v877_v28 }
 0x110   : > { %v6153_v44 = vsel %vm982_vm8, %v960_v16, %v875_v41 }
 0x111   : > { %4661 = vmatprep.mubr.msk.f32.mxu0 %vm1040_vm9, %v6153_v44 }
 0x112   : > { %4662 = vmatmul.mubr.msk.f32.gmra.mrb[8].mxu0 %vm1040_vm9, %v6156_v58  ;;  %v753_v54 = vpop.permute.xlu1 %752 }
 0x113   : > { %v751_v27 = vpop.permute.xlu0 %750  ;;  %v963_v8 = vsel %vm258_vm0, %v375_v56, %v753_v54 }
 0x114   : > { %v962_v5 = vsel %vm258_vm0, %v489_v55, %v751_v27  ;;  %v440_v27 = vrot.slane %v5799_v38, %v5965_v9  ;;  %v359_v38 = vrot.slane %v5821_v48, 7 }
 0x116   : > { %v881_v21 = vpop.permute.xlu1 %880  ;;  %v493_v56 = vsel %vm221_vm7, %v440_v27, %v395_v39  ;;  %v396_v48 = vsel %vm368_vm6, %v359_v38, %v341_v14  ;;  %v378_v2 = vsel %vm368_vm6, %v341_v14, %v359_v38  ;;  %v343_v38 = vrot.slane %v5864_v6, 7 }
 0x117   : > { %v879_v26 = vpop.permute.xlu0 %878  ;;  %v6178_v3 = vsel %vm982_vm8, %v963_v8, %v881_v21 }
 0x118   : > { %v6175_v53 = vsel %vm982_vm8, %v962_v5, %v879_v26 }
 0x119   : > { %4664 = vmatprep.mubr.msk.f32.mxu0 %vm1040_vm9, %v6175_v53 }
 0x11a   : > { %4665 = vmatmul.mubr.msk.f32.gmra.mrb[10].mxu0 %vm1040_vm9, %v6178_v3  ;;  %v757_v31 = vpop.permute.xlu1 %756 }
 0x11b   : > { %v755_v30 = vpop.permute.xlu0 %754  ;;  %v965_v40 = vsel %vm258_vm0, %v376_v13, %v757_v31 }
 0x11c   : > { %v964_v16 = vsel %vm258_vm0, %v491_v34, %v755_v30  ;;  %v444_v30 = vrot.slane %v5819_v47, %v5965_v9  ;;  %v360_v47 = vrot.slane %v5846_v61, 7 }
 0x11e   : > { %v885_v28 = vpop.permute.xlu1 %884  ;;  %v495_v13 = vsel %vm221_vm7, %v444_v30, %v396_v48  ;;  %v397_v61 = vsel %vm368_vm6, %v360_v47, %v342_v23  ;;  %v379_v14 = vsel %vm368_vm6, %v342_v23, %v360_v47  ;;  %v344_v47 = vrot.slane %v5884_v17, 7 }
 0x11f   : > { %v883_v41 = vpop.permute.xlu0 %882  ;;  %v6200_v15 = vsel %vm982_vm8, %v965_v40, %v885_v28 }
 0x120   : > { %v6197_v29 = vsel %vm982_vm8, %v964_v16, %v883_v41 }
 0x121   : > { %4667 = vmatprep.mubr.msk.f32.mxu0 %vm1040_vm9, %v6197_v29 }
 0x122   : > { %4668 = vmatmul.mubr.msk.f32.gmra.mrb[12].mxu0 %vm1040_vm9, %v6200_v15  ;;  %v761_v55 = vpop.permute.xlu1 %760 }
 0x123   : > { %v759_v54 = vpop.permute.xlu0 %758  ;;  %v967_v8 = vsel %vm258_vm0, %v377_v0, %v761_v55 }
 0x124   : > { %v966_v5 = vsel %vm258_vm0, %v493_v56, %v759_v54  ;;  %v448_v54 = vrot.slane %v5844_v60, %v5965_v9  ;;  %v361_v60 = vrot.slane %v5866_v7, 7 }
 0x126   : > { %v889_v21 = vpop.permute.xlu1 %888  ;;  %v497_v0 = vsel %vm221_vm7, %v448_v54, %v397_v61  ;;  %v398_v7 = vsel %vm368_vm6, %v361_v60, %v343_v38  ;;  %v380_v23 = vsel %vm368_vm6, %v343_v38, %v361_v60  ;;  %v345_v60 = vrot.slane %v5904_v35, 7 }
 0x127   : > { %v887_v26 = vpop.permute.xlu0 %886  ;;  %v6222_v24 = vsel %vm982_vm8, %v967_v8, %v889_v21 }
 0x128   : > { %v6219_v25 = vsel %vm982_vm8, %v966_v5, %v887_v26 }
 0x129   : > { %4670 = vmatprep.mubr.msk.f32.mxu0 %vm1040_vm9, %v6219_v25 }
 0x12a   : > { %4671 = vmatmul.mubr.msk.f32.gmra.mrb[14].mxu0 %vm1040_vm9, %v6222_v24  ;;  %v765_v34 = vpop.permute.xlu1 %764 }
 0x12b   : > { %v763_v31 = vpop.permute.xlu0 %762  ;;  %v969_v40 = vsel %vm258_vm0, %v378_v2, %v765_v34 }
 0x12c   : > { %v968_v16 = vsel %vm258_vm0, %v495_v13, %v763_v31  ;;  %v452_v31 = vrot.slane %v5864_v6, %v5965_v9  ;;  %v362_v6 = vrot.slane %v5886_v18, 7 }
 0x12e   : > { %v893_v28 = vpop.permute.xlu1 %892  ;;  %v499_v2 = vsel %vm221_vm7, %v452_v31, %v398_v7  ;;  %v399_v18 = vsel %vm368_vm6, %v362_v6, %v344_v47  ;;  %v381_v38 = vsel %vm368_vm6, %v344_v47, %v362_v6  ;;  %v346_v6 = vrot.slane %v5924_v46, 7 }
 0x12f   : > { %v891_v41 = vpop.permute.xlu0 %890  ;;  %v6244_v39 = vsel %vm982_vm8, %v969_v40, %v893_v28 }
 0x130   : > { %v6241_v27 = vsel %vm982_vm8, %v968_v16, %v891_v41 }
 0x131   : > { %4673 = vmatprep.mubr.msk.f32.mxu0 %vm1040_vm9, %v6241_v27 }
 0x132   : > { %4674 = vmatmul.mubr.msk.f32.gmra.mrb[16].mxu0 %vm1040_vm9, %v6244_v39  ;;  %v769_v56 = vpop.permute.xlu1 %768 }
 0x133   : > { %v767_v55 = vpop.permute.xlu0 %766  ;;  %v971_v8 = vsel %vm258_vm0, %v379_v14, %v769_v56 }
 0x134   : > { %v970_v5 = vsel %vm258_vm0, %v497_v0, %v767_v55  ;;  %v456_v55 = vrot.slane %v5884_v17, %v5965_v9  ;;  %v363_v17 = vrot.slane %v5906_v36, 7 }
 0x136   : > { %v897_v21 = vpop.permute.xlu1 %896  ;;  %v501_v14 = vsel %vm221_vm7, %v456_v55, %v399_v18  ;;  %v400_v36 = vsel %vm368_vm6, %v363_v17, %v345_v60  ;;  %v382_v47 = vsel %vm368_vm6, %v345_v60, %v363_v17  ;;  %v347_v17 = vrot.slane %v5944_v57, 7 }
 0x137   : > { %v895_v26 = vpop.permute.xlu0 %894  ;;  %v6266_v48 = vsel %vm982_vm8, %v971_v8, %v897_v21 }
 0x138   : > { %v6263_v30 = vsel %vm982_vm8, %v970_v5, %v895_v26 }
 0x139   : > { %4676 = vmatprep.mubr.msk.f32.mxu0 %vm1040_vm9, %v6263_v30 }
 0x13a   : > { %4677 = vmatmul.mubr.msk.f32.gmra.mrb[18].mxu0 %vm1040_vm9, %v6266_v48  ;;  %v773_v13 = vpop.permute.xlu1 %772 }
 0x13b   : > { %v771_v34 = vpop.permute.xlu0 %770  ;;  %v973_v40 = vsel %vm258_vm0, %v380_v23, %v773_v13 }
 0x13c   : > { %v972_v16 = vsel %vm258_vm0, %v499_v2, %v771_v34  ;;  %v460_v34 = vrot.slane %v5904_v35, %v5965_v9  ;;  %v364_v35 = vrot.slane %v5926_v49, 7 }
 0x13e   : > { %v901_v28 = vpop.permute.xlu1 %900  ;;  %v503_v23 = vsel %vm221_vm7, %v460_v34, %v400_v36  ;;  %v401_v49 = vsel %vm368_vm6, %v364_v35, %v346_v6  ;;  %v383_v60 = vsel %vm368_vm6, %v346_v6, %v364_v35  ;;  %v348_v35 = vrot.slane %v5967_v10, 7 }
 0x13f   : > { %v899_v41 = vpop.permute.xlu0 %898  ;;  %v6288_v61 = vsel %vm982_vm8, %v973_v40, %v901_v28 }
 0x140   : > { %v6285_v54 = vsel %vm982_vm8, %v972_v16, %v899_v41 }
 0x141   : > { %4679 = vmatprep.mubr.msk.f32.mxu0 %vm1040_vm9, %v6285_v54 }
 0x142   : > { %4680 = vmatmul.mubr.msk.f32.gmra.mrb[20].mxu0 %vm1040_vm9, %v6288_v61  ;;  %v777_v0 = vpop.permute.xlu1 %776 }
 0x143   : > { %v775_v56 = vpop.permute.xlu0 %774  ;;  %v975_v8 = vsel %vm258_vm0, %v381_v38, %v777_v0 }
 0x144   : > { %v974_v5 = vsel %vm258_vm0, %v501_v14, %v775_v56  ;;  %v464_v56 = vrot.slane %v5924_v46, %v5965_v9  ;;  %v365_v46 = vrot.slane %v5946_v62, 7 }
 0x146   : > { %v905_v21 = vpop.permute.xlu1 %904  ;;  %v505_v38 = vsel %vm221_vm7, %v464_v56, %v401_v49  ;;  %v402_v62 = vsel %vm368_vm6, %v365_v46, %v347_v17  ;;  %v384_v6 = vsel %vm368_vm6, %v347_v17, %v365_v46  ;;  %v332_v46 = vrot.slane %v5999_v45, 7 }
 0x147   : > { %v903_v26 = vpop.permute.xlu0 %902  ;;  %v6310_v7 = vsel %vm982_vm8, %v975_v8, %v905_v21 }
 0x148   : > { %v6307_v31 = vsel %vm982_vm8, %v974_v5, %v903_v26 }
 0x149   : > { %4682 = vmatprep.mubr.msk.f32.mxu0 %vm1040_vm9, %v6307_v31 }
 0x14a   : > { %4683 = vmatmul.mubr.msk.f32.gmra.mrb[22].mxu0 %vm1040_vm9, %v6310_v7  ;;  %v781_v2 = vpop.permute.xlu1 %780 }
 0x14b   : > { %v779_v13 = vpop.permute.xlu0 %778  ;;  %v977_v40 = vsel %vm258_vm0, %v382_v47, %v781_v2 }
 0x14c   : > { %v976_v16 = vsel %vm258_vm0, %v503_v23, %v779_v13  ;;  %v468_v13 = vrot.slane %v5944_v57, %v5965_v9  ;;  %v366_v57 = vrot.slane %v5969_v12, 7 }
 0x14e   : > { %v909_v28 = vpop.permute.xlu1 %908  ;;  %v507_v47 = vsel %vm221_vm7, %v468_v13, %v402_v62  ;;  %v403_v12 = vsel %vm368_vm6, %v366_v57, %v348_v35  ;;  %v385_v17 = vsel %vm368_vm6, %v348_v35, %v366_v57 }
 0x14f   : > { %v907_v41 = vpop.permute.xlu0 %906  ;;  %v6332_v18 = vsel %vm982_vm8, %v977_v40, %v909_v28 }
 0x150   : > { %v6329_v55 = vsel %vm982_vm8, %v976_v16, %v907_v41 }
 0x151   : > { %4685 = vmatprep.mubr.msk.f32.mxu0 %vm1040_vm9, %v6329_v55 }
 0x152   : > { %4686 = vmatmul.mubr.msk.f32.gmra.mrb[24].mxu0 %vm1040_vm9, %v6332_v18  ;;  %v785_v14 = vpop.permute.xlu1 %784 }
 0x153   : > { %v783_v0 = vpop.permute.xlu0 %782  ;;  %v979_v8 = vsel %vm258_vm0, %v383_v60, %v785_v14 }
 0x154   : > { %v978_v5 = vsel %vm258_vm0, %v505_v38, %v783_v0  ;;  %v472_v0 = vrot.slane %v5967_v10, %v5965_v9  ;;  %v350_v10 = vrot.slane %v6001_v50, 7 }
 0x156   : > { %v913_v21 = vpop.permute.xlu1 %912  ;;  %v509_v60 = vsel %vm221_vm7, %v472_v0, %v403_v12  ;;  %v387_v50 = vsel %vm368_vm6, %v350_v10, %v332_v46  ;;  %v369_v35 = vsel %vm368_vm6, %v332_v46, %v350_v10 }
 0x157   : > { %v911_v26 = vpop.permute.xlu0 %910  ;;  %v6354_v36 = vsel %vm982_vm8, %v979_v8, %v913_v21 }
 0x158   : > { %v6351_v34 = vsel %vm982_vm8, %v978_v5, %v911_v26 }
 0x159   : > { %4688 = vmatprep.mubr.msk.f32.mxu0 %vm1040_vm9, %v6351_v34 }
 0x15a   : > { %4689 = vmatmul.mubr.msk.f32.gmra.mrb[26].mxu0 %vm1040_vm9, %v6354_v36  ;;  %v789_v23 = vpop.permute.xlu1 %788 }
 0x15b   : > { %v787_v2 = vpop.permute.xlu0 %786  ;;  %v981_v40 = vsel %vm258_vm0, %v384_v6, %v789_v23 }
 0x15c   : > { %v980_v16 = vsel %vm258_vm0, %v507_v47, %v787_v2  ;;  %v408_v2 = vrot.slane %v5999_v45, %v5965_v9 }
 0x15e   : > { %v917_v28 = vpop.permute.xlu1 %916  ;;  %v477_v6 = vsel %vm221_vm7, %v408_v2, %v387_v50 }
 0x15f   : > { %v915_v41 = vpop.permute.xlu0 %914  ;;  %v6376_v49 = vsel %vm982_vm8, %v981_v40, %v917_v28 }
 0x160   : > { %v6373_v56 = vsel %vm982_vm8, %v980_v16, %v915_v41 }
 0x161   : > { %4691 = vmatprep.mubr.msk.f32.mxu0 %vm1040_vm9, %v6373_v56 }
 0x162   : > { %4692 = vmatmul.mubr.msk.f32.gmra.mrb[28].mxu0 %vm1040_vm9, %v6376_v49  ;;  %v1022_v38 = vpop.permute.xlu1 %1021 }
 0x163   : > { %v1020_v14 = vpop.permute.xlu0 %1019  ;;  %v1034_v8 = vsel %vm258_vm0, %v385_v17, %v1022_v38 }
 0x164   : > { %v1033_v5 = vsel %vm258_vm0, %v509_v60, %v1020_v14 }
 0x166   : > { %v1030_v21 = vpop.permute.xlu1 %1029 }
 0x167   : > { %v1028_v26 = vpop.permute.xlu0 %1027  ;;  %v6398_v62 = vsel %vm982_vm8, %v1034_v8, %v1030_v21 }
 0x168   : > { %v6395_v13 = vsel %vm982_vm8, %v1033_v5, %v1028_v26 }
 0x169   : > { %4694 = vmatprep.mubr.msk.f32.mxu0 %vm1040_vm9, %v6395_v13 }
 0x16a   : > { %4695 = vmatmul.mubr.msk.f32.gmra.mrb[30].mxu0 %vm1040_vm9, %v6398_v62  ;;  %v729_v47 = vpop.permute.xlu1 %728 }
 0x16b   : > { %v727_v23 = vpop.permute.xlu0 %726  ;;  %v951_v45 = vsel %vm258_vm0, %v369_v35, %v729_v47 }
 0x16c   : > { %v950_v57 = vsel %vm258_vm0, %v477_v6, %v727_v23 }
 0x16e   : > { %v857_v40 = vpop.permute.xlu1 %856 }
 0x16f   : > { %v855_v16 = vpop.permute.xlu0 %854  ;;  %v984_v28 = vsel %vm982_vm8, %v951_v45, %v857_v40 }
 0x170   : > { %v983_v41 = vsel %vm982_vm8, %v950_v57, %v855_v16 }
 0x171   : > { %4701 = vmatprep.mubr.msk.f32.mxu0 %vm1040_vm9, %v983_v41 }
 0x172   : > { %4702 = vmatmul.mubr.msk.f32.vlgmr.msra.gmra.mrb[0].mxu0 %vm1040_vm9, %v984_v28 }
 0x173   : > { %4974 = vmatpush3.bf16.msk.msra.mxu0 %vm5745_vm5, %v6047_v51  ;;  %4704 = vmatprep.mubr.msk.f32.mxu0 %vm1040_vm9, %v6021_v20  ;;  %v349_v20 = vrot.slane %v6053_v43, 7  ;;  %v476_v51 = vrot.slane %v6053_v43, %v5965_v9 }
 0x176   : > { %4705 = vmatmul.mubr.msk.f32.gmra.mrb[2].mxu0 %vm1040_vm9, %v6045_v52  ;;  %v367_v52 = vrot.slane %v6055_v42, 7  ;;  %v1605_v42 = vpop.permute.xlu1 %1604 }
 0x177   : > { %4707 = vmatprep.mubr.msk.f32.mxu0 %vm1040_vm9, %v6073_v1 }
 0x17a   : > { %4708 = vmatmul.mubr.msk.f32.gmra.mrb[4].mxu0 %vm1040_vm9, %v6076_v4 }
 0x17b   : > { %4710 = vmatprep.mubr.msk.f32.mxu0 %vm1040_vm9, %v6097_v37 }
 0x17e   : > { %4711 = vmatmul.mubr.msk.f32.gmra.mrb[6].mxu0 %vm1040_vm9, %v6100_v59 }
 0x17f   : > { %4713 = vmatprep.mubr.msk.f32.mxu0 %vm1040_vm9, %v6131_v22 }
 0x182   : > { %4714 = vmatmul.mubr.msk.f32.gmra.mrb[8].mxu0 %vm1040_vm9, %v6134_v63 }
 0x183   : > { %4716 = vmatprep.mubr.msk.f32.mxu0 %vm1040_vm9, %v6153_v44 }
 0x186   : > { %4717 = vmatmul.mubr.msk.f32.gmra.mrb[10].mxu0 %vm1040_vm9, %v6156_v58 }
 0x187   : > { %4719 = vmatprep.mubr.msk.f32.mxu0 %vm1040_vm9, %v6175_v53 }
 0x18a   : > { %4720 = vmatmul.mubr.msk.f32.gmra.mrb[12].mxu0 %vm1040_vm9, %v6178_v3 }
 0x18b   : > { %4722 = vmatprep.mubr.msk.f32.mxu0 %vm1040_vm9, %v6197_v29 }
 0x18e   : > { %4723 = vmatmul.mubr.msk.f32.gmra.mrb[14].mxu0 %vm1040_vm9, %v6200_v15 }
 0x18f   : > { %4725 = vmatprep.mubr.msk.f32.mxu0 %vm1040_vm9, %v6219_v25 }
 0x192   : > { %4726 = vmatmul.mubr.msk.f32.gmra.mrb[16].mxu0 %vm1040_vm9, %v6222_v24 }
 0x193   : > { %4728 = vmatprep.mubr.msk.f32.mxu0 %vm1040_vm9, %v6241_v27 }
 0x196   : > { %4729 = vmatmul.mubr.msk.f32.gmra.mrb[18].mxu0 %vm1040_vm9, %v6244_v39 }
 0x197   : > { %4731 = vmatprep.mubr.msk.f32.mxu0 %vm1040_vm9, %v6263_v30 }
 0x19a   : > { %4732 = vmatmul.mubr.msk.f32.gmra.mrb[20].mxu0 %vm1040_vm9, %v6266_v48 }
 0x19b   : > { %4734 = vmatprep.mubr.msk.f32.mxu0 %vm1040_vm9, %v6285_v54 }
 0x19e   : > { %4735 = vmatmul.mubr.msk.f32.gmra.mrb[22].mxu0 %vm1040_vm9, %v6288_v61 }
 0x19f   : > { %4737 = vmatprep.mubr.msk.f32.mxu0 %vm1040_vm9, %v6307_v31 }
 0x1a2   : > { %4738 = vmatmul.mubr.msk.f32.gmra.mrb[24].mxu0 %vm1040_vm9, %v6310_v7 }
 0x1a3   : > { %4740 = vmatprep.mubr.msk.f32.mxu0 %vm1040_vm9, %v6329_v55 }
 0x1a6   : > { %4741 = vmatmul.mubr.msk.f32.gmra.mrb[26].mxu0 %vm1040_vm9, %v6332_v18 }
 0x1a7   : > { %4743 = vmatprep.mubr.msk.f32.mxu0 %vm1040_vm9, %v6351_v34 }
 0x1aa   : > { %4744 = vmatmul.mubr.msk.f32.gmra.mrb[28].mxu0 %vm1040_vm9, %v6354_v36 }
 0x1ab   : > { %4746 = vmatprep.mubr.msk.f32.mxu0 %vm1040_vm9, %v6373_v56 }
 0x1ae   : > { %4747 = vmatmul.mubr.msk.f32.gmra.mrb[30].mxu0 %vm1040_vm9, %v6376_v49 }
 0x1af   : > { %4753 = vmatprep.mubr.msk.f32.mxu0 %vm1040_vm9, %v6073_v1  ;;  %v404_v1 = vsel %vm368_vm6, %v367_v52, %v349_v20 }
 0x1b2   : > { %4754 = vmatmul.mubr.msk.f32.vlgmr.msra.gmra.mrb[0].mxu0 %vm1040_vm9, %v6076_v4  ;;  %v1603_v4 = vpop.permute.xlu0 %1602 }
 0x1b3   : > { %4756 = vmatprep.mubr.msk.f32.mxu0 %vm1040_vm9, %v6097_v37  ;;  %v511_v37 = vsel %vm221_vm7, %v476_v51, %v404_v1 }
 0x1b6   : > { %4757 = vmatmul.mubr.msk.f32.gmra.mrb[2].mxu0 %vm1040_vm9, %v6100_v59  ;;  %v1616_v59 = vsel %vm258_vm0, %v511_v37, %v1603_v4  ;;  %v1611_v43 = vpop.permute.xlu0 %1610 }
 0x1b7   : > { %4759 = vmatprep.mubr.msk.f32.mxu0 %vm1040_vm9, %v6131_v22  ;;  %v386_v22 = vsel %vm368_vm6, %v349_v20, %v367_v52 }
 0x1ba   : > { %4760 = vmatmul.mubr.msk.f32.gmra.mrb[4].mxu0 %vm1040_vm9, %v6134_v63  ;;  %v1618_v63 = vsel %vm982_vm8, %v1616_v59, %v1611_v43 }
 0x1bb   : > { %4762 = vmatprep.mubr.msk.f32.mxu0 %vm1040_vm9, %v6153_v44  ;;  %v1617_v44 = vsel %vm258_vm0, %v386_v22, %v1605_v42 }
 0x1be   : > { %4763 = vmatmul.mubr.msk.f32.gmra.mrb[6].mxu0 %vm1040_vm9, %v6156_v58  ;;  %v1613_v58 = vpop.permute.xlu1 %1612 }
 0x1bf   : > { %4765 = vmatprep.mubr.msk.f32.mxu0 %vm1040_vm9, %v6175_v53  ;;  %v1619_v53 = vsel %vm982_vm8, %v1617_v44, %v1613_v58 }
 0x1c2   : > { %4766 = vmatmul.mubr.msk.f32.gmra.mrb[8].mxu0 %vm1040_vm9, %v6178_v3 }
 0x1c3   : > { %4768 = vmatprep.mubr.msk.f32.mxu0 %vm1040_vm9, %v6197_v29 }
 0x1c6   : > { %4769 = vmatmul.mubr.msk.f32.gmra.mrb[10].mxu0 %vm1040_vm9, %v6200_v15 }
 0x1c7   : > { %4771 = vmatprep.mubr.msk.f32.mxu0 %vm1040_vm9, %v6219_v25 }
 0x1ca   : > { %4772 = vmatmul.mubr.msk.f32.gmra.mrb[12].mxu0 %vm1040_vm9, %v6222_v24 }
 0x1cb   : > { %4774 = vmatprep.mubr.msk.f32.mxu0 %vm1040_vm9, %v6241_v27 }
 0x1ce   : > { %4775 = vmatmul.mubr.msk.f32.gmra.mrb[14].mxu0 %vm1040_vm9, %v6244_v39 }
 0x1cf   : > { %4777 = vmatprep.mubr.msk.f32.mxu0 %vm1040_vm9, %v6263_v30 }
 0x1d2   : > { %4778 = vmatmul.mubr.msk.f32.gmra.mrb[16].mxu0 %vm1040_vm9, %v6266_v48 }
 0x1d3   : > { %4780 = vmatprep.mubr.msk.f32.mxu0 %vm1040_vm9, %v6285_v54 }
 0x1d6   : > { %4781 = vmatmul.mubr.msk.f32.gmra.mrb[18].mxu0 %vm1040_vm9, %v6288_v61 }
 0x1d7   : > { %4783 = vmatprep.mubr.msk.f32.mxu0 %vm1040_vm9, %v6307_v31 }
 0x1da   : > { %4784 = vmatmul.mubr.msk.f32.gmra.mrb[20].mxu0 %vm1040_vm9, %v6310_v7 }
 0x1db   : > { %4786 = vmatprep.mubr.msk.f32.mxu0 %vm1040_vm9, %v6329_v55 }
 0x1de   : > { %4787 = vmatmul.mubr.msk.f32.gmra.mrb[22].mxu0 %vm1040_vm9, %v6332_v18 }
 0x1df   : > { %4789 = vmatprep.mubr.msk.f32.mxu0 %vm1040_vm9, %v6351_v34 }
 0x1e2   : > { %4790 = vmatmul.mubr.msk.f32.gmra.mrb[24].mxu0 %vm1040_vm9, %v6354_v36 }
 0x1e3   : > { %4792 = vmatprep.mubr.msk.f32.mxu0 %vm1040_vm9, %v6373_v56 }
 0x1e6   : > { %4793 = vmatmul.mubr.msk.f32.gmra.mrb[26].mxu0 %vm1040_vm9, %v6376_v49 }
 0x1e7   : > { %4795 = vmatprep.mubr.msk.f32.mxu0 %vm1040_vm9, %v6395_v13 }
 0x1ea   : > { %4796 = vmatmul.mubr.msk.f32.gmra.mrb[28].mxu0 %vm1040_vm9, %v6398_v62 }
 0x1eb   : > { %4798 = vmatprep.mubr.msk.f32.mxu0 %vm1040_vm9, %v1618_v63 }
 0x1ee   : > { %4799 = vmatmul.mubr.msk.f32.gmra.mrb[30].mxu0 %vm1040_vm9, %v1619_v53 }
 0x285   : > { %v6557_v3 = vpop.f32.mrb[0].mxu0 }
 0x286   : > { %v1890_v29 = vsel %vm258_vm0, %v6557_v3, 0.0  ;;  %v6561_v15 = vpop.f32.mrb[1].mxu0 }
 0x287   : > { %v1889_v25 = vsel %vm258_vm0, %v6561_v15, 0.0 }
 0x288   : > { %v1891_v24 = vadd.f32 %v1890_v29, %v1889_v25 }
 0x289   : > { %v6565_v27 = vpop.f32.mrb[2].mxu0 }
 0x28a   : > { %v6567_v39 = vpop.f32.mrb[3].mxu0  ;;  %v1894_v54 = vsel %vm258_vm0, %v6565_v27, 0.0 }
 0x28b   : > { %v1892_v30 = vsel %vm258_vm0, %v6567_v39, 0.0 }
 0x28c   : > { %v1893_v48 = vadd.f32 %v1892_v30, %v1891_v24 }
 0x28d   : > { %v6573_v61 = vpop.f32.mrb[4].mxu0 }
 0x28e   : > { %v6575_v31 = vpop.f32.mrb[5].mxu0  ;;  %v1895_v7 = vadd.f32 %v1894_v54, %v1893_v48  ;;  %v1898_v34 = vsel %vm258_vm0, %v6573_v61, 0.0 }
 0x28f   : > { %v1896_v55 = vsel %vm258_vm0, %v6575_v31, 0.0 }
 0x290   : > { %v1897_v18 = vadd.f32 %v1896_v55, %v1895_v7 }
 0x291   : > { %v6581_v36 = vpop.f32.mrb[6].mxu0 }
 0x292   : > { %v6583_v56 = vpop.f32.mrb[7].mxu0  ;;  %v1899_v49 = vadd.f32 %v1898_v34, %v1897_v18  ;;  %v1902_v14 = vsel %vm258_vm0, %v6581_v36, 0.0 }
 0x293   : > { %v1900_v0 = vsel %vm258_vm0, %v6583_v56, 0.0 }
 0x294   : > { %v1901_v12 = vadd.f32 %v1900_v0, %v1899_v49 }
 0x295   : > { %v6589_v38 = vpop.f32.mrb[8].mxu0 }
 0x296   : > { %v6591_v60 = vpop.f32.mrb[9].mxu0  ;;  %v1903_v17 = vadd.f32 %v1902_v14, %v1901_v12  ;;  %v1906_v5 = vsel %vm258_vm0, %v6589_v38, 0.0 }
 0x297   : > { %v1904_v46 = vsel %vm258_vm0, %v6591_v60, 0.0 }
 0x298   : > { %v1905_v10 = vadd.f32 %v1904_v46, %v1903_v17 }
 0x299   : > { %v6597_v8 = vpop.f32.mrb[10].mxu0 }
 0x29a   : > { %v6599_v26 = vpop.f32.mrb[11].mxu0  ;;  %v1907_v21 = vadd.f32 %v1906_v5, %v1905_v10  ;;  %v1910_v2 = vsel %vm258_vm0, %v6597_v8, 0.0 }
 0x29b   : > { %v1908_v13 = vsel %vm258_vm0, %v6599_v26, 0.0 }
 0x29c   : > { %v1909_v62 = vadd.f32 %v1908_v13, %v1907_v21 }
 0x29d   : > { %v6605_v50 = vpop.f32.mrb[12].mxu0 }
 0x29e   : > { %v6607_v23 = vpop.f32.mrb[13].mxu0  ;;  %v1911_v47 = vadd.f32 %v1910_v2, %v1909_v62  ;;  %v1914_v57 = vsel %vm258_vm0, %v6605_v50, 0.0 }
 0x29f   : > { %v1912_v6 = vsel %vm258_vm0, %v6607_v23, 0.0 }
 0x2a0   : > { %v1913_v35 = vadd.f32 %v1912_v6, %v1911_v47 }
 0x2a1   : > { %v6613_v45 = vpop.f32.mrb[14].mxu0 }
 0x2a2   : > { %v6615_v16 = vpop.f32.mrb[15].mxu0  ;;  %v1915_v40 = vadd.f32 %v1914_v57, %v1913_v35  ;;  %v1918_v20 = vsel %vm258_vm0, %v6613_v45, 0.0 }
 0x2a3   : > { %v1916_v41 = vsel %vm258_vm0, %v6615_v16, 0.0 }
 0x2a4   : > { %v1917_v28 = vadd.f32 %v1916_v41, %v1915_v40 }
 0x2a5   : > { %v6621_v52 = vpop.f32.mrb[16].mxu0 }
 0x2a6   : > { %v6623_v51 = vpop.f32.mrb[17].mxu0  ;;  %v1919_v1 = vadd.f32 %v1918_v20, %v1917_v28  ;;  %v1922_v42 = vsel %vm258_vm0, %v6621_v52, 0.0 }
 0x2a7   : > { %v1920_v4 = vsel %vm258_vm0, %v6623_v51, 0.0 }
 0x2a8   : > { %v1921_v37 = vadd.f32 %v1920_v4, %v1919_v1 }
 0x2a9   : > { %v6629_v59 = vpop.f32.mrb[18].mxu0 }
 0x2aa   : > { %v6631_v43 = vpop.f32.mrb[19].mxu0  ;;  %v1923_v22 = vadd.f32 %v1922_v42, %v1921_v37  ;;  %v1926_v58 = vsel %vm258_vm0, %v6629_v59, 0.0 }
 0x2ab   : > { %v1924_v63 = vsel %vm258_vm0, %v6631_v43, 0.0 }
 0x2ac   : > { %v1925_v44 = vadd.f32 %v1924_v63, %v1923_v22 }
 0x2ad   : > { %v6637_v53 = vpop.f32.mrb[20].mxu0 }
 0x2ae   : > { %v6639_v29 = vpop.f32.mrb[21].mxu0  ;;  %v1927_v25 = vadd.f32 %v1926_v58, %v1925_v44  ;;  %v1930_v48 = vsel %vm258_vm0, %v6637_v53, 0.0 }
 0x2af   : > { %v1928_v24 = vsel %vm258_vm0, %v6639_v29, 0.0 }
 0x2b0   : > { %v1929_v30 = vadd.f32 %v1928_v24, %v1927_v25 }
 0x2b1   : > { %v4788_v54 = vpop.f32.mrb[22].mxu0 }
 0x2b2   : > { %v1808_v7 = vpop.f32.mrb[23].mxu0  ;;  %v1931_v55 = vadd.f32 %v1930_v48, %v1929_v30  ;;  %v1934_v49 = vsel %vm258_vm0, %v4788_v54, 0.0 }
 0x2b3   : > { %v1932_v18 = vsel %vm258_vm0, %v1808_v7, 0.0 }
 0x2b4   : > { %v1933_v34 = vadd.f32 %v1932_v18, %v1931_v55 }
 0x2b5   : > { %v4791_v0 = vpop.f32.mrb[24].mxu0 }
 0x2b6   : > { %v1818_v12 = vpop.f32.mrb[25].mxu0  ;;  %v1935_v14 = vadd.f32 %v1934_v49, %v1933_v34  ;;  %v1938_v10 = vsel %vm258_vm0, %v4791_v0, 0.0 }
 0x2b7   : > { %v1936_v17 = vsel %vm258_vm0, %v1818_v12, 0.0 }
 0x2b8   : > { %v1937_v46 = vadd.f32 %v1936_v17, %v1935_v14 }
 0x2b9   : > { %v4794_v5 = vpop.f32.mrb[26].mxu0 }
 0x2ba   : > { %v1828_v21 = vpop.f32.mrb[27].mxu0  ;;  %v1939_v13 = vadd.f32 %v1938_v10, %v1937_v46  ;;  %v1942_v47 = vsel %vm258_vm0, %v4794_v5, 0.0 }
 0x2bb   : > { %v1940_v62 = vsel %vm258_vm0, %v1828_v21, 0.0 }
 0x2bc   : > { %v1941_v2 = vadd.f32 %v1940_v62, %v1939_v13 }
 0x2bd   : > { %v4797_v6 = vpop.f32.mrb[28].mxu0 }
 0x2be   : > { %v1838_v35 = vpop.f32.mrb[29].mxu0  ;;  %v1943_v57 = vadd.f32 %v1942_v47, %v1941_v2  ;;  %v1946_v28 = vsel %vm258_vm0, %v4797_v6, 0.0 }
 0x2bf   : > { %v1944_v40 = vsel %vm258_vm0, %v1838_v35, 0.0 }
 0x2c0   : > { %v1945_v41 = vadd.f32 %v1944_v40, %v1943_v57 }
 0x2c1   : > { %v4800_v20 = vpop.f32.mrb[30].mxu0 }
 0x2c2   : > { %v1848_v1 = vpop.f32.mrb[31].mxu0  ;;  %v1947_v4 = vadd.f32 %v1946_v28, %v1945_v41  ;;  %v1950_v22 = vsel %vm258_vm0, %v4800_v20, 0.0 }
 0x2c3   : > { %v1948_v37 = vsel %vm258_vm0, %v1848_v1, 0.0 }
 0x2c4   : > { %v1949_v42 = vadd.f32 %v1948_v37, %v1947_v4 }
 0x2c6   : > { %v1951_v63 = vadd.f32 %v1950_v22, %v1949_v42 }
 0x2c8   : > { %v1952_v44 = vrot.slane %v1951_v63, 4 }
 0x2ca   : > { %v1953_v58 = vadd.f32 %v1952_v44, %v1951_v63 }
 0x2cc   : > { %v1954_v25 = vrot.slane %v1953_v58, 2 }
 0x2ce   : > { %v1955_v24 = vadd.f32 %v1954_v25, %v1953_v58 }
 0x2d0   : > { %v1956_v30 = vrot.slane %v1955_v24, 1 }
 0x2d2   : > { %v1957_v48 = vadd.f32 %v1956_v30, %v1955_v24 }
 0x2d4   : > { %v1958_v55 = vmul.f32 0.00390625, %v1957_v48 }
 0x2d6   : > { %v6656_v18 = vsub.f32 %v6561_v15, %v1958_v55  ;;  %v6659_v34 = vsub.f32 %v6557_v3, %v1958_v55  ;;  %v6662_v49 = vsub.f32 %v6567_v39, %v1958_v55  ;;  %v6665_v14 = vsub.f32 %v6565_v27, %v1958_v55 }
 0x2d7   : > { %v6668_v17 = vsub.f32 %v6575_v31, %v1958_v55  ;;  %v6671_v46 = vsub.f32 %v6573_v61, %v1958_v55  ;;  %v6674_v10 = vsub.f32 %v6583_v56, %v1958_v55  ;;  %v6677_v15 = vsub.f32 %v6581_v36, %v1958_v55 }
 0x2d8   : > { %v6680_v3 = vsub.f32 %v6591_v60, %v1958_v55  ;;  %v6683_v39 = vsub.f32 %v6589_v38, %v1958_v55  ;;  %v6686_v27 = vsub.f32 %v6599_v26, %v1958_v55  ;;  %v6689_v31 = vsub.f32 %v6597_v8, %v1958_v55 }
 0x2d9   : > { %v6692_v61 = vsub.f32 %v6607_v23, %v1958_v55  ;;  %v6695_v56 = vsub.f32 %v6605_v50, %v1958_v55  ;;  %v6698_v36 = vsub.f32 %v6615_v16, %v1958_v55  ;;  %v6701_v60 = vsub.f32 %v6613_v45, %v1958_v55 }
 0x2da   : > { %v6704_v38 = vsub.f32 %v6623_v51, %v1958_v55  ;;  %v6707_v26 = vsub.f32 %v6621_v52, %v1958_v55  ;;  %v6710_v8 = vsub.f32 %v6631_v43, %v1958_v55  ;;  %v6713_v23 = vsub.f32 %v6629_v59, %v1958_v55 }
 0x2db   : > { %v6716_v50 = vsub.f32 %v6639_v29, %v1958_v55  ;;  %v6719_v16 = vsub.f32 %v6637_v53, %v1958_v55  ;;  %v6721_v45 = vsub.f32 %v1808_v7, %v1958_v55  ;;  %v6723_v13 = vsub.f32 %v4788_v54, %v1958_v55 }
 0x2dc   : > { %v6725_v51 = vsub.f32 %v1818_v12, %v1958_v55  ;;  %v6727_v52 = vsub.f32 %v4791_v0, %v1958_v55  ;;  %v6729_v62 = vsub.f32 %v1828_v21, %v1958_v55  ;;  %v6731_v43 = vsub.f32 %v4794_v5, %v1958_v55 }
 0x2dd   : > { %v6733_v59 = vsub.f32 %v1838_v35, %v1958_v55  ;;  %v6735_v2 = vsub.f32 %v4797_v6, %v1958_v55  ;;  %v6737_v29 = vsub.f32 %v1848_v1, %v1958_v55  ;;  %v6739_v53 = vsub.f32 %v4800_v20, %v1958_v55 }
 0x2de   : > { %v1991_v54 = vmul.f32 %v6656_v18, %v6656_v18  ;;  %v1992_v7 = vmul.f32 %v6659_v34, %v6659_v34  ;;  %v1993_v0 = vmul.f32 %v6662_v49, %v6662_v49  ;;  %v1994_v12 = vmul.f32 %v6665_v14, %v6665_v14 }
 0x2df   : > { %v1995_v6 = vmul.f32 %v6668_v17, %v6668_v17  ;;  %v1996_v40 = vmul.f32 %v6671_v46, %v6671_v46  ;;  %v1997_v20 = vmul.f32 %v6674_v10, %v6674_v10  ;;  %v1998_v37 = vmul.f32 %v6677_v15, %v6677_v15 }
 0x2e0   : > { %v2023_v5 = vsel %vm258_vm0, %v1991_v54, 0.0  ;;  %v2024_v21 = vsel %vm258_vm0, %v1992_v7, 0.0  ;;  %v2026_v35 = vsel %vm258_vm0, %v1993_v0, 0.0  ;;  %v2028_v41 = vsel %vm258_vm0, %v1994_v12, 0.0 }
 0x2e1   : > { %v2025_v47 = vadd.f32 %v2024_v21, %v2023_v5  ;;  %v2030_v1 = vsel %vm258_vm0, %v1995_v6, 0.0  ;;  %v2032_v42 = vsel %vm258_vm0, %v1996_v40, 0.0  ;;  %v1999_v63 = vmul.f32 %v6680_v3, %v6680_v3 }
 0x2e2   : > { %v2034_v44 = vsel %vm258_vm0, %v1997_v20, 0.0  ;;  %v2000_v25 = vmul.f32 %v6683_v39, %v6683_v39  ;;  %v2036_v24 = vsel %vm258_vm0, %v1998_v37, 0.0  ;;  %v2001_v48 = vmul.f32 %v6686_v27, %v6686_v27 }
 0x2e3   : > { %v2027_v57 = vadd.f32 %v2026_v35, %v2025_v47  ;;  %v2038_v55 = vsel %vm258_vm0, %v1999_v63, 0.0  ;;  %v2002_v7 = vmul.f32 %v6689_v31, %v6689_v31  ;;  %v2003_v5 = vmul.f32 %v6692_v61, %v6692_v61 }
 0x2e4   : > { %v2040_v0 = vsel %vm258_vm0, %v2000_v25, 0.0  ;;  %v2042_v21 = vsel %vm258_vm0, %v2001_v48, 0.0  ;;  %v2004_v6 = vmul.f32 %v6695_v56, %v6695_v56  ;;  %v2005_v40 = vmul.f32 %v6698_v36, %v6698_v36 }
 0x2e5   : > { %v2029_v28 = vadd.f32 %v2028_v41, %v2027_v57  ;;  %v2044_v35 = vsel %vm258_vm0, %v2002_v7, 0.0  ;;  %v2046_v41 = vsel %vm258_vm0, %v2003_v5, 0.0  ;;  %v2006_v20 = vmul.f32 %v6701_v60, %v6701_v60 }
 0x2e6   : > { %v2007_v37 = vmul.f32 %v6704_v38, %v6704_v38  ;;  %v2008_v63 = vmul.f32 %v6707_v26, %v6707_v26  ;;  %v2009_v25 = vmul.f32 %v6710_v8, %v6710_v8  ;;  %v2010_v48 = vmul.f32 %v6713_v23, %v6713_v23 }
 0x2e7   : > { %v2031_v4 = vadd.f32 %v2030_v1, %v2029_v28  ;;  %v2048_v1 = vsel %vm258_vm0, %v2004_v6, 0.0  ;;  %v2011_v7 = vmul.f32 %v6716_v50, %v6716_v50  ;;  %v2012_v5 = vmul.f32 %v6719_v16, %v6719_v16 }
 0x2e8   : > { %v2013_v6 = vmul.f32 %v6721_v45, %v6721_v45 }
 0x2e9   : > { %v2033_v22 = vadd.f32 %v2032_v42, %v2031_v4  ;;  %v2050_v42 = vsel %vm258_vm0, %v2005_v40, 0.0  ;;  %v2014_v40 = vmul.f32 %v6723_v13, %v6723_v13 }
 0x2eb   : > { %v2035_v58 = vadd.f32 %v2034_v44, %v2033_v22  ;;  %v2052_v44 = vsel %vm258_vm0, %v2006_v20, 0.0  ;;  %v2015_v20 = vmul.f32 %v6725_v51, %v6725_v51 }
 0x2ed   : > { %v2037_v30 = vadd.f32 %v2036_v24, %v2035_v58  ;;  %v2054_v24 = vsel %vm258_vm0, %v2007_v37, 0.0  ;;  %v2016_v37 = vmul.f32 %v6727_v52, %v6727_v52 }
 0x2ef   : > { %v2039_v54 = vadd.f32 %v2038_v55, %v2037_v30  ;;  %v2056_v55 = vsel %vm258_vm0, %v2008_v63, 0.0  ;;  %v2017_v63 = vmul.f32 %v6729_v62, %v6729_v62 }
 0x2f1   : > { %v2041_v12 = vadd.f32 %v2040_v0, %v2039_v54  ;;  %v2058_v0 = vsel %vm258_vm0, %v2009_v25, 0.0  ;;  %v2018_v25 = vmul.f32 %v6731_v43, %v6731_v43 }
 0x2f3   : > { %v2043_v47 = vadd.f32 %v2042_v21, %v2041_v12  ;;  %v2060_v21 = vsel %vm258_vm0, %v2010_v48, 0.0  ;;  %v2019_v48 = vmul.f32 %v6733_v59, %v6733_v59 }
 0x2f5   : > { %v2045_v57 = vadd.f32 %v2044_v35, %v2043_v47  ;;  %v2062_v35 = vsel %vm258_vm0, %v2011_v7, 0.0  ;;  %v2020_v7 = vmul.f32 %v6735_v2, %v6735_v2 }
 0x2f7   : > { %v2047_v28 = vadd.f32 %v2046_v41, %v2045_v57  ;;  %v2064_v41 = vsel %vm258_vm0, %v2012_v5, 0.0  ;;  %v2021_v5 = vmul.f32 %v6737_v29, %v6737_v29 }
 0x2f9   : > { %v2049_v4 = vadd.f32 %v2048_v1, %v2047_v28  ;;  %v2066_v1 = vsel %vm258_vm0, %v2013_v6, 0.0  ;;  %v2022_v6 = vmul.f32 %v6739_v53, %v6739_v53 }
 0x2fb   : > { %v2051_v22 = vadd.f32 %v2050_v42, %v2049_v4  ;;  %v2068_v42 = vsel %vm258_vm0, %v2014_v40, 0.0  ;;  %v2082_v40 = vsel %vm258_vm0, %v2021_v5, 0.0 }
 0x2fd   : > { %v2053_v58 = vadd.f32 %v2052_v44, %v2051_v22  ;;  %v2070_v44 = vsel %vm258_vm0, %v2015_v20, 0.0 }
 0x2ff   : > { %v2055_v30 = vadd.f32 %v2054_v24, %v2053_v58  ;;  %v2072_v24 = vsel %vm258_vm0, %v2016_v37, 0.0 }
 0x301   : > { %v2057_v54 = vadd.f32 %v2056_v55, %v2055_v30  ;;  %v2074_v55 = vsel %vm258_vm0, %v2017_v63, 0.0 }
 0x303   : > { %v2059_v12 = vadd.f32 %v2058_v0, %v2057_v54  ;;  %v2076_v0 = vsel %vm258_vm0, %v2018_v25, 0.0 }
 0x305   : > { %v2061_v47 = vadd.f32 %v2060_v21, %v2059_v12  ;;  %v2078_v21 = vsel %vm258_vm0, %v2019_v48, 0.0 }
 0x307   : > { %v2063_v57 = vadd.f32 %v2062_v35, %v2061_v47  ;;  %v2080_v35 = vsel %vm258_vm0, %v2020_v7, 0.0 }
 0x309   : > { %v2065_v28 = vadd.f32 %v2064_v41, %v2063_v57 }
 0x30b   : > { %v2067_v4 = vadd.f32 %v2066_v1, %v2065_v28  ;;  %v2084_v28 = vsel %vm258_vm0, %v2022_v6, 0.0 }
 0x30d   : > { %v2069_v22 = vadd.f32 %v2068_v42, %v2067_v4 }
 0x30f   : > { %v2071_v58 = vadd.f32 %v2070_v44, %v2069_v22 }
 0x311   : > { %v2073_v30 = vadd.f32 %v2072_v24, %v2071_v58 }
 0x313   : > { %v2075_v54 = vadd.f32 %v2074_v55, %v2073_v30 }
 0x315   : > { %v2077_v12 = vadd.f32 %v2076_v0, %v2075_v54 }
 0x317   : > { %v2079_v47 = vadd.f32 %v2078_v21, %v2077_v12 }
 0x319   : > { %v2081_v57 = vadd.f32 %v2080_v35, %v2079_v47 }
 0x31b   : > { %v2083_v41 = vadd.f32 %v2082_v40, %v2081_v57 }
 0x31d   : > { %v2085_v20 = vadd.f32 %v2084_v28, %v2083_v41 }
 0x31f   : > { %v2086_v1 = vrot.slane %v2085_v20, 4 }
 0x321   : > { %v2087_v4 = vadd.f32 %v2086_v1, %v2085_v20 }
 0x323   : > { %v2088_v37 = vrot.slane %v2087_v4, 2 }
 0x325   : > { %v2089_v42 = vadd.f32 %v2088_v37, %v2087_v4 }
 0x327   : > { %v2090_v22 = vrot.slane %v2089_v42, 1 }
 0x329   : > { %v2091_v63 = vadd.f32 %v2090_v22, %v2089_v42 }
 0x32b   : > { %v2092_v44 = vmul.f32 0.00390625, %v2091_v63 }
 0x32d   : > { %v2093_v58 = vadd.f32 1e-05, %v2092_v44 }
 0x32f   : > { %5194 = vrsqrt.f32 %v2093_v58 }
 0x339   : > { %v5195_v25 = vpop.eup %5194 }
 0x33a   : > { %v2125_v24 = vmul.f32 %v5195_v25, %v6737_v29  ;;  %v2095_v30 = vmul.f32 %v5195_v25, %v6656_v18  ;;  %v2096_v48 = vmul.f32 %v5195_v25, %v6659_v34  ;;  %v2097_v55 = vmul.f32 %v5195_v25, %v6662_v49 }
 0x33b   : > { %v2098_v54 = vmul.f32 %v5195_v25, %v6665_v14  ;;  %v2099_v7 = vmul.f32 %v5195_v25, %v6668_v17  ;;  %v2100_v0 = vmul.f32 %v5195_v25, %v6671_v46  ;;  %v2101_v12 = vmul.f32 %v5195_v25, %v6674_v10 }
 0x33c   : > { %v2157_v5 = vmax.f32 %v2125_v24, 0.0  ;;  %v2102_v21 = vmul.f32 %v5195_v25, %v6677_v15  ;;  %v2103_v47 = vmul.f32 %v5195_v25, %v6680_v3  ;;  %v2104_v29 = vmul.f32 %v5195_v25, %v6683_v39 }
 0x33d   : > { %v2105_v18 = vmul.f32 %v5195_v25, %v6686_v27  ;;  %v2106_v34 = vmul.f32 %v5195_v25, %v6689_v31  ;;  %v2107_v49 = vmul.f32 %v5195_v25, %v6692_v61  ;;  %v2108_v14 = vmul.f32 %v5195_v25, %v6695_v56 }
 0x33e   : > { %2189 = vst.msk [vmem:[#allocation2 + $0x100] sm:$0xff] %vm258_vm0, %v2157_v5  ;;  %v2109_v17 = vmul.f32 %v5195_v25, %v6698_v36  ;;  %v2110_v46 = vmul.f32 %v5195_v25, %v6701_v60  ;;  %v2111_v10 = vmul.f32 %v5195_v25, %v6704_v38  ;;  %v2112_v15 = vmul.f32 %v5195_v25, %v6707_v26 }
 0x33f   : > { %v2113_v3 = vmul.f32 %v5195_v25, %v6710_v8  ;;  %v6859_v39 = vmul.f32 %v5195_v25, %v6713_v23  ;;  %v6862_v27 = vmul.f32 %v5195_v25, %v6716_v50  ;;  %v6865_v31 = vmul.f32 %v5195_v25, %v6719_v16 }
 0x340   : > { %v6868_v61 = vmul.f32 %v5195_v25, %v6721_v45  ;;  %v6871_v56 = vmul.f32 %v5195_v25, %v6723_v13  ;;  %v6874_v36 = vmul.f32 %v5195_v25, %v6725_v51  ;;  %v6877_v60 = vmul.f32 %v5195_v25, %v6727_v52 }
 0x341   : > { %v6880_v38 = vmul.f32 %v5195_v25, %v6729_v62  ;;  %v6883_v26 = vmul.f32 %v5195_v25, %v6731_v43  ;;  %v6886_v8 = vmul.f32 %v5195_v25, %v6733_v59  ;;  %v6889_v23 = vmul.f32 %v5195_v25, %v6735_v2 }
 0x342   : > { %v6892_v50 = vmul.f32 %v5195_v25, %v6739_v53  ;;  %v2128_v16 = vmax.f32 %v2096_v48, 0.0  ;;  %v2127_v45 = vmax.f32 %v2095_v30, 0.0  ;;  %v2129_v13 = vmax.f32 %v2097_v55, 0.0 }
 0x343   : > { %v2130_v51 = vmax.f32 %v2098_v54, 0.0  ;;  %v2131_v52 = vmax.f32 %v2099_v7, 0.0  ;;  %v2132_v6 = vmax.f32 %v2100_v0, 0.0  ;;  %v2133_v62 = vmax.f32 %v2101_v12, 0.0 }
 0x344   : > { %2160 = vst.msk [vmem:[#allocation2 + $0x18] sm:$0xff] %vm258_vm0, %v2128_v16  ;;  %v2134_v43 = vmax.f32 %v2102_v21, 0.0  ;;  %v2135_v35 = vmax.f32 %v2103_v47, 0.0  ;;  %v2136_v57 = vmax.f32 %v2104_v29, 0.0  ;;  %v2137_v59 = vmax.f32 %v2105_v18, 0.0  ;;  %2159 = vst.msk [vmem:[#allocation2 + $0x10] sm:$0xff] %vm258_vm0, %v2127_v45 }
 0x345   : > { %2161 = vst.msk [vmem:[#allocation2 + $0x20] sm:$0xff] %vm258_vm0, %v2129_v13  ;;  %2191 = vst.msk [vmem:[#allocation2] sm:$0xff] %vm258_vm0, %v2129_v13  ;;  %v2138_v2 = vmax.f32 %v2106_v34, 0.0  ;;  %v2139_v53 = vmax.f32 %v2107_v49, 0.0  ;;  %v2140_v40 = vmax.f32 %v2108_v14, 0.0  ;;  %v2141_v41 = vmax.f32 %v2109_v17, 0.0 }
 0x346   : > { %2162 = vst.msk [vmem:[#allocation2 + $0x28] sm:$0xff] %vm258_vm0, %v2130_v51  ;;  %2163 = vst.msk [vmem:[#allocation2 + $0x30] sm:$0xff] %vm258_vm0, %v2131_v52  ;;  %v2142_v28 = vmax.f32 %v2110_v46, 0.0  ;;  %v2143_v20 = vmax.f32 %v2111_v10, 0.0  ;;  %v2144_v1 = vmax.f32 %v2112_v15, 0.0  ;;  %v2145_v4 = vmax.f32 %v2113_v3, 0.0 }
 0x347   : > { %2164 = vst.msk [vmem:[#allocation2 + $0x38] sm:$0xff] %vm258_vm0, %v2132_v6  ;;  %2165 = vst.msk [vmem:[#allocation2 + $0x40] sm:$0xff] %vm258_vm0, %v2133_v62  ;;  %v2146_v37 = vmax.f32 %v6859_v39, 0.0  ;;  %v2147_v42 = vmax.f32 %v6862_v27, 0.0  ;;  %v2148_v22 = vmax.f32 %v6865_v31, 0.0  ;;  %v2149_v63 = vmax.f32 %v6868_v61, 0.0 }
 0x348   : > { %2192 = vst.msk [vmem:[#allocation2 + $0x8] sm:$0xff] %vm258_vm0, %v2130_v51  ;;  %2166 = vst.msk [vmem:[#allocation2 + $0x48] sm:$0xff] %vm258_vm0, %v2134_v43  ;;  %v2150_v44 = vmax.f32 %v6871_v56, 0.0  ;;  %v2151_v58 = vmax.f32 %v6874_v36, 0.0  ;;  %v2152_v25 = vmax.f32 %v6877_v60, 0.0  ;;  %v2153_v24 = vmax.f32 %v6880_v38, 0.0 }
 0x349   : > { %2167 = vst.msk [vmem:[#allocation2 + $0x50] sm:$0xff] %vm258_vm0, %v2135_v35  ;;  %2168 = vst.msk [vmem:[#allocation2 + $0x58] sm:$0xff] %vm258_vm0, %v2136_v57  ;;  %v2154_v30 = vmax.f32 %v6883_v26, 0.0  ;;  %v2155_v48 = vmax.f32 %v6886_v8, 0.0  ;;  %v2156_v55 = vmax.f32 %v6889_v23, 0.0  ;;  %v2158_v54 = vmax.f32 %v6892_v50, 0.0 }
 0x34a   : > { %2169 = vst.msk [vmem:[#allocation2 + $0x60] sm:$0xff] %vm258_vm0, %v2137_v59  ;;  %2170 = vst.msk [vmem:[#allocation2 + $0x68] sm:$0xff] %vm258_vm0, %v2138_v2  ;;  %v6945_v12 = vld [vmem:[#allocation2 + $0x100] sm:$0xff] }
 0x34b   : > { %2171 = vst.msk [vmem:[#allocation2 + $0x70] sm:$0xff] %vm258_vm0, %v2139_v53  ;;  %2172 = vst.msk [vmem:[#allocation2 + $0x78] sm:$0xff] %vm258_vm0, %v2140_v40  ;;  %v6935_v7 = vld [vmem:[#allocation2 + $0x18] sm:$0xff]  ;;  %v6937_v0 = vld [vmem:[#allocation2 + $0x10] sm:$0xff] }
 0x34c   : > { %2173 = vst.msk [vmem:[#allocation2 + $0x80] sm:$0xff] %vm258_vm0, %v2141_v41  ;;  %2174 = vst.msk [vmem:[#allocation2 + $0x88] sm:$0xff] %vm258_vm0, %v2142_v28  ;;  %2629 = vrot.lane.b32.xlu1 %v6935_v7, %s5361_s18  ;;  %2627 = vrot.lane.b32.xlu0 %v6937_v0, %s5361_s18  ;;  %v6954_v47 = vld [vmem:[#allocation2 + $0x20] sm:$0xff]  ;;  %v2430_v14 = vrot.slane %v6935_v7, 1  ;;  %v2490_v17 = vrot.slane %v6935_v7, %v5650_v32  ;;  %v2412_v3 = vrot.slane %v6937_v0, 1 }
 0x34d   : > { %2175 = vst.msk [vmem:[#allocation2 + $0x90] sm:$0xff] %vm258_vm0, %v2143_v20  ;;  %2176 = vst.msk [vmem:[#allocation2 + $0x98] sm:$0xff] %vm258_vm0, %v2144_v1  ;;  %v6951_v5 = vld [vmem:[#allocation2 + $0x28] sm:$0xff]  ;;  %v6968_v15 = vld [vmem:[#allocation2 + $0x30] sm:$0xff]  ;;  %v2413_v60 = vrot.slane %v6954_v47, 1 }
 0x34e   : > { %2177 = vst.msk [vmem:[#allocation2 + $0xa0] sm:$0xff] %vm258_vm0, %v2145_v4  ;;  %2178 = vst.msk [vmem:[#allocation2 + $0xa8] sm:$0xff] %vm258_vm0, %v2146_v37  ;;  %v6956_v29 = vld [vmem:[#allocation2 + $0x38] sm:$0xff]  ;;  %v2431_v27 = vrot.slane %v6951_v5, 1  ;;  %v2494_v31 = vrot.slane %v6951_v5, %v5650_v32  ;;  %v6986_v26 = vld [vmem:[#allocation2 + $0x40] sm:$0xff]  ;;  %v2414_v51 = vrot.slane %v6968_v15, 1  ;;  %v2466_v1 = vsel %vm549_vm1, %v2430_v14, %v2412_v3 }
 0x34f   : > { %2179 = vst.msk [vmem:[#allocation2 + $0xb0] sm:$0xff] %vm258_vm0, %v2147_v42  ;;  %2180 = vst.msk [vmem:[#allocation2 + $0xb8] sm:$0xff] %vm258_vm0, %v2148_v22  ;;  %v6979_v61 = vld [vmem:[#allocation2 + $0x48] sm:$0xff]  ;;  %v2432_v23 = vrot.slane %v6956_v29, 1  ;;  %v2498_v50 = vrot.slane %v6956_v29, %v5650_v32  ;;  %v2415_v59 = vrot.slane %v6986_v26, 1  ;;  %v7177_v42 = vsel %vm549_vm1, %v2412_v3, %v2430_v14 }
 0x350   : > { %2181 = vst.msk [vmem:[#allocation2 + $0xc0] sm:$0xff] %vm258_vm0, %v2149_v63  ;;  %2182 = vst.msk [vmem:[#allocation2 + $0xc8] sm:$0xff] %vm258_vm0, %v2150_v44  ;;  %2633 = vrot.lane.b32.xlu1 %v6951_v5, %s5361_s18  ;;  %2631 = vrot.lane.b32.xlu0 %v6954_v47, %s5361_s18  ;;  %v6988_v8 = vld [vmem:[#allocation2 + $0x58] sm:$0xff]  ;;  %v6996_v13 = vld [vmem:[#allocation2 + $0x50] sm:$0xff]  ;;  %v2433_v6 = vrot.slane %v6979_v61, 1  ;;  %v2502_v62 = vrot.slane %v6979_v61, %v5650_v32  ;;  %v2467_v18 = vsel %vm549_vm1, %v2431_v27, %v2413_v60 }
 0x351   : > { %2183 = vst.msk [vmem:[#allocation2 + $0xd0] sm:$0xff] %vm258_vm0, %v2151_v58  ;;  %2184 = vst.msk [vmem:[#allocation2 + $0xd8] sm:$0xff] %vm258_vm0, %v2152_v25  ;;  %v7003_v43 = vld [vmem:[#allocation2 + $0x68] sm:$0xff]  ;;  %v7014_v53 = vld [vmem:[#allocation2 + $0x60] sm:$0xff]  ;;  %v2434_v41 = vrot.slane %v6988_v8, 1  ;;  %v2506_v28 = vrot.slane %v6988_v8, %v5650_v32  ;;  %v2416_v37 = vrot.slane %v6996_v13, 1  ;;  %v7198_v14 = vsel %vm224_vm2, %v2494_v31, %v2467_v18 }
 0x352   : > { %2185 = vst.msk [vmem:[#allocation2 + $0xe0] sm:$0xff] %vm258_vm0, %v2153_v24  ;;  %2186 = vst.msk [vmem:[#allocation2 + $0xe8] sm:$0xff] %vm258_vm0, %v2154_v30  ;;  %v7016_v40 = vld [vmem:[#allocation2 + $0x78] sm:$0xff]  ;;  %v7024_v4 = vld [vmem:[#allocation2 + $0x70] sm:$0xff]  ;;  %v2435_v22 = vrot.slane %v7003_v43, 1  ;;  %v2510_v63 = vrot.slane %v7003_v43, %v5650_v32  ;;  %v2417_v24 = vrot.slane %v7014_v53, 1  ;;  %v2468_v3 = vsel %vm549_vm1, %v2432_v23, %v2414_v51 }
 0x353   : > { %2187 = vst.msk [vmem:[#allocation2 + $0xf0] sm:$0xff] %vm258_vm0, %v2155_v48  ;;  %2188 = vst.msk [vmem:[#allocation2 + $0xf8] sm:$0xff] %vm258_vm0, %v2156_v55  ;;  %v7031_v44 = vld [vmem:[#allocation2 + $0x88] sm:$0xff]  ;;  %v2469_v18 = vsel %vm549_vm1, %v2433_v6, %v2415_v59  ;;  %v7225_v31 = vsel %vm224_vm2, %v2498_v50, %v2468_v3  ;;  %v2470_v50 = vsel %vm549_vm1, %v2434_v41, %v2416_v37  ;;  %v9089_v33 = vrot.slane %v7016_v40, 7 }
 0x354   : > { %2190 = vst.msk [vmem:[#allocation2 + $0x108] sm:$0xff] %vm258_vm0, %v2158_v54  ;;  %2193 = vst.msk [vmem:[#allocation2 + $0x110] sm:$0xff] %vm258_vm0, %v2155_v48  ;;  %2637 = vrot.lane.b32.xlu1 %v6956_v29, %s5361_s18  ;;  %2635 = vrot.lane.b32.xlu0 %v6968_v15, %s5361_s18  ;;  %v7038_v48 = vld [vmem:[#allocation2 + $0x80] sm:$0xff]  ;;  %v7052_v25 = vld [vmem:[#allocation2 + $0x90] sm:$0xff]  ;;  %v7169_v54 = vsel %vm224_vm2, %v2490_v17, %v2466_v1  ;;  %v7191_v17 = vsel %vm549_vm1, %v2413_v60, %v2431_v27  ;;  %v8990_v1 = vrot.slane %v7024_v4, 1 }
 0x355   : > { %2194 = vst.msk [vmem:[#allocation2 + $0x118] sm:$0xff] %vm258_vm0, %v2156_v55  ;;  %v7040_v55 = vld [vmem:[#allocation2 + $0x98] sm:$0xff]  ;;  %v7059_v2 = vld [vmem:[#allocation2 + $0xa8] sm:$0xff]  ;;  %v7066_v35 = vld [vmem:[#allocation2 + $0xa0] sm:$0xff]  ;;  %v7212_v27 = vsel %vm549_vm1, %v2414_v51, %v2432_v23  ;;  %v7232_v60 = vsel %vm224_vm2, %v2502_v62, %v2469_v18  ;;  %v7240_v23 = vsel %vm549_vm1, %v2415_v59, %v2433_v6  ;;  %v7258_v6 = vsel %vm224_vm2, %v2506_v28, %v2470_v50 }
 0x356   : > { %v7068_v52 = vld [vmem:[#allocation2 + $0xb8] sm:$0xff]  ;;  %v7076_v38 = vld [vmem:[#allocation2 + $0xb0] sm:$0xff]  ;;  %v7136_v46 = vld [vmem:[#allocation2 + $0x8] sm:$0xff]  ;;  %v7266_v62 = vsel %vm549_vm1, %v2416_v37, %v2434_v41  ;;  %v2471_v59 = vsel %vm549_vm1, %v2435_v22, %v2417_v24  ;;  %v7287_v41 = vsel %vm549_vm1, %v2417_v24, %v2435_v22  ;;  %v8991_v37 = vrot.slane %v7016_v40, 1 }
 0x357   : > { %v7087_v56 = vld [vmem:[#allocation2 + $0xc8] sm:$0xff]  ;;  %v7094_v21 = vld [vmem:[#allocation2 + $0xc0] sm:$0xff]  ;;  %v7279_v28 = vsel %vm224_vm2, %v2510_v63, %v2471_v59  ;;  %v8993_v63 = vmov %v8990_v1  ;;  %v8995_v59 = vrot.slane %v7016_v40, %v5650_v32  ;;  %v8997_v24 = vrot.slane %v7038_v48, 1 }
 0x358   : > { %2641 = vrot.lane.b32.xlu1 %v6979_v61, %s5361_s18  ;;  %2639 = vrot.lane.b32.xlu0 %v6986_v26, %s5361_s18  ;;  %v7096_v45 = vld [vmem:[#allocation2 + $0xd8] sm:$0xff]  ;;  %v7104_v20 = vld [vmem:[#allocation2 + $0xd0] sm:$0xff]  ;;  %v2472_v3 = vsel %vm549_vm1, %v8991_v37, %v8990_v1  ;;  %v8992_v18 = vmov %v8991_v37  ;;  %v8998_v34 = vrot.slane %v7031_v44, 1  ;;  %v9004_v57 = vrot.slane %v7031_v44, %v5650_v32 }
 0x359   : > { %v7111_v49 = vld [vmem:[#allocation2 + $0xe8] sm:$0xff]  ;;  %v7122_v16 = vld [vmem:[#allocation2 + $0xe0] sm:$0xff]  ;;  %v2424_v10 = vrot.slane %v7104_v20, 1  ;;  %v7301_v50 = vsel %vm549_vm1, %v8993_v63, %v8992_v18  ;;  %v7308_v22 = vsel %vm224_vm2, %v8995_v59, %v2472_v3  ;;  %v9000_v39 = vmov %v8997_v24 }
 0x35a   : > { %v7124_v58 = vld [vmem:[#allocation2 + $0xf8] sm:$0xff]  ;;  %v7132_v30 = vld [vmem:[#allocation2 + $0xf0] sm:$0xff]  ;;  %8994 = vst [vmem:[#allocation15_spill] sm:$0xff] %v7301_v50  ;;  %8996 = vst [vmem:[#allocation16_spill] sm:$0xff] %v7308_v22  ;;  %v2473_v1 = vsel %vm549_vm1, %v8998_v34, %v8997_v24  ;;  %v8999_v37 = vmov %v8998_v34  ;;  %v9002_v63 = vrot.slane %v7052_v25, 1  ;;  %v9003_v3 = vrot.slane %v7040_v55, 1 }
 0x35b   : > { %v7134_v36 = vld [vmem:[#allocation2 + $0x108] sm:$0xff]  ;;  %v7322_v18 = vsel %vm549_vm1, %v9000_v39, %v8999_v37  ;;  %v7335_v34 = vsel %vm224_vm2, %v9004_v57, %v2473_v1  ;;  %v9006_v24 = vrot.slane %v7040_v55, %v5650_v32  ;;  %v9012_v57 = vrot.slane %v7059_v2, 1  ;;  %v7384_v50 = vld [vmem:[#allocation2] sm:$0xff] }
 0x35c   : > { %2645 = vrot.lane.b32.xlu1 %v6988_v8, %s5361_s18  ;;  %2643 = vrot.lane.b32.xlu0 %v6996_v13, %s5361_s18  ;;  %v2445_v51 = vrot.slane %v7134_v36, 1  ;;  %9001 = vst [vmem:[#allocation17_spill] sm:$0xff] %v7322_v18  ;;  %v2474_v59 = vsel %vm549_vm1, %v9003_v3, %v9002_v63  ;;  %9005 = vst [vmem:[#allocation18_spill] sm:$0xff] %v7335_v34  ;;  %v9008_v37 = vmov %v9003_v3  ;;  %v9009_v18 = vmov %v9002_v63 }
 0x35d   : > { %v7342_v39 = vsel %vm224_vm2, %v9006_v24, %v2474_v59  ;;  %v7350_v63 = vsel %vm549_vm1, %v9009_v18, %v9008_v37  ;;  %v9011_v3 = vrot.slane %v7066_v35, 1  ;;  %v2429_v59 = vrot.slane %v7136_v46, 1 }
 0x35e   : > { %9007 = vst [vmem:[#allocation19_spill] sm:$0xff] %v7342_v39  ;;  %9010 = vst [vmem:[#allocation20_spill] sm:$0xff] %v7350_v63  ;;  %v9013_v24 = vrot.slane %v7059_v2, %v5650_v32  ;;  %v9015_v37 = vmov %v9012_v57  ;;  %v9019_v39 = vrot.slane %v7068_v52, 1 }
 0x35f   : > { %v2475_v1 = vsel %vm549_vm1, %v9012_v57, %v9011_v3  ;;  %v9016_v63 = vmov %v9011_v3  ;;  %v9018_v57 = vrot.slane %v7076_v38, 1 }
 0x360   : > { %2649 = vrot.lane.b32.xlu1 %v7003_v43, %s5361_s18  ;;  %2647 = vrot.lane.b32.xlu0 %v7014_v53, %s5361_s18  ;;  %v7368_v18 = vsel %vm224_vm2, %v9013_v24, %v2475_v1  ;;  %v7376_v3 = vsel %vm549_vm1, %v9016_v63, %v9015_v37  ;;  %v9020_v1 = vrot.slane %v7068_v52, %v5650_v32 }
 0x361   : > { %9014 = vst [vmem:[#allocation21_spill] sm:$0xff] %v7368_v18  ;;  %9017 = vst [vmem:[#allocation22_spill] sm:$0xff] %v7376_v3  ;;  %v2476_v34 = vsel %vm549_vm1, %v9019_v39, %v9018_v57  ;;  %v9022_v18 = vmov %v9019_v39  ;;  %v9023_v63 = vmov %v9018_v57  ;;  %v9025_v3 = vrot.slane %v7094_v21, 1 }
 0x362   : > { %v7391_v24 = vsel %vm224_vm2, %v9020_v1, %v2476_v34  ;;  %v7399_v37 = vsel %vm549_vm1, %v9023_v63, %v9022_v18  ;;  %v9026_v39 = vrot.slane %v7087_v56, 1  ;;  %v9032_v63 = vrot.slane %v6935_v7, 7 }
 0x363   : > { %9021 = vst [vmem:[#allocation23_spill] sm:$0xff] %v7391_v24  ;;  %9024 = vst [vmem:[#allocation24_spill] sm:$0xff] %v7399_v37  ;;  %v9028_v34 = vmov %v9025_v3  ;;  %v9030_v24 = vrot.slane %v7087_v56, %v5650_v32  ;;  %v9033_v37 = vrot.slane %v6937_v0, 7 }
 0x364   : > { %2653 = vrot.lane.b32.xlu1 %v7016_v40, %s5361_s18  ;;  %2651 = vrot.lane.b32.xlu0 %v7024_v4, %s5361_s18  ;;  %v2477_v57 = vsel %vm549_vm1, %v9026_v39, %v9025_v3  ;;  %v9027_v22 = vmov %v9026_v39 }
 0x365   : > { %v7413_v1 = vsel %vm549_vm1, %v9028_v34, %v9027_v22  ;;  %v7420_v18 = vsel %vm224_vm2, %v9030_v24, %v2477_v57  ;;  %v7428_v3 = vsel %vm368_vm6, %v9033_v37, %v9032_v63  ;;  %v9034_v39 = vmov %v9033_v37 }
 0x366   : > { %9029 = vst [vmem:[#allocation25_spill] sm:$0xff] %v7413_v1  ;;  %9031 = vst [vmem:[#allocation26_spill] sm:$0xff] %v7420_v18  ;;  %v9035_v22 = vmov %v9032_v63  ;;  %v9036_v1 = vrot.slane %v7096_v45, 1  ;;  %v9037_v57 = vrot.slane %v6937_v0, %v5965_v9  ;;  %v9038_v37 = vrot.slane %v7096_v45, %v5650_v32 }
 0x367   : > { %v2286_v34 = vsel %vm368_vm6, %v9035_v22, %v9034_v39  ;;  %v9043_v0 = vrot.slane %v6954_v47, 7 }
 0x368   : > { %2657 = vrot.lane.b32.xlu1 %v7031_v44, %s5361_s18  ;;  %2655 = vrot.lane.b32.xlu0 %v7038_v48, %s5361_s18  ;;  %v2478_v24 = vsel %vm549_vm1, %v9036_v1, %v2424_v10  ;;  %v7445_v18 = vsel %vm221_vm7, %v9037_v57, %v2286_v34  ;;  %v9040_v63 = vmov %v9036_v1  ;;  %v9042_v1 = vrot.slane %v6951_v5, 7 }
 0x369   : > { %v7452_v7 = vsel %vm224_vm2, %v9038_v37, %v2478_v24  ;;  %v7458_v39 = vsel %vm549_vm1, %v2424_v10, %v9040_v63  ;;  %v2411_v34 = vrot.slane %v7384_v50, 1  ;;  %v9045_v24 = vmov %v9043_v0 }
 0x36a   : > { %9039 = vst [vmem:[#allocation27_spill] sm:$0xff] %v7452_v7  ;;  %9041 = vst [vmem:[#allocation28_spill] sm:$0xff] %v7458_v39  ;;  %v7466_v22 = vsel %vm368_vm6, %v9043_v0, %v9042_v1  ;;  %v9046_v10 = vmov %v9042_v1  ;;  %v9047_v37 = vrot.slane %v7122_v16, 1  ;;  %v9048_v63 = vrot.slane %v7111_v49, 1 }
 0x36b   : > { %9044 = vst [vmem:[#allocation29_spill] sm:$0xff] %v7466_v22  ;;  %v2287_v57 = vsel %vm368_vm6, %v9046_v10, %v9045_v24  ;;  %v9052_v5 = vrot.slane %v6954_v47, %v5965_v9  ;;  %v9053_v10 = vrot.slane %v7111_v49, %v5650_v32  ;;  %v9055_v7 = vrot.slane %v6968_v15, 7 }
 0x36c   : > { %2661 = vrot.lane.b32.xlu1 %v7040_v55, %s5361_s18  ;;  %2659 = vrot.lane.b32.xlu0 %v7052_v25, %s5361_s18  ;;  %v2479_v1 = vsel %vm549_vm1, %v9048_v63, %v9047_v37  ;;  %v9049_v0 = vmov %v9048_v63  ;;  %v9050_v22 = vmov %v9047_v37  ;;  %v9054_v63 = vrot.slane %v6956_v29, 7 }
 0x36d   : > { %v7491_v39 = vsel %vm549_vm1, %v9050_v22, %v9049_v0  ;;  %v7498_v24 = vsel %vm221_vm7, %v9052_v5, %v2287_v57  ;;  %v7505_v37 = vsel %vm224_vm2, %v9053_v10, %v2479_v1  ;;  %v9056_v47 = vmov %v9055_v7 }
 0x36e   : > { %9051 = vst [vmem:[#allocation30_spill] sm:$0xff] %v7491_v39  ;;  %v7513_v22 = vsel %vm368_vm6, %v9055_v7, %v9054_v63  ;;  %v9057_v57 = vmov %v9054_v63  ;;  %v9058_v5 = vrot.slane %v6968_v15, %v5965_v9  ;;  %v9059_v10 = vrot.slane %v7132_v30, 1 }
 0x36f   : > { %v2288_v0 = vsel %vm368_vm6, %v9057_v57, %v9056_v47  ;;  %v9060_v39 = vrot.slane %v7124_v58, 1  ;;  %v9064_v15 = vrot.slane %v6979_v61, 7  ;;  %v9065_v57 = vrot.slane %v6986_v26, 7 }
 0x370   : > { %2665 = vrot.lane.b32.xlu1 %v7059_v2, %s5361_s18  ;;  %2663 = vrot.lane.b32.xlu0 %v7066_v35, %s5361_s18  ;;  %v7526_v1 = vsel %vm221_vm7, %v9058_v5, %v2288_v0  ;;  %v9062_v29 = vmov %v9059_v10  ;;  %v9067_v5 = vrot.slane %v7124_v58, %v5650_v32  ;;  %v2245_v61 = vrot.slane %v7122_v16, 7 }
 0x371   : > { %v2480_v7 = vsel %vm549_vm1, %v9060_v39, %v9059_v10  ;;  %v9061_v63 = vmov %v9060_v39  ;;  %v7548_v0 = vsel %vm368_vm6, %v9065_v57, %v9064_v15  ;;  %v9068_v10 = vmov %v9065_v57 }
 0x372   : > { %v7540_v47 = vsel %vm549_vm1, %v9062_v29, %v9061_v63  ;;  %9066 = vst [vmem:[#allocation32_spill] sm:$0xff] %v7548_v0  ;;  %v7555_v39 = vsel %vm224_vm2, %v9067_v5, %v2480_v7  ;;  %v9069_v63 = vmov %v9064_v15  ;;  %v9073_v7 = vrot.slane %v6986_v26, %v5965_v9 }
 0x373   : > { %9063 = vst [vmem:[#allocation31_spill] sm:$0xff] %v7540_v47  ;;  %v2289_v29 = vsel %vm368_vm6, %v9069_v63, %v9068_v10  ;;  %v9070_v47 = vrot.slane %v6945_v12, 1  ;;  %v9074_v5 = vrot.slane %v7134_v36, %v5650_v32  ;;  %v9076_v10 = vrot.slane %v6988_v8, 7 }
 0x374   : > { %2669 = vrot.lane.b32.xlu1 %v7068_v52, %s5361_s18  ;;  %2667 = vrot.lane.b32.xlu0 %v7076_v38, %s5361_s18  ;;  %v9077_v63 = vrot.slane %v6996_v13, 7  ;;  %v2264_v8 = vrot.slane %v7124_v58, 7 }
 0x375   : > { %v2481_v15 = vsel %vm549_vm1, %v2445_v51, %v9070_v47  ;;  %v9071_v57 = vmov %v9070_v47  ;;  %v7583_v47 = vsel %vm221_vm7, %v9073_v7, %v2289_v29  ;;  %v9079_v29 = vmov %v9076_v10 }
 0x376   : > { %v7571_v0 = vsel %vm549_vm1, %v9071_v57, %v2445_v51  ;;  %v7590_v51 = vsel %vm224_vm2, %v9074_v5, %v2481_v15  ;;  %v7598_v57 = vsel %vm368_vm6, %v9077_v63, %v9076_v10  ;;  %v9078_v26 = vmov %v9077_v63 }
 0x377   : > { %9072 = vst [vmem:[#allocation33_spill] sm:$0xff] %v7571_v0  ;;  %9075 = vst [vmem:[#allocation34_spill] sm:$0xff] %v7590_v51  ;;  %v2290_v7 = vsel %vm368_vm6, %v9079_v29, %v9078_v26  ;;  %v2465_v0 = vsel %vm549_vm1, %v2429_v59, %v2411_v34  ;;  %v7610_v15 = vsel %vm549_vm1, %v2411_v34, %v2429_v59  ;;  %v9080_v5 = vrot.slane %v7003_v43, 7 }
 0x378   : > { %v9081_v51 = vrot.slane %v7014_v53, 7  ;;  %v9083_v63 = vrot.slane %v6996_v13, %v5965_v9  ;;  %v9084_v59 = vrot.slane %v7136_v46, %v5650_v32  ;;  %v2246_v13 = vrot.slane %v7132_v30, 7  ;;  %2673 = vrot.lane.b32.xlu1 %v7087_v56, %s5361_s18  ;;  %2671 = vrot.lane.b32.xlu0 %v7094_v21, %s5361_s18 }
 0x37a   : > { %v7618_v10 = vsel %vm368_vm6, %v9081_v51, %v9080_v5  ;;  %v7626_v26 = vsel %vm221_vm7, %v9083_v63, %v2290_v7  ;;  %v7633_v34 = vsel %vm224_vm2, %v9084_v59, %v2465_v0  ;;  %v9085_v29 = vmov %v9081_v51 }
 0x37b   : > { %9082 = vst [vmem:[#allocation35_spill] sm:$0xff] %v7618_v10  ;;  %v9086_v51 = vmov %v9080_v5  ;;  %v9087_v7 = vrot.slane %v7014_v53, %v5965_v9  ;;  %v9090_v0 = vrot.slane %v7024_v4, 7  ;;  %v2366_v53 = vrot.slane %v7132_v30, %v5965_v9 }
 0x37c   : > { %v2291_v5 = vsel %vm368_vm6, %v9086_v51, %v9085_v29  ;;  %v9093_v29 = vmov %v9089_v33  ;;  %v9103_v10 = vrot.slane %v7038_v48, %v5965_v9  ;;  %2677 = vrot.lane.b32.xlu1 %v7096_v45, %s5361_s18  ;;  %2675 = vrot.lane.b32.xlu0 %v7104_v20, %s5361_s18 }
 0x37d   : > { %v7647_v63 = vsel %vm221_vm7, %v9087_v7, %v2291_v5  ;;  %v7655_v59 = vsel %vm368_vm6, %v9090_v0, %v9089_v33  ;;  %v9092_v43 = vmov %v9090_v0  ;;  %v2265_v5 = vrot.slane %v7134_v36, 7 }
 0x37e   : > { %9088 = vst [vmem:[#allocation36_spill] sm:$0xff] %v7647_v63  ;;  %9091 = vst [vmem:[#allocation37_spill] sm:$0xff] %v7655_v59  ;;  %v2292_v51 = vsel %vm368_vm6, %v9093_v29, %v9092_v43  ;;  %v2249_v33 = vrot.slane %v7136_v46, 7  ;;  %v9094_v7 = vrot.slane %v7024_v4, %v5965_v9  ;;  %v2306_v0 = vrot.slane %v7384_v50, %v5965_v9 }
 0x37f   : > { %v9096_v43 = vrot.slane %v7031_v44, 7  ;;  %v9097_v29 = vrot.slane %v7038_v48, 7 }
 0x380   : > { %v7676_v40 = vsel %vm221_vm7, %v9094_v7, %v2292_v51  ;;  %v9101_v51 = vrot.slane %v7040_v55, 7  ;;  %v9102_v7 = vrot.slane %v7052_v25, 7  ;;  %v9110_v55 = vrot.slane %v7052_v25, %v5965_v9  ;;  %2681 = vrot.lane.b32.xlu1 %v7111_v49, %s5361_s18  ;;  %2679 = vrot.lane.b32.xlu0 %v7122_v16, %s5361_s18 }
 0x381   : > { %9095 = vst [vmem:[#allocation38_spill] sm:$0xff] %v7676_v40  ;;  %v7686_v59 = vsel %vm368_vm6, %v9097_v29, %v9096_v43  ;;  %v9099_v32 = vmov %v9097_v29  ;;  %v9100_v63 = vmov %v9096_v43 }
 0x382   : > { %9098 = vst [vmem:[#allocation39_spill] sm:$0xff] %v7686_v59  ;;  %v2293_v4 = vsel %vm368_vm6, %v9100_v63, %v9099_v32  ;;  %v7700_v40 = vsel %vm368_vm6, %v9102_v7, %v9101_v51  ;;  %v9104_v44 = vmov %v9102_v7  ;;  %v9105_v29 = vmov %v9101_v51 }
 0x383   : > { %v7707_v43 = vsel %vm221_vm7, %v9103_v10, %v2293_v4  ;;  %v2294_v32 = vsel %vm368_vm6, %v9105_v29, %v9104_v44  ;;  %v9106_v63 = vrot.slane %v7059_v2, 7  ;;  %v9107_v59 = vrot.slane %v7066_v35, 7 }
 0x384   : > { %v7734_v7 = vsel %vm221_vm7, %v9110_v55, %v2294_v32  ;;  %v9111_v44 = vrot.slane %v7066_v35, %v5965_v9  ;;  %v9112_v29 = vrot.slane %v7068_v52, 7  ;;  %v9113_v2 = vrot.slane %v7076_v38, 7  ;;  %2685 = vrot.lane.b32.xlu1 %v7124_v58, %s5361_s18  ;;  %2683 = vrot.lane.b32.xlu0 %v7132_v30, %s5361_s18  ;;  %v9137_v58 = vld [vmem:[#allocation19_spill] sm:$0xff]  ;;  %v9138_v30 = vld [vmem:[#allocation20_spill] sm:$0xff] }
 0x385   : > { %v7721_v51 = vsel %vm368_vm6, %v9107_v59, %v9106_v63  ;;  %v9108_v48 = vmov %v9107_v59  ;;  %v9109_v10 = vmov %v9106_v63  ;;  %v2231_v35 = vrot.slane %v7384_v50, 7 }
 0x386   : > { %v2295_v4 = vsel %vm368_vm6, %v9109_v10, %v9108_v48  ;;  %v7749_v63 = vsel %vm368_vm6, %v9113_v2, %v9112_v29  ;;  %v9114_v25 = vmov %v9113_v2  ;;  %v9115_v32 = vmov %v9112_v29 }
 0x387   : > { %v7741_v59 = vsel %vm221_vm7, %v9111_v44, %v2295_v4  ;;  %v2296_v48 = vsel %vm368_vm6, %v9115_v32, %v9114_v25  ;;  %v9116_v10 = vrot.slane %v7076_v38, %v5965_v9  ;;  %v9117_v52 = vrot.slane %v7087_v56, 7 }
 0x388   : > { %v9118_v55 = vrot.slane %v7094_v21, 7  ;;  %v9121_v38 = vrot.slane %v7094_v21, %v5965_v9  ;;  %v9126_v21 = vrot.slane %v7111_v49, 7  ;;  %2917 = vrot.lane.b32.xlu1 %v7134_v36, %s5361_s18  ;;  %2915 = vrot.lane.b32.xlu0 %v6945_v12, %s5361_s18  ;;  %v9135_v36 = vld [vmem:[#allocation18_spill] sm:$0xff] }
 0x389   : > { %v7767_v4 = vsel %vm221_vm7, %v9116_v10, %v2296_v48  ;;  %v9120_v2 = vmov %v9117_v52  ;;  %v9122_v48 = vrot.slane %v7096_v45, 7  ;;  %v9123_v10 = vrot.slane %v7104_v20, 7 }
 0x38a   : > { %v7775_v44 = vsel %vm368_vm6, %v9118_v55, %v9117_v52  ;;  %v9119_v29 = vmov %v9118_v55 }
 0x38b   : > { %v2297_v25 = vsel %vm368_vm6, %v9120_v2, %v9119_v29  ;;  %v7796_v52 = vsel %vm368_vm6, %v9123_v10, %v9122_v48  ;;  %v9124_v56 = vmov %v9123_v10  ;;  %v9125_v55 = vmov %v9122_v48 }
 0x38c   : > { %v7788_v32 = vsel %vm221_vm7, %v9121_v38, %v2297_v25  ;;  %v2298_v29 = vsel %vm368_vm6, %v9125_v55, %v9124_v56  ;;  %v7808_v2 = vsel %vm368_vm6, %v2245_v61, %v9126_v21  ;;  %v9127_v25 = vrot.slane %v7104_v20, %v5965_v9  ;;  %2625 = vrot.lane.b32.xlu1 %v7136_v46, %s5361_s18  ;;  %v9134_v46 = vld [vmem:[#allocation15_spill] sm:$0xff] }
 0x38d   : > { %v9128_v48 = vmov %v9126_v21  ;;  %v7823_v10 = vsel %vm368_vm6, %v2246_v13, %v2264_v8  ;;  %v2300_v56 = vsel %vm368_vm6, %v2264_v8, %v2246_v13  ;;  %v9129_v55 = vrot.slane %v7122_v16, %v5965_v9  ;;  %v2934_v13 = vld [vmem:[#allocation8 + $0x10] sm:$0xff]  ;;  %v2911_v16 = vld [vmem:[#allocation8] sm:$0xff]  ;;  %2623 = vrot.lane.b32.xlu0 %v7384_v50, %s5361_s18  ;;  %v9146_v50 = vld [vmem:[#allocation28_spill] sm:$0xff] }
 0x38e   : > { %v7815_v38 = vsel %vm221_vm7, %v9127_v25, %v2298_v29  ;;  %v2299_v45 = vsel %vm368_vm6, %v9128_v48, %v2245_v61  ;;  %v7836_v29 = vsel %vm221_vm7, %v2366_v53, %v2300_v56  ;;  %v9130_v61 = vrot.slane %v6945_v12, 7  ;;  %v2935_v48 = vld [vmem:[#allocation8 + $0x18] sm:$0xf] }
 0x38f   : > { %v7832_v20 = vsel %vm221_vm7, %v9129_v55, %v2299_v45  ;;  %v9132_v53 = vrot.slane %v6945_v12, %v5965_v9  ;;  %v7861_v56 = vsel %vm368_vm6, %v2231_v35, %v2249_v33  ;;  %v4975_v55 = vpack.c.bf16 %v2935_v48, %v2934_v13  ;;  %v9133_v12 = vld [vmem:[#allocation16_spill] sm:$0xff] }
 0x390   : > { %v7842_v21 = vsel %vm368_vm6, %v9130_v61, %v2265_v5  ;;  %v9131_v25 = vmov %v9130_v61  ;;  %v2912_v61 = vld [vmem:[#allocation8 + $0x8] sm:$0xf]  ;;  %2757 = vrot.lane.b32.xlu1 %v7169_v54, %s5362_s20  ;;  %v9139_v54 = vld [vmem:[#allocation21_spill] sm:$0xff] }
 0x391   : > { %v2301_v8 = vsel %vm368_vm6, %v2265_v5, %v9131_v25  ;;  %v2285_v5 = vsel %vm368_vm6, %v2249_v33, %v2231_v35  ;;  %4977 = vmatprep.subr.msk.bf16.mxu1 %vm5745_vm5, %v4975_v55  ;;  %v7877_v33 = vpack.c.bf16 %v2912_v61, %v2911_v16  ;;  %2755 = vrot.lane.b32.xlu0 %v7177_v42, %s5362_s20  ;;  %v9136_v42 = vld [vmem:[#allocation17_spill] sm:$0xff]  ;;  %v9150_v16 = vld [vmem:[#allocation32_spill] sm:$0xff] }
 0x392   : > { %v7857_v45 = vsel %vm221_vm7, %v9132_v53, %v2301_v8  ;;  %v7867_v49 = vsel %vm221_vm7, %v2306_v0, %v2285_v5  ;;  %4980 = vmatpush3.bf16.msk.msra.mxu1 %vm5745_vm5, %v4975_v55  ;;  %v9147_v25 = vld [vmem:[#allocation29_spill] sm:$0xff] }
 0x393   : > { %4983 = vmatprep.subr.msk.bf16.mxu1 %vm5745_vm5, %v7877_v33 }
 0x394   : > { %2761 = vrot.lane.b32.xlu1 %v7198_v14, %s5362_s20  ;;  %v9141_v14 = vld [vmem:[#allocation23_spill] sm:$0xff] }
 0x395   : > { %2759 = vrot.lane.b32.xlu0 %v7191_v17, %s5362_s20  ;;  %v9140_v17 = vld [vmem:[#allocation22_spill] sm:$0xff] }
 0x398   : > { %2765 = vrot.lane.b32.xlu1 %v7225_v31, %s5362_s20  ;;  %v9143_v31 = vld [vmem:[#allocation26_spill] sm:$0xff] }
 0x399   : > { %2763 = vrot.lane.b32.xlu0 %v7212_v27, %s5362_s20  ;;  %v9142_v27 = vld [vmem:[#allocation24_spill] sm:$0xff] }
 0x39c   : > { %2769 = vrot.lane.b32.xlu1 %v7232_v60, %s5362_s20  ;;  %v9144_v60 = vld [vmem:[#allocation25_spill] sm:$0xff] }
 0x39d   : > { %2767 = vrot.lane.b32.xlu0 %v7240_v23, %s5362_s20 }
 0x3a0   : > { %2773 = vrot.lane.b32.xlu1 %v7258_v6, %s5362_s20 }
 0x3a1   : > { %2771 = vrot.lane.b32.xlu0 %v7266_v62, %s5362_s20 }
 0x3a4   : > { %2777 = vrot.lane.b32.xlu1 %v7279_v28, %s5362_s20 }
 0x3a5   : > { %2775 = vrot.lane.b32.xlu0 %v7287_v41, %s5362_s20  ;;  %v9145_v41 = vld [vmem:[#allocation27_spill] sm:$0xff] }
 0x3a8   : > { %2781 = vrot.lane.b32.xlu1 %v9133_v12, %s5362_s20  ;;  %v9151_v12 = vld [vmem:[#allocation34_spill] sm:$0xff] }
 0x3a9   : > { %2779 = vrot.lane.b32.xlu0 %v9134_v46, %s5362_s20  ;;  %v7988_v46 = vld [vmem:[#allocation2 + $0x110] sm:$0xff] }
 0x3ac   : > { %2785 = vrot.lane.b32.xlu1 %v9135_v36, %s5362_s20 }
 0x3ad   : > { %2783 = vrot.lane.b32.xlu0 %v9136_v42, %s5362_s20 }
 0x3b0   : > { %2789 = vrot.lane.b32.xlu1 %v9137_v58, %s5362_s20 }
 0x3b1   : > { %2787 = vrot.lane.b32.xlu0 %v9138_v30, %s5362_s20 }
 0x3b4   : > { %2793 = vrot.lane.b32.xlu1 %v9139_v54, %s5362_s20  ;;  %v2428_v54 = vrot.slane %v7988_v46, 1 }
 0x3b5   : > { %2791 = vrot.lane.b32.xlu0 %v9140_v17, %s5362_s20 }
 0x3b8   : > { %2797 = vrot.lane.b32.xlu1 %v9141_v14, %s5362_s20 }
 0x3b9   : > { %2795 = vrot.lane.b32.xlu0 %v9142_v27, %s5362_s20  ;;  %v9153_v27 = vld [vmem:[#allocation35_spill] sm:$0xff] }
 0x3bc   : > { %2801 = vrot.lane.b32.xlu1 %v9143_v31, %s5362_s20  ;;  %v9154_v31 = vld [vmem:[#allocation36_spill] sm:$0xff] }
 0x3bd   : > { %2799 = vrot.lane.b32.xlu0 %v9144_v60, %s5362_s20  ;;  %v9155_v60 = vld [vmem:[#allocation13_spill] sm:$0xff] }
 0x3be   : > { %v2630_v23 = vpop.permute.xlu1 %2629  ;;  %v2628_v6 = vpop.permute.xlu0 %2627 }
 0x3bf   : > { %v7940_v62 = vsel %vm258_vm0, %v7428_v3, %v2630_v23  ;;  %v7944_v28 = vsel %vm258_vm0, %v7445_v18, %v2628_v6  ;;  %v9148_v18 = vld [vmem:[#allocation30_spill] sm:$0xff] }
 0x3c0   : > { %2805 = vrot.lane.b32.xlu1 %v9145_v41, %s5362_s20  ;;  %v9156_v41 = vld [vmem:[#allocation37_spill] sm:$0xff] }
 0x3c1   : > { %2803 = vrot.lane.b32.xlu0 %v9146_v50, %s5362_s20 }
 0x3c2   : > { %v2634_v0 = vpop.permute.xlu1 %2633  ;;  %v2632_v35 = vpop.permute.xlu0 %2631 }
 0x3c3   : > { %v7952_v8 = vsel %vm258_vm0, %v9147_v25, %v2634_v0  ;;  %v7956_v3 = vsel %vm258_vm0, %v7498_v24, %v2632_v35  ;;  %v9149_v24 = vld [vmem:[#allocation31_spill] sm:$0xff]  ;;  %v9157_v0 = vld [vmem:[#allocation38_spill] sm:$0xff] }
 0x3c4   : > { %2809 = vrot.lane.b32.xlu1 %v7505_v37, %s5362_s20 }
 0x3c5   : > { %2807 = vrot.lane.b32.xlu0 %v9148_v18, %s5362_s20 }
 0x3c6   : > { %v2638_v13 = vpop.permute.xlu1 %2637  ;;  %v2636_v48 = vpop.permute.xlu0 %2635 }
 0x3c7   : > { %v7964_v53 = vsel %vm258_vm0, %v7513_v22, %v2638_v13  ;;  %v7968_v5 = vsel %vm258_vm0, %v7526_v1, %v2636_v48  ;;  %v9152_v1 = vld [vmem:[#allocation33_spill] sm:$0xff] }
 0x3c8   : > { %2813 = vrot.lane.b32.xlu1 %v7555_v39, %s5362_s20  ;;  %v7986_v39 = vld [vmem:[#allocation2 + $0x118] sm:$0xff] }
 0x3c9   : > { %2811 = vrot.lane.b32.xlu0 %v9149_v24, %s5362_s20  ;;  %v2446_v30 = vrot.slane %v7986_v39, 1  ;;  %v2266_v11 = vrot.slane %v7986_v39, 7 }
 0x3ca   : > { %v2642_v37 = vpop.permute.xlu1 %2641  ;;  %v2640_v55 = vpop.permute.xlu0 %2639 }
 0x3cb   : > { %v7976_v61 = vsel %vm258_vm0, %v9150_v16, %v2642_v37  ;;  %v7980_v22 = vsel %vm258_vm0, %v7583_v47, %v2640_v55  ;;  %v2464_v13 = vsel %vm549_vm1, %v2428_v54, %v2446_v30  ;;  %v9159_v37 = vld [vmem:[#allocation39_spill] sm:$0xff] }
 0x3cc   : > { %2925 = vrot.lane.b32.xlu1 %v9151_v12, %s5362_s20 }
 0x3cd   : > { %2923 = vrot.lane.b32.xlu0 %v9152_v1, %s5362_s20 }
 0x3ce   : > { %v2646_v36 = vpop.permute.xlu1 %2645  ;;  %v2644_v42 = vpop.permute.xlu0 %2643 }
 0x3cf   : > { %v7992_v58 = vsel %vm258_vm0, %v7598_v57, %v2646_v36  ;;  %v7996_v47 = vsel %vm258_vm0, %v7626_v26, %v2644_v42 }
 0x3d0   : > { %2753 = vrot.lane.b32.xlu1 %v7633_v34, %s5362_s20  ;;  %v2554_v34 = vrot.slane %v7986_v39, %v9155_v60 }
 0x3d1   : > { %2751 = vrot.lane.b32.xlu0 %v7610_v15, %s5362_s20  ;;  %v2482_v15 = vsel %vm549_vm1, %v2446_v30, %v2428_v54 }
 0x3d2   : > { %v2650_v17 = vpop.permute.xlu1 %2649  ;;  %v2648_v14 = vpop.permute.xlu0 %2647  ;;  %v2590_v18 = vsel %vm224_vm2, %v2554_v34, %v2482_v15 }
 0x3d3   : > { %v8006_v57 = vsel %vm258_vm0, %v9153_v27, %v2650_v17  ;;  %v8010_v26 = vsel %vm258_vm0, %v9154_v31, %v2648_v14 }
 0x3d4   : > { %3498 = vrot.lane.b32.xlu1 %v7986_v39, %s5361_s18 }
 0x3d5   : > { %3496 = vrot.lane.b32.xlu0 %v7988_v46, %s5361_s18 }
 0x3d6   : > { %v2654_v23 = vpop.permute.xlu1 %2653  ;;  %v2652_v6 = vpop.permute.xlu0 %2651 }
 0x3d7   : > { %v8022_v50 = vsel %vm258_vm0, %v9156_v41, %v2654_v23  ;;  %v8026_v35 = vsel %vm258_vm0, %v9157_v0, %v2652_v6 }
 0x3d8   : > { %3506 = vrot.lane.b32.xlu1 %v2590_v18, %s5362_s20 }
 0x3d9   : > { %3504 = vrot.lane.b32.xlu0 %v2464_v13, %s5362_s20 }
 0x3da   : > { %v2658_v48 = vpop.permute.xlu1 %2657  ;;  %v2656_v24 = vpop.permute.xlu0 %2655 }
 0x3db   : > { %v8036_v55 = vsel %vm258_vm0, %v9159_v37, %v2658_v48  ;;  %v8040_v16 = vsel %vm258_vm0, %v7707_v43, %v2656_v24  ;;  %v3515_v24 = vld [vmem:[#allocation8 + $0x20] sm:$0xff]  ;;  %v3516_v37 = vld [vmem:[#allocation8 + $0x28] sm:$0xf] }
 0x3de   : > { %v2662_v12 = vpop.permute.xlu1 %2661  ;;  %v2660_v1 = vpop.permute.xlu0 %2659 }
 0x3df   : > { %v8044_v36 = vsel %vm258_vm0, %v7700_v40, %v2662_v12  ;;  %v8048_v42 = vsel %vm258_vm0, %v7734_v7, %v2660_v1 }
 0x3e2   : > { %v2666_v30 = vpop.permute.xlu1 %2665  ;;  %v2664_v54 = vpop.permute.xlu0 %2663 }
 0x3e3   : > { %v8052_v17 = vsel %vm258_vm0, %v7721_v51, %v2666_v30  ;;  %v8056_v43 = vsel %vm258_vm0, %v7741_v59, %v2664_v54  ;;  %v8122_v30 = vpack.c.bf16 %v3516_v37, %v3515_v24 }
 0x3e6   : > { %v2670_v14 = vpop.permute.xlu1 %2669  ;;  %v2668_v27 = vpop.permute.xlu0 %2667 }
 0x3e7   : > { %v8060_v40 = vsel %vm258_vm0, %v7749_v63, %v2670_v14  ;;  %v8064_v7 = vsel %vm258_vm0, %v7767_v4, %v2668_v27 }
 0x3ea   : > { %v2674_v31 = vpop.permute.xlu1 %2673  ;;  %v2672_v60 = vpop.permute.xlu0 %2671 }
 0x3eb   : > { %v8068_v51 = vsel %vm258_vm0, %v7775_v44, %v2674_v31  ;;  %v8072_v59 = vsel %vm258_vm0, %v7788_v32, %v2672_v60 }
 0x3ee   : > { %v2678_v34 = vpop.permute.xlu1 %2677  ;;  %v2676_v15 = vpop.permute.xlu0 %2675 }
 0x3ef   : > { %v8076_v63 = vsel %vm258_vm0, %v7796_v52, %v2678_v34  ;;  %v8080_v4 = vsel %vm258_vm0, %v7815_v38, %v2676_v15 }
 0x3f2   : > { %v2682_v23 = vpop.permute.xlu1 %2681  ;;  %v2680_v6 = vpop.permute.xlu0 %2679 }
 0x3f3   : > { %v8084_v44 = vsel %vm258_vm0, %v7808_v2, %v2682_v23  ;;  %v8088_v32 = vsel %vm258_vm0, %v7832_v20, %v2680_v6 }
 0x3f6   : > { %v2686_v41 = vpop.permute.xlu1 %2685  ;;  %v2684_v0 = vpop.permute.xlu0 %2683 }
 0x3f7   : > { %v8092_v52 = vsel %vm258_vm0, %v7823_v10, %v2686_v41  ;;  %v8096_v38 = vsel %vm258_vm0, %v7836_v29, %v2684_v0 }
 0x3fa   : > { %v2918_v25 = vpop.permute.xlu1 %2917  ;;  %v2916_v18 = vpop.permute.xlu0 %2915 }
 0x3fb   : > { %v8100_v2 = vsel %vm258_vm0, %v7842_v21, %v2918_v25  ;;  %v8104_v20 = vsel %vm258_vm0, %v7857_v45, %v2916_v18 }
 0x3fe   : > { %v2626_v13 = vpop.permute.xlu1 %2625 }
 0x3ff   : > { %v2624_v48 = vpop.permute.xlu0 %2623  ;;  %v8108_v10 = vsel %vm258_vm0, %v7861_v56, %v2626_v13 }
 0x400   : > { %v8112_v29 = vsel %vm258_vm0, %v7867_v49, %v2624_v48 }
 0x402   : > { %v2758_v12 = vpop.permute.xlu1 %2757 }
 0x403   : > { %v2756_v1 = vpop.permute.xlu0 %2755  ;;  %v8116_v21 = vsel %vm982_vm8, %v7940_v62, %v2758_v12 }
 0x404   : > { %v8120_v45 = vsel %vm982_vm8, %v7944_v28, %v2756_v1 }
 0x405   : > { %4805 = vmatprep.mubr.msk.f32.mxu1 %vm1040_vm9, %v8120_v45 }
 0x406   : > { %4806 = vmatmul.mubr.msk.f32.vlgmr.msra.gmra.mrb[0].mxu1 %vm1040_vm9, %v8116_v21  ;;  %v2762_v56 = vpop.permute.xlu1 %2761 }
 0x407   : > { %4986 = vmatpush3.bf16.msk.msra.mxu1 %vm5745_vm5, %v7877_v33  ;;  %v2760_v49 = vpop.permute.xlu0 %2759  ;;  %v8133_v62 = vsel %vm982_vm8, %v7952_v8, %v2762_v56 }
 0x408   : > { %v8137_v28 = vsel %vm982_vm8, %v7956_v3, %v2760_v49  ;;  %4989 = vmatprep.subr.msk.bf16.mxu1 %vm5745_vm5, %v8122_v30 }
 0x409   : > { %4808 = vmatprep.mubr.msk.f32.mxu1 %vm1040_vm9, %v8137_v28 }
 0x40a   : > { %4809 = vmatmul.mubr.msk.f32.gmra.mrb[2].mxu1 %vm1040_vm9, %v8133_v62  ;;  %v2766_v33 = vpop.permute.xlu1 %2765 }
 0x40b   : > { %v2764_v54 = vpop.permute.xlu0 %2763  ;;  %v8148_v8 = vsel %vm982_vm8, %v7964_v53, %v2766_v33 }
 0x40c   : > { %v8152_v3 = vsel %vm982_vm8, %v7968_v5, %v2764_v54 }
 0x40d   : > { %4811 = vmatprep.mubr.msk.f32.mxu1 %vm1040_vm9, %v8152_v3 }
 0x40e   : > { %4812 = vmatmul.mubr.msk.f32.gmra.mrb[4].mxu1 %vm1040_vm9, %v8148_v8  ;;  %v2770_v14 = vpop.permute.xlu1 %2769 }
 0x40f   : > { %v2768_v27 = vpop.permute.xlu0 %2767  ;;  %v8160_v31 = vsel %vm982_vm8, %v7976_v61, %v2770_v14 }
 0x410   : > { %v8164_v53 = vsel %vm982_vm8, %v7980_v22, %v2768_v27 }
 0x411   : > { %4814 = vmatprep.mubr.msk.f32.mxu1 %vm1040_vm9, %v8164_v53 }
 0x412   : > { %4815 = vmatmul.mubr.msk.f32.gmra.mrb[6].mxu1 %vm1040_vm9, %v8160_v31  ;;  %v2774_v5 = vpop.permute.xlu1 %2773 }
 0x413   : > { %v2772_v60 = vpop.permute.xlu0 %2771  ;;  %v8172_v34 = vsel %vm982_vm8, %v7992_v58, %v2774_v5 }
 0x414   : > { %v8176_v61 = vsel %vm982_vm8, %v7996_v47, %v2772_v60 }
 0x415   : > { %4817 = vmatprep.mubr.msk.f32.mxu1 %vm1040_vm9, %v8176_v61 }
 0x416   : > { %4818 = vmatmul.mubr.msk.f32.gmra.mrb[8].mxu1 %vm1040_vm9, %v8172_v34  ;;  %v2778_v22 = vpop.permute.xlu1 %2777 }
 0x417   : > { %v2776_v15 = vpop.permute.xlu0 %2775  ;;  %v8184_v23 = vsel %vm982_vm8, %v8006_v57, %v2778_v22 }
 0x418   : > { %v8188_v58 = vsel %vm982_vm8, %v8010_v26, %v2776_v15 }
 0x419   : > { %4820 = vmatprep.mubr.msk.f32.mxu1 %vm1040_vm9, %v8188_v58 }
 0x41a   : > { %4821 = vmatmul.mubr.msk.f32.gmra.mrb[10].mxu1 %vm1040_vm9, %v8184_v23  ;;  %v2782_v47 = vpop.permute.xlu1 %2781 }
 0x41b   : > { %v2780_v6 = vpop.permute.xlu0 %2779  ;;  %v8196_v41 = vsel %vm982_vm8, %v8022_v50, %v2782_v47 }
 0x41c   : > { %v8200_v57 = vsel %vm982_vm8, %v8026_v35, %v2780_v6 }
 0x41d   : > { %4823 = vmatprep.mubr.msk.f32.mxu1 %vm1040_vm9, %v8200_v57 }
 0x41e   : > { %4824 = vmatmul.mubr.msk.f32.gmra.mrb[12].mxu1 %vm1040_vm9, %v8196_v41  ;;  %v2786_v26 = vpop.permute.xlu1 %2785 }
 0x41f   : > { %v2784_v0 = vpop.permute.xlu0 %2783  ;;  %v8208_v25 = vsel %vm982_vm8, %v8036_v55, %v2786_v26 }
 0x420   : > { %v8212_v50 = vsel %vm982_vm8, %v8040_v16, %v2784_v0 }
 0x421   : > { %4826 = vmatprep.mubr.msk.f32.mxu1 %vm1040_vm9, %v8212_v50 }
 0x422   : > { %4827 = vmatmul.mubr.msk.f32.gmra.mrb[14].mxu1 %vm1040_vm9, %v8208_v25  ;;  %v2790_v35 = vpop.permute.xlu1 %2789 }
 0x423   : > { %v2788_v18 = vpop.permute.xlu0 %2787  ;;  %v8220_v13 = vsel %vm982_vm8, %v8044_v36, %v2790_v35 }
 0x424   : > { %v8224_v55 = vsel %vm982_vm8, %v8048_v42, %v2788_v18 }
 0x425   : > { %4829 = vmatprep.mubr.msk.f32.mxu1 %vm1040_vm9, %v8224_v55 }
 0x426   : > { %4830 = vmatmul.mubr.msk.f32.gmra.mrb[16].mxu1 %vm1040_vm9, %v8220_v13  ;;  %v2794_v16 = vpop.permute.xlu1 %2793 }
 0x427   : > { %v2792_v48 = vpop.permute.xlu0 %2791  ;;  %v8232_v24 = vsel %vm982_vm8, %v8052_v17, %v2794_v16 }
 0x428   : > { %v8236_v36 = vsel %vm982_vm8, %v8056_v43, %v2792_v48 }
 0x429   : > { %4832 = vmatprep.mubr.msk.f32.mxu1 %vm1040_vm9, %v8236_v36 }
 0x42a   : > { %4833 = vmatmul.mubr.msk.f32.gmra.mrb[18].mxu1 %vm1040_vm9, %v8232_v24  ;;  %v2798_v42 = vpop.permute.xlu1 %2797 }
 0x42b   : > { %v2796_v37 = vpop.permute.xlu0 %2795  ;;  %v8244_v12 = vsel %vm982_vm8, %v8060_v40, %v2798_v42 }
 0x42c   : > { %v8248_v17 = vsel %vm982_vm8, %v8064_v7, %v2796_v37 }
 0x42d   : > { %4835 = vmatprep.mubr.msk.f32.mxu1 %vm1040_vm9, %v8248_v17 }
 0x42e   : > { %4836 = vmatmul.mubr.msk.f32.gmra.mrb[20].mxu1 %vm1040_vm9, %v8244_v12  ;;  %v2802_v43 = vpop.permute.xlu1 %2801 }
 0x42f   : > { %v2800_v1 = vpop.permute.xlu0 %2799  ;;  %v8256_v56 = vsel %vm982_vm8, %v8068_v51, %v2802_v43 }
 0x430   : > { %v8260_v40 = vsel %vm982_vm8, %v8072_v59, %v2800_v1 }
 0x431   : > { %4838 = vmatprep.mubr.msk.f32.mxu1 %vm1040_vm9, %v8260_v40 }
 0x432   : > { %4839 = vmatmul.mubr.msk.f32.gmra.mrb[22].mxu1 %vm1040_vm9, %v8256_v56  ;;  %v2806_v7 = vpop.permute.xlu1 %2805 }
 0x433   : > { %v2804_v49 = vpop.permute.xlu0 %2803  ;;  %v8268_v33 = vsel %vm982_vm8, %v8076_v63, %v2806_v7 }
 0x434   : > { %v8272_v51 = vsel %vm982_vm8, %v8080_v4, %v2804_v49 }
 0x435   : > { %4841 = vmatprep.mubr.msk.f32.mxu1 %vm1040_vm9, %v8272_v51 }
 0x436   : > { %4842 = vmatmul.mubr.msk.f32.gmra.mrb[24].mxu1 %vm1040_vm9, %v8268_v33  ;;  %v2810_v59 = vpop.permute.xlu1 %2809 }
 0x437   : > { %v2808_v54 = vpop.permute.xlu0 %2807  ;;  %v8280_v14 = vsel %vm982_vm8, %v8084_v44, %v2810_v59 }
 0x438   : > { %v8284_v63 = vsel %vm982_vm8, %v8088_v32, %v2808_v54 }
 0x439   : > { %4844 = vmatprep.mubr.msk.f32.mxu1 %vm1040_vm9, %v8284_v63 }
 0x43a   : > { %4845 = vmatmul.mubr.msk.f32.gmra.mrb[26].mxu1 %vm1040_vm9, %v8280_v14  ;;  %v2814_v4 = vpop.permute.xlu1 %2813 }
 0x43b   : > { %v2812_v27 = vpop.permute.xlu0 %2811  ;;  %v8292_v5 = vsel %vm982_vm8, %v8092_v52, %v2814_v4 }
 0x43c   : > { %v8296_v44 = vsel %vm982_vm8, %v8096_v38, %v2812_v27 }
 0x43d   : > { %4847 = vmatprep.mubr.msk.f32.mxu1 %vm1040_vm9, %v8296_v44 }
 0x43e   : > { %4848 = vmatmul.mubr.msk.f32.gmra.mrb[28].mxu1 %vm1040_vm9, %v8292_v5  ;;  %v2926_v32 = vpop.permute.xlu1 %2925 }
 0x43f   : > { %v2924_v60 = vpop.permute.xlu0 %2923  ;;  %v8304_v22 = vsel %vm982_vm8, %v8100_v2, %v2926_v32  ;;  %v2248_v2 = vrot.slane %v7988_v46, 7 }
 0x440   : > { %v8308_v52 = vsel %vm982_vm8, %v8104_v20, %v2924_v60 }
 0x441   : > { %4850 = vmatprep.mubr.msk.f32.mxu1 %vm1040_vm9, %v8308_v52 }
 0x442   : > { %4851 = vmatmul.mubr.msk.f32.gmra.mrb[30].mxu1 %vm1040_vm9, %v8304_v22  ;;  %v2754_v38 = vpop.permute.xlu1 %2753 }
 0x443   : > { %v2752_v15 = vpop.permute.xlu0 %2751  ;;  %v2880_v47 = vsel %vm982_vm8, %v8108_v10, %v2754_v38  ;;  %v2374_v10 = vrot.slane %v7988_v46, %v5965_v9  ;;  %v2284_v9 = vsel %vm368_vm6, %v2248_v2, %v2266_v11 }
 0x444   : > { %v2879_v6 = vsel %vm982_vm8, %v8112_v29, %v2752_v15 }
 0x445   : > { %4857 = vmatprep.mubr.msk.f32.mxu1 %vm1040_vm9, %v2879_v6 }
 0x446   : > { %4858 = vmatmul.mubr.msk.f32.vlgmr.msra.gmra.mrb[0].mxu1 %vm1040_vm9, %v2880_v47  ;;  %v3499_v29 = vpop.permute.xlu1 %3498 }
 0x447   : > { %4992 = vmatpush3.bf16.msk.msra.mxu1 %vm5745_vm5, %v8122_v30  ;;  %4860 = vmatprep.mubr.msk.f32.mxu1 %vm1040_vm9, %v8120_v45  ;;  %v3497_v20 = vpop.permute.xlu0 %3496  ;;  %v3511_v46 = vsel %vm258_vm0, %v2284_v9, %v3499_v29 }
 0x44a   : > { %4861 = vmatmul.mubr.msk.f32.gmra.mrb[2].mxu1 %vm1040_vm9, %v8116_v21  ;;  %v2302_v21 = vsel %vm368_vm6, %v2266_v11, %v2248_v2 }
 0x44b   : > { %4863 = vmatprep.mubr.msk.f32.mxu1 %vm1040_vm9, %v8137_v28  ;;  %v3505_v39 = vpop.permute.xlu0 %3504  ;;  %v2409_v45 = vsel %vm221_vm7, %v2374_v10, %v2302_v21 }
 0x44c   : > { %v3510_v30 = vsel %vm258_vm0, %v2409_v45, %v3497_v20 }
 0x44e   : > { %4864 = vmatmul.mubr.msk.f32.gmra.mrb[4].mxu1 %vm1040_vm9, %v8133_v62 }
 0x44f   : > { %4866 = vmatprep.mubr.msk.f32.mxu1 %vm1040_vm9, %v8152_v3 }
 0x452   : > { %4867 = vmatmul.mubr.msk.f32.gmra.mrb[6].mxu1 %vm1040_vm9, %v8148_v8 }
 0x453   : > { %4869 = vmatprep.mubr.msk.f32.mxu1 %vm1040_vm9, %v8164_v53 }
 0x456   : > { %4870 = vmatmul.mubr.msk.f32.gmra.mrb[8].mxu1 %vm1040_vm9, %v8160_v31 }
 0x457   : > { %4872 = vmatprep.mubr.msk.f32.mxu1 %vm1040_vm9, %v8176_v61 }
 0x45a   : > { %4873 = vmatmul.mubr.msk.f32.gmra.mrb[10].mxu1 %vm1040_vm9, %v8172_v34 }
 0x45b   : > { %4875 = vmatprep.mubr.msk.f32.mxu1 %vm1040_vm9, %v8188_v58 }
 0x45e   : > { %4876 = vmatmul.mubr.msk.f32.gmra.mrb[12].mxu1 %vm1040_vm9, %v8184_v23 }
 0x45f   : > { %4878 = vmatprep.mubr.msk.f32.mxu1 %vm1040_vm9, %v8200_v57 }
 0x462   : > { %4879 = vmatmul.mubr.msk.f32.gmra.mrb[14].mxu1 %vm1040_vm9, %v8196_v41 }
 0x463   : > { %4881 = vmatprep.mubr.msk.f32.mxu1 %vm1040_vm9, %v8212_v50 }
 0x466   : > { %4882 = vmatmul.mubr.msk.f32.gmra.mrb[16].mxu1 %vm1040_vm9, %v8208_v25 }
 0x467   : > { %4884 = vmatprep.mubr.msk.f32.mxu1 %vm1040_vm9, %v8224_v55 }
 0x46a   : > { %4885 = vmatmul.mubr.msk.f32.gmra.mrb[18].mxu1 %vm1040_vm9, %v8220_v13 }
 0x46b   : > { %4887 = vmatprep.mubr.msk.f32.mxu1 %vm1040_vm9, %v8236_v36 }
 0x46e   : > { %4888 = vmatmul.mubr.msk.f32.gmra.mrb[20].mxu1 %vm1040_vm9, %v8232_v24 }
 0x46f   : > { %4890 = vmatprep.mubr.msk.f32.mxu1 %vm1040_vm9, %v8248_v17 }
 0x472   : > { %4891 = vmatmul.mubr.msk.f32.gmra.mrb[22].mxu1 %vm1040_vm9, %v8244_v12 }
 0x473   : > { %4893 = vmatprep.mubr.msk.f32.mxu1 %vm1040_vm9, %v8260_v40 }
 0x476   : > { %4894 = vmatmul.mubr.msk.f32.gmra.mrb[24].mxu1 %vm1040_vm9, %v8256_v56 }
 0x477   : > { %4896 = vmatprep.mubr.msk.f32.mxu1 %vm1040_vm9, %v8272_v51 }
 0x47a   : > { %4897 = vmatmul.mubr.msk.f32.gmra.mrb[26].mxu1 %vm1040_vm9, %v8268_v33 }
 0x47b   : > { %4899 = vmatprep.mubr.msk.f32.mxu1 %vm1040_vm9, %v8284_v63 }
 0x47e   : > { %4900 = vmatmul.mubr.msk.f32.gmra.mrb[28].mxu1 %vm1040_vm9, %v8280_v14 }
 0x47f   : > { %4902 = vmatprep.mubr.msk.f32.mxu1 %vm1040_vm9, %v8296_v44 }
 0x482   : > { %4903 = vmatmul.mubr.msk.f32.gmra.mrb[30].mxu1 %vm1040_vm9, %v8292_v5 }
 0x483   : > { %4909 = vmatprep.mubr.msk.f32.mxu1 %vm1040_vm9, %v8137_v28  ;;  %v3512_v28 = vsel %vm982_vm8, %v3510_v30, %v3505_v39 }
 0x486   : > { %4910 = vmatmul.mubr.msk.f32.vlgmr.msra.gmra.mrb[0].mxu1 %vm1040_vm9, %v8133_v62  ;;  %v3507_v62 = vpop.permute.xlu1 %3506 }
 0x487   : > { %4912 = vmatprep.mubr.msk.f32.mxu1 %vm1040_vm9, %v8152_v3 }
 0x48a   : > { %4913 = vmatmul.mubr.msk.f32.gmra.mrb[2].mxu1 %vm1040_vm9, %v8148_v8  ;;  %v3513_v8 = vsel %vm982_vm8, %v3511_v46, %v3507_v62 }
 0x48b   : > { %4915 = vmatprep.mubr.msk.f32.mxu1 %vm1040_vm9, %v8164_v53 }
 0x48e   : > { %4916 = vmatmul.mubr.msk.f32.gmra.mrb[4].mxu1 %vm1040_vm9, %v8160_v31 }
 0x48f   : > { %4918 = vmatprep.mubr.msk.f32.mxu1 %vm1040_vm9, %v8176_v61 }
 0x492   : > { %4919 = vmatmul.mubr.msk.f32.gmra.mrb[6].mxu1 %vm1040_vm9, %v8172_v34 }
 0x493   : > { %4921 = vmatprep.mubr.msk.f32.mxu1 %vm1040_vm9, %v8188_v58 }
 0x496   : > { %4922 = vmatmul.mubr.msk.f32.gmra.mrb[8].mxu1 %vm1040_vm9, %v8184_v23 }
 0x497   : > { %4924 = vmatprep.mubr.msk.f32.mxu1 %vm1040_vm9, %v8200_v57 }
 0x49a   : > { %4925 = vmatmul.mubr.msk.f32.gmra.mrb[10].mxu1 %vm1040_vm9, %v8196_v41 }
 0x49b   : > { %4927 = vmatprep.mubr.msk.f32.mxu1 %vm1040_vm9, %v8212_v50 }
 0x49e   : > { %4928 = vmatmul.mubr.msk.f32.gmra.mrb[12].mxu1 %vm1040_vm9, %v8208_v25 }
 0x49f   : > { %4930 = vmatprep.mubr.msk.f32.mxu1 %vm1040_vm9, %v8224_v55 }
 0x4a2   : > { %4931 = vmatmul.mubr.msk.f32.gmra.mrb[14].mxu1 %vm1040_vm9, %v8220_v13 }
 0x4a3   : > { %4933 = vmatprep.mubr.msk.f32.mxu1 %vm1040_vm9, %v8236_v36 }
 0x4a6   : > { %4934 = vmatmul.mubr.msk.f32.gmra.mrb[16].mxu1 %vm1040_vm9, %v8232_v24 }
 0x4a7   : > { %4936 = vmatprep.mubr.msk.f32.mxu1 %vm1040_vm9, %v8248_v17 }
 0x4aa   : > { %4937 = vmatmul.mubr.msk.f32.gmra.mrb[18].mxu1 %vm1040_vm9, %v8244_v12 }
 0x4ab   : > { %4939 = vmatprep.mubr.msk.f32.mxu1 %vm1040_vm9, %v8260_v40 }
 0x4ae   : > { %4940 = vmatmul.mubr.msk.f32.gmra.mrb[20].mxu1 %vm1040_vm9, %v8256_v56 }
 0x4af   : > { %4942 = vmatprep.mubr.msk.f32.mxu1 %vm1040_vm9, %v8272_v51 }
 0x4b2   : > { %4943 = vmatmul.mubr.msk.f32.gmra.mrb[22].mxu1 %vm1040_vm9, %v8268_v33 }
 0x4b3   : > { %4945 = vmatprep.mubr.msk.f32.mxu1 %vm1040_vm9, %v8284_v63 }
 0x4b6   : > { %4946 = vmatmul.mubr.msk.f32.gmra.mrb[24].mxu1 %vm1040_vm9, %v8280_v14 }
 0x4b7   : > { %4948 = vmatprep.mubr.msk.f32.mxu1 %vm1040_vm9, %v8296_v44 }
 0x4ba   : > { %4949 = vmatmul.mubr.msk.f32.gmra.mrb[26].mxu1 %vm1040_vm9, %v8292_v5 }
 0x4bb   : > { %4951 = vmatprep.mubr.msk.f32.mxu1 %vm1040_vm9, %v8308_v52 }
 0x4be   : > { %4952 = vmatmul.mubr.msk.f32.gmra.mrb[28].mxu1 %vm1040_vm9, %v8304_v22 }
 0x4bf   : > { %4954 = vmatprep.mubr.msk.f32.mxu1 %vm1040_vm9, %v3512_v28 }
 0x4c2   : > { %4955 = vmatmul.mubr.msk.f32.gmra.mrb[30].mxu1 %vm1040_vm9, %v3513_v8 }
 0x559   : > { %v8459_v3 = vpop.f32.mrb[0].mxu1 }
 0x55a   : > { %v3784_v31 = vsel %vm258_vm0, %v8459_v3, 0.0  ;;  %v8463_v53 = vpop.f32.mrb[1].mxu1 }
 0x55b   : > { %v3783_v34 = vsel %vm258_vm0, %v8463_v53, 0.0 }
 0x55c   : > { %v3785_v19 = vadd.f32 %v3784_v31, %v3783_v34 }
 0x55d   : > { %v8467_v61 = vpop.f32.mrb[2].mxu1 }
 0x55e   : > { %v8469_v23 = vpop.f32.mrb[3].mxu1  ;;  %v3788_v57 = vsel %vm258_vm0, %v8467_v61, 0.0 }
 0x55f   : > { %v3786_v58 = vsel %vm258_vm0, %v8469_v23, 0.0 }
 0x560   : > { %v3787_v41 = vadd.f32 %v3786_v58, %v3785_v19 }
 0x561   : > { %v8475_v26 = vpop.f32.mrb[4].mxu1 }
 0x562   : > { %v8477_v0 = vpop.f32.mrb[5].mxu1  ;;  %v3789_v25 = vadd.f32 %v3788_v57, %v3787_v41  ;;  %v3792_v18 = vsel %vm258_vm0, %v8475_v26, 0.0 }
 0x563   : > { %v3790_v50 = vsel %vm258_vm0, %v8477_v0, 0.0 }
 0x564   : > { %v3791_v35 = vadd.f32 %v3790_v50, %v3789_v25 }
 0x565   : > { %v8483_v13 = vpop.f32.mrb[6].mxu1 }
 0x566   : > { %v8485_v55 = vpop.f32.mrb[7].mxu1  ;;  %v3793_v16 = vadd.f32 %v3792_v18, %v3791_v35  ;;  %v3796_v36 = vsel %vm258_vm0, %v8483_v13, 0.0 }
 0x567   : > { %v3794_v48 = vsel %vm258_vm0, %v8485_v55, 0.0 }
 0x568   : > { %v3795_v24 = vadd.f32 %v3794_v48, %v3793_v16 }
 0x569   : > { %v8491_v42 = vpop.f32.mrb[8].mxu1 }
 0x56a   : > { %v8493_v37 = vpop.f32.mrb[9].mxu1  ;;  %v3797_v12 = vadd.f32 %v3796_v36, %v3795_v24  ;;  %v3800_v1 = vsel %vm258_vm0, %v8491_v42, 0.0 }
 0x56b   : > { %v3798_v17 = vsel %vm258_vm0, %v8493_v37, 0.0 }
 0x56c   : > { %v3799_v43 = vadd.f32 %v3798_v17, %v3797_v12 }
 0x56d   : > { %v8499_v56 = vpop.f32.mrb[10].mxu1 }
 0x56e   : > { %v8501_v40 = vpop.f32.mrb[11].mxu1  ;;  %v3801_v7 = vadd.f32 %v3800_v1, %v3799_v43  ;;  %v3804_v51 = vsel %vm258_vm0, %v8499_v56, 0.0 }
 0x56f   : > { %v3802_v49 = vsel %vm258_vm0, %v8501_v40, 0.0 }
 0x570   : > { %v3803_v33 = vadd.f32 %v3802_v49, %v3801_v7 }
 0x571   : > { %v8507_v59 = vpop.f32.mrb[12].mxu1 }
 0x572   : > { %v8509_v54 = vpop.f32.mrb[13].mxu1  ;;  %v3805_v14 = vadd.f32 %v3804_v51, %v3803_v33  ;;  %v3808_v27 = vsel %vm258_vm0, %v8507_v59, 0.0 }
 0x573   : > { %v3806_v63 = vsel %vm258_vm0, %v8509_v54, 0.0 }
 0x574   : > { %v3807_v4 = vadd.f32 %v3806_v63, %v3805_v14 }
 0x575   : > { %v8515_v5 = vpop.f32.mrb[14].mxu1 }
 0x576   : > { %v8517_v44 = vpop.f32.mrb[15].mxu1  ;;  %v3809_v32 = vadd.f32 %v3808_v27, %v3807_v4  ;;  %v3812_v52 = vsel %vm258_vm0, %v8515_v5, 0.0 }
 0x577   : > { %v3810_v60 = vsel %vm258_vm0, %v8517_v44, 0.0 }
 0x578   : > { %v3811_v22 = vadd.f32 %v3810_v60, %v3809_v32 }
 0x579   : > { %v8523_v38 = vpop.f32.mrb[16].mxu1 }
 0x57a   : > { %v8525_v15 = vpop.f32.mrb[17].mxu1  ;;  %v3813_v47 = vadd.f32 %v3812_v52, %v3811_v22  ;;  %v3816_v2 = vsel %vm258_vm0, %v8523_v38, 0.0 }
 0x57b   : > { %v3814_v6 = vsel %vm258_vm0, %v8525_v15, 0.0 }
 0x57c   : > { %v3815_v11 = vadd.f32 %v3814_v6, %v3813_v47 }
 0x57d   : > { %v8531_v20 = vpop.f32.mrb[18].mxu1 }
 0x57e   : > { %v8533_v10 = vpop.f32.mrb[19].mxu1  ;;  %v3817_v29 = vadd.f32 %v3816_v2, %v3815_v11  ;;  %v3820_v45 = vsel %vm258_vm0, %v8531_v20, 0.0 }
 0x57f   : > { %v3818_v21 = vsel %vm258_vm0, %v8533_v10, 0.0 }
 0x580   : > { %v3819_v39 = vadd.f32 %v3818_v21, %v3817_v29 }
 0x581   : > { %v8539_v30 = vpop.f32.mrb[20].mxu1 }
 0x582   : > { %v8541_v62 = vpop.f32.mrb[21].mxu1  ;;  %v3821_v28 = vadd.f32 %v3820_v45, %v3819_v39  ;;  %v3824_v8 = vsel %vm258_vm0, %v8539_v30, 0.0 }
 0x583   : > { %v3822_v9 = vsel %vm258_vm0, %v8541_v62, 0.0 }
 0x584   : > { %v3823_v46 = vadd.f32 %v3822_v9, %v3821_v28 }
 0x585   : > { %v4944_v31 = vpop.f32.mrb[22].mxu1 }
 0x586   : > { %v3702_v34 = vpop.f32.mrb[23].mxu1  ;;  %v3825_v19 = vadd.f32 %v3824_v8, %v3823_v46  ;;  %v3828_v57 = vsel %vm258_vm0, %v4944_v31, 0.0 }
 0x587   : > { %v3826_v58 = vsel %vm258_vm0, %v3702_v34, 0.0 }
 0x588   : > { %v3827_v41 = vadd.f32 %v3826_v58, %v3825_v19 }
 0x589   : > { %v4947_v25 = vpop.f32.mrb[24].mxu1 }
 0x58a   : > { %v3712_v50 = vpop.f32.mrb[25].mxu1  ;;  %v3829_v35 = vadd.f32 %v3828_v57, %v3827_v41  ;;  %v3832_v48 = vsel %vm258_vm0, %v4947_v25, 0.0 }
 0x58b   : > { %v3830_v18 = vsel %vm258_vm0, %v3712_v50, 0.0 }
 0x58c   : > { %v3831_v16 = vadd.f32 %v3830_v18, %v3829_v35 }
 0x58d   : > { %v4950_v24 = vpop.f32.mrb[26].mxu1 }
 0x58e   : > { %v3722_v36 = vpop.f32.mrb[27].mxu1  ;;  %v3833_v12 = vadd.f32 %v3832_v48, %v3831_v16  ;;  %v3836_v1 = vsel %vm258_vm0, %v4950_v24, 0.0 }
 0x58f   : > { %v3834_v17 = vsel %vm258_vm0, %v3722_v36, 0.0 }
 0x590   : > { %v3835_v43 = vadd.f32 %v3834_v17, %v3833_v12 }
 0x591   : > { %v4953_v7 = vpop.f32.mrb[28].mxu1 }
 0x592   : > { %v3732_v49 = vpop.f32.mrb[29].mxu1  ;;  %v3837_v33 = vadd.f32 %v3836_v1, %v3835_v43  ;;  %v3840_v63 = vsel %vm258_vm0, %v4953_v7, 0.0 }
 0x593   : > { %v3838_v51 = vsel %vm258_vm0, %v3732_v49, 0.0 }
 0x594   : > { %v3839_v14 = vadd.f32 %v3838_v51, %v3837_v33 }
 0x595   : > { %v4956_v4 = vpop.f32.mrb[30].mxu1 }
 0x596   : > { %v3742_v27 = vpop.f32.mrb[31].mxu1  ;;  %v3841_v32 = vadd.f32 %v3840_v63, %v3839_v14  ;;  %v3844_v52 = vsel %vm258_vm0, %v4956_v4, 0.0 }
 0x597   : > { %v3842_v60 = vsel %vm258_vm0, %v3742_v27, 0.0 }
 0x598   : > { %v3843_v22 = vadd.f32 %v3842_v60, %v3841_v32 }
 0x59a   : > { %v3845_v47 = vadd.f32 %v3844_v52, %v3843_v22 }
 0x59c   : > { %v3846_v6 = vrot.slane %v3845_v47, 4 }
 0x59e   : > { %v3847_v11 = vadd.f32 %v3846_v6, %v3845_v47 }
 0x5a0   : > { %v3848_v2 = vrot.slane %v3847_v11, 2 }
 0x5a2   : > { %v3849_v29 = vadd.f32 %v3848_v2, %v3847_v11 }
 0x5a4   : > { %v3850_v21 = vrot.slane %v3849_v29, 1 }
 0x5a6   : > { %v3851_v39 = vadd.f32 %v3850_v21, %v3849_v29 }
 0x5a8   : > { %v3852_v45 = vmul.f32 0.00390625, %v3851_v39 }
 0x5aa   : > { %v8558_v28 = vsub.f32 %v8463_v53, %v3852_v45  ;;  %v8561_v9 = vsub.f32 %v8459_v3, %v3852_v45  ;;  %v8564_v46 = vsub.f32 %v8469_v23, %v3852_v45  ;;  %v8567_v8 = vsub.f32 %v8467_v61, %v3852_v45 }
 0x5ab   : > { %v8570_v19 = vsub.f32 %v8477_v0, %v3852_v45  ;;  %v8573_v58 = vsub.f32 %v8475_v26, %v3852_v45  ;;  %v8576_v41 = vsub.f32 %v8485_v55, %v3852_v45  ;;  %v8579_v53 = vsub.f32 %v8483_v13, %v3852_v45 }
 0x5ac   : > { %v8582_v3 = vsub.f32 %v8493_v37, %v3852_v45  ;;  %v8585_v23 = vsub.f32 %v8491_v42, %v3852_v45  ;;  %v8588_v61 = vsub.f32 %v8501_v40, %v3852_v45  ;;  %v8591_v0 = vsub.f32 %v8499_v56, %v3852_v45 }
 0x5ad   : > { %v8594_v26 = vsub.f32 %v8509_v54, %v3852_v45  ;;  %v8597_v55 = vsub.f32 %v8507_v59, %v3852_v45  ;;  %v8600_v13 = vsub.f32 %v8517_v44, %v3852_v45  ;;  %v8603_v37 = vsub.f32 %v8515_v5, %v3852_v45 }
 0x5ae   : > { %v8606_v42 = vsub.f32 %v8525_v15, %v3852_v45  ;;  %v8609_v40 = vsub.f32 %v8523_v38, %v3852_v45  ;;  %v8612_v56 = vsub.f32 %v8533_v10, %v3852_v45  ;;  %v8615_v54 = vsub.f32 %v8531_v20, %v3852_v45 }
 0x5af   : > { %v8618_v59 = vsub.f32 %v8541_v62, %v3852_v45  ;;  %v8621_v44 = vsub.f32 %v8539_v30, %v3852_v45  ;;  %v8623_v5 = vsub.f32 %v3702_v34, %v3852_v45  ;;  %v8625_v57 = vsub.f32 %v4944_v31, %v3852_v45 }
 0x5b0   : > { %v8627_v15 = vsub.f32 %v3712_v50, %v3852_v45  ;;  %v8629_v38 = vsub.f32 %v4947_v25, %v3852_v45  ;;  %v8631_v35 = vsub.f32 %v3722_v36, %v3852_v45  ;;  %v8633_v10 = vsub.f32 %v4950_v24, %v3852_v45 }
 0x5b1   : > { %v8635_v20 = vsub.f32 %v3732_v49, %v3852_v45  ;;  %v8637_v18 = vsub.f32 %v4953_v7, %v3852_v45  ;;  %v8639_v62 = vsub.f32 %v3742_v27, %v3852_v45  ;;  %v8641_v30 = vsub.f32 %v4956_v4, %v3852_v45 }
 0x5b2   : > { %v3885_v31 = vmul.f32 %v8558_v28, %v8558_v28  ;;  %v3886_v34 = vmul.f32 %v8561_v9, %v8561_v9  ;;  %v3887_v25 = vmul.f32 %v8564_v46, %v8564_v46  ;;  %v3888_v50 = vmul.f32 %v8567_v8, %v8567_v8 }
 0x5b3   : > { %v3889_v36 = vmul.f32 %v8570_v19, %v8570_v19  ;;  %v3890_v43 = vmul.f32 %v8573_v58, %v8573_v58  ;;  %v3891_v49 = vmul.f32 %v8576_v41, %v8576_v41  ;;  %v3892_v14 = vmul.f32 %v8579_v53, %v8579_v53 }
 0x5b4   : > { %v3917_v16 = vsel %vm258_vm0, %v3885_v31, 0.0  ;;  %v3918_v48 = vsel %vm258_vm0, %v3886_v34, 0.0  ;;  %v3920_v12 = vsel %vm258_vm0, %v3887_v25, 0.0  ;;  %v3922_v1 = vsel %vm258_vm0, %v3888_v50, 0.0 }
 0x5b5   : > { %v3919_v24 = vadd.f32 %v3918_v48, %v3917_v16  ;;  %v3924_v33 = vsel %vm258_vm0, %v3889_v36, 0.0  ;;  %v3926_v63 = vsel %vm258_vm0, %v3890_v43, 0.0  ;;  %v3893_v27 = vmul.f32 %v8582_v3, %v8582_v3 }
 0x5b6   : > { %v3928_v32 = vsel %vm258_vm0, %v3891_v49, 0.0  ;;  %v3894_v22 = vmul.f32 %v8585_v23, %v8585_v23  ;;  %v3930_v52 = vsel %vm258_vm0, %v3892_v14, 0.0  ;;  %v3895_v6 = vmul.f32 %v8588_v61, %v8588_v61 }
 0x5b7   : > { %v3921_v17 = vadd.f32 %v3920_v12, %v3919_v24  ;;  %v3932_v11 = vsel %vm258_vm0, %v3893_v27, 0.0  ;;  %v3896_v29 = vmul.f32 %v8591_v0, %v8591_v0  ;;  %v3897_v45 = vmul.f32 %v8594_v26, %v8594_v26 }
 0x5b8   : > { %v3934_v21 = vsel %vm258_vm0, %v3894_v22, 0.0  ;;  %v3936_v31 = vsel %vm258_vm0, %v3895_v6, 0.0  ;;  %v3898_v25 = vmul.f32 %v8597_v55, %v8597_v55  ;;  %v3899_v48 = vmul.f32 %v8600_v13, %v8600_v13 }
 0x5b9   : > { %v3923_v7 = vadd.f32 %v3922_v1, %v3921_v17  ;;  %v3938_v50 = vsel %vm258_vm0, %v3896_v29, 0.0  ;;  %v3940_v24 = vsel %vm258_vm0, %v3897_v45, 0.0  ;;  %v3900_v12 = vmul.f32 %v8603_v37, %v8603_v37 }
 0x5ba   : > { %v3942_v17 = vsel %vm258_vm0, %v3898_v25, 0.0  ;;  %v3901_v1 = vmul.f32 %v8606_v42, %v8606_v42 }
 0x5bb   : > { %v3925_v51 = vadd.f32 %v3924_v33, %v3923_v7  ;;  %v3944_v7 = vsel %vm258_vm0, %v3899_v48, 0.0  ;;  %v3902_v33 = vmul.f32 %v8609_v40, %v8609_v40 }
 0x5bd   : > { %v3927_v4 = vadd.f32 %v3926_v63, %v3925_v51  ;;  %v3946_v51 = vsel %vm258_vm0, %v3900_v12, 0.0  ;;  %v3903_v63 = vmul.f32 %v8612_v56, %v8612_v56 }
 0x5bf   : > { %v3929_v60 = vadd.f32 %v3928_v32, %v3927_v4  ;;  %v3948_v4 = vsel %vm258_vm0, %v3901_v1, 0.0  ;;  %v3904_v32 = vmul.f32 %v8615_v54, %v8615_v54 }
 0x5c1   : > { %v3931_v47 = vadd.f32 %v3930_v52, %v3929_v60  ;;  %v3950_v60 = vsel %vm258_vm0, %v3902_v33, 0.0  ;;  %v3905_v52 = vmul.f32 %v8618_v59, %v8618_v59 }
 0x5c3   : > { %v3933_v2 = vadd.f32 %v3932_v11, %v3931_v47  ;;  %v3952_v47 = vsel %vm258_vm0, %v3903_v63, 0.0  ;;  %v3906_v11 = vmul.f32 %v8621_v44, %v8621_v44 }
 0x5c5   : > { %v3935_v39 = vadd.f32 %v3934_v21, %v3933_v2  ;;  %v3954_v2 = vsel %vm258_vm0, %v3904_v32, 0.0  ;;  %v3907_v21 = vmul.f32 %v8623_v5, %v8623_v5 }
 0x5c7   : > { %v3937_v34 = vadd.f32 %v3936_v31, %v3935_v39  ;;  %v3956_v39 = vsel %vm258_vm0, %v3905_v52, 0.0  ;;  %v3908_v31 = vmul.f32 %v8625_v57, %v8625_v57 }
 0x5c9   : > { %v3939_v16 = vadd.f32 %v3938_v50, %v3937_v34  ;;  %v3958_v34 = vsel %vm258_vm0, %v3906_v11, 0.0  ;;  %v3909_v50 = vmul.f32 %v8627_v15, %v8627_v15 }
 0x5cb   : > { %v3941_v36 = vadd.f32 %v3940_v24, %v3939_v16  ;;  %v3960_v16 = vsel %vm258_vm0, %v3907_v21, 0.0  ;;  %v3910_v24 = vmul.f32 %v8629_v38, %v8629_v38 }
 0x5cd   : > { %v3943_v43 = vadd.f32 %v3942_v17, %v3941_v36  ;;  %v3962_v36 = vsel %vm258_vm0, %v3908_v31, 0.0  ;;  %v3911_v17 = vmul.f32 %v8631_v35, %v8631_v35 }
 0x5cf   : > { %v3945_v49 = vadd.f32 %v3944_v7, %v3943_v43  ;;  %v3964_v43 = vsel %vm258_vm0, %v3909_v50, 0.0  ;;  %v3912_v7 = vmul.f32 %v8633_v10, %v8633_v10 }
 0x5d1   : > { %v3947_v14 = vadd.f32 %v3946_v51, %v3945_v49  ;;  %v3966_v49 = vsel %vm258_vm0, %v3910_v24, 0.0  ;;  %v3913_v51 = vmul.f32 %v8635_v20, %v8635_v20 }
 0x5d3   : > { %v3949_v27 = vadd.f32 %v3948_v4, %v3947_v14  ;;  %v3968_v14 = vsel %vm258_vm0, %v3911_v17, 0.0  ;;  %v3914_v4 = vmul.f32 %v8637_v18, %v8637_v18 }
 0x5d5   : > { %v3951_v22 = vadd.f32 %v3950_v60, %v3949_v27  ;;  %v3970_v27 = vsel %vm258_vm0, %v3912_v7, 0.0  ;;  %v3915_v60 = vmul.f32 %v8639_v62, %v8639_v62 }
 0x5d7   : > { %v3953_v6 = vadd.f32 %v3952_v47, %v3951_v22  ;;  %v3972_v22 = vsel %vm258_vm0, %v3913_v51, 0.0  ;;  %v3916_v47 = vmul.f32 %v8641_v30, %v8641_v30 }
 0x5d9   : > { %v3955_v29 = vadd.f32 %v3954_v2, %v3953_v6  ;;  %v3974_v6 = vsel %vm258_vm0, %v3914_v4, 0.0  ;;  %v3976_v2 = vsel %vm258_vm0, %v3915_v60, 0.0  ;;  %v3978_v21 = vsel %vm258_vm0, %v3916_v47, 0.0  ;;  %v4021_v4 = vld [vmem:[%s5573_s28] sm:$0xff]  ;;  %v4027_v60 = vld [vmem:[%s5573_s28 + $0x30] sm:$0xff] }
 0x5db   : > { %v3957_v45 = vadd.f32 %v3956_v39, %v3955_v29 }
 0x5dd   : > { %v3959_v25 = vadd.f32 %v3958_v34, %v3957_v45 }
 0x5df   : > { %v3961_v48 = vadd.f32 %v3960_v16, %v3959_v25 }
 0x5e1   : > { %v3963_v12 = vadd.f32 %v3962_v36, %v3961_v48 }
 0x5e3   : > { %v3965_v1 = vadd.f32 %v3964_v43, %v3963_v12  ;;  %v4051_v12 = vld [vmem:[%s5573_s28 + $0xf0] sm:$0xff] }
 0x5e5   : > { %v3967_v33 = vadd.f32 %v3966_v49, %v3965_v1 }
 0x5e7   : > { %v3969_v63 = vadd.f32 %v3968_v14, %v3967_v33 }
 0x5e9   : > { %v3971_v32 = vadd.f32 %v3970_v27, %v3969_v63  ;;  %v4024_v27 = vld [vmem:[%s5573_s28 + $0x18] sm:$0xff] }
 0x5eb   : > { %v3973_v52 = vadd.f32 %v3972_v22, %v3971_v32  ;;  %v4026_v32 = vld [vmem:[%s5573_s28 + $0x28] sm:$0xff] }
 0x5ec   : > { %v4030_v22 = vld [vmem:[%s5573_s28 + $0x48] sm:$0xff] }
 0x5ed   : > { %v3975_v11 = vadd.f32 %v3974_v6, %v3973_v52  ;;  %v4029_v52 = vld [vmem:[%s5573_s28 + $0x40] sm:$0xff]  ;;  %v4031_v6 = vld [vmem:[%s5573_s28 + $0x50] sm:$0xff] }
 0x5ef   : > { %v3977_v29 = vadd.f32 %v3976_v2, %v3975_v11  ;;  %v4034_v11 = vld [vmem:[%s5573_s28 + $0x68] sm:$0xff] }
 0x5f1   : > { %v3979_v39 = vadd.f32 %v3978_v21, %v3977_v29  ;;  %v4035_v21 = vld [vmem:[%s5573_s28 + $0x70] sm:$0xff] }
 0x5f3   : > { %v3980_v45 = vrot.slane %v3979_v39, 4 }
 0x5f5   : > { %v3981_v31 = vadd.f32 %v3980_v45, %v3979_v39  ;;  %v4037_v45 = vld [vmem:[%s5573_s28 + $0x80] sm:$0xff] }
 0x5f7   : > { %v3982_v34 = vrot.slane %v3981_v31, 2 }
 0x5f9   : > { %v3983_v25 = vadd.f32 %v3982_v34, %v3981_v31  ;;  %v4040_v31 = vld [vmem:[%s5573_s28 + $0x98] sm:$0xff] }
 0x5fb   : > { %v3984_v50 = vrot.slane %v3983_v25, 1 }
 0x5fd   : > { %v3985_v16 = vadd.f32 %v3984_v50, %v3983_v25  ;;  %v4039_v50 = vld [vmem:[%s5573_s28 + $0x90] sm:$0xff] }
 0x5ff   : > { %v3986_v48 = vmul.f32 0.00390625, %v3985_v16  ;;  %v4041_v16 = vld [vmem:[%s5573_s28 + $0xa0] sm:$0xff] }
 0x601   : > { %v3987_v24 = vadd.f32 1e-05, %v3986_v48 }
 0x603   : > { %5196 = vrsqrt.f32 %v3987_v24 }
 0x60d   : > { %v5197_v36 = vpop.eup %5196 }
 0x60e   : > { %v4019_v17 = vmul.f32 %v5197_v36, %v8639_v62  ;;  %v3989_v43 = vmul.f32 %v5197_v36, %v8558_v28  ;;  %v3990_v1 = vmul.f32 %v5197_v36, %v8561_v9  ;;  %v3991_v7 = vmul.f32 %v5197_v36, %v8564_v46  ;;  %v4022_v46 = vld [vmem:[%s5573_s28 + $0x8] sm:$0xff] }
 0x60f   : > { %v3992_v49 = vmul.f32 %v5197_v36, %v8567_v8  ;;  %v3993_v33 = vmul.f32 %v5197_v36, %v8570_v19  ;;  %v3994_v51 = vmul.f32 %v5197_v36, %v8573_v58  ;;  %v3995_v14 = vmul.f32 %v5197_v36, %v8576_v41 }
 0x610   : > { %v4083_v62 = vadd.f32 %v4051_v12, %v4019_v17  ;;  %v3996_v28 = vmul.f32 %v5197_v36, %v8579_v53  ;;  %v3997_v9 = vmul.f32 %v5197_v36, %v8582_v3  ;;  %v3998_v63 = vmul.f32 %v5197_v36, %v8585_v23  ;;  %v4023_v53 = vld [vmem:[%s5573_s28 + $0x10] sm:$0xff]  ;;  %v4025_v3 = vld [vmem:[%s5573_s28 + $0x20] sm:$0xff]  ;;  %v4044_v17 = vld [vmem:[%s5573_s28 + $0xb8] sm:$0xff] }
 0x611   : > { %v3999_v8 = vmul.f32 %v5197_v36, %v8588_v61  ;;  %v4000_v19 = vmul.f32 %v5197_v36, %v8591_v0  ;;  %v4001_v58 = vmul.f32 %v5197_v36, %v8594_v26  ;;  %v4002_v41 = vmul.f32 %v5197_v36, %v8597_v55  ;;  %v4028_v55 = vld [vmem:[%s5573_s28 + $0x38] sm:$0xff] }
 0x612   : > { %4115 = vst.msk [vmem:[%s8763_s7 + $0xf0] sm:$0xff] %vm258_vm0, %v4083_v62  ;;  %v4003_v23 = vmul.f32 %v5197_v36, %v8600_v13  ;;  %v8769_v61 = vmul.f32 %v5197_v36, %v8603_v37  ;;  %v8772_v0 = vmul.f32 %v5197_v36, %v8606_v42  ;;  %v8775_v26 = vmul.f32 %v5197_v36, %v8609_v40  ;;  %v4032_v40 = vld [vmem:[%s5573_s28 + $0x58] sm:$0xff]  ;;  %v4043_v62 = vld [vmem:[%s5573_s28 + $0xb0] sm:$0xff] }
 0x613   : > { %v4007_v47 = vmul.f32 %v5197_v36, %v8612_v56  ;;  %v8783_v13 = vmul.f32 %v5197_v36, %v8615_v54  ;;  %v8786_v37 = vmul.f32 %v5197_v36, %v8618_v59  ;;  %v8789_v42 = vmul.f32 %v5197_v36, %v8621_v44  ;;  %v4033_v59 = vld [vmem:[%s5573_s28 + $0x60] sm:$0xff]  ;;  %v4036_v44 = vld [vmem:[%s5573_s28 + $0x78] sm:$0xff] }
 0x614   : > { %v4011_v2 = vmul.f32 %v5197_v36, %v8623_v5  ;;  %v8796_v29 = vmul.f32 %v5197_v36, %v8625_v57  ;;  %v8799_v56 = vmul.f32 %v5197_v36, %v8627_v15  ;;  %v8802_v54 = vmul.f32 %v5197_v36, %v8629_v38  ;;  %v4038_v38 = vld [vmem:[%s5573_s28 + $0x88] sm:$0xff] }
 0x615   : > { %v8808_v39 = vmul.f32 %v5197_v36, %v8631_v35  ;;  %v8811_v5 = vmul.f32 %v5197_v36, %v8633_v10  ;;  %v8814_v57 = vmul.f32 %v5197_v36, %v8635_v20  ;;  %v8817_v15 = vmul.f32 %v5197_v36, %v8637_v18  ;;  %v4042_v20 = vld [vmem:[%s5573_s28 + $0xa8] sm:$0xff] }
 0x616   : > { %v8823_v34 = vmul.f32 %v5197_v36, %v8641_v30  ;;  %v4053_v35 = vadd.f32 %v4021_v4, %v3989_v43  ;;  %v4054_v25 = vadd.f32 %v4022_v46, %v3990_v1  ;;  %v4055_v10 = vadd.f32 %v4023_v53, %v3991_v7  ;;  %v4046_v30 = vld [vmem:[%s5573_s28 + $0xc8] sm:$0xff]  ;;  %v4049_v4 = vld [vmem:[%s5573_s28 + $0xe0] sm:$0xff] }
 0x617   : > { %v4056_v18 = vadd.f32 %v4024_v27, %v3992_v49  ;;  %v4057_v48 = vadd.f32 %v4025_v3, %v3993_v33  ;;  %v4058_v24 = vadd.f32 %v4026_v32, %v3994_v51  ;;  %v4059_v12 = vadd.f32 %v4027_v60, %v3995_v14  ;;  %v4045_v49 = vld [vmem:[%s5573_s28 + $0xc0] sm:$0xff]  ;;  %v4048_v33 = vld [vmem:[%s5573_s28 + $0xd8] sm:$0xff]  ;;  %v4047_v51 = vld [vmem:[%s5573_s28 + $0xd0] sm:$0xff] }
 0x618   : > { %v4060_v36 = vadd.f32 %v4028_v55, %v3996_v28  ;;  %v4061_v43 = vadd.f32 %v4029_v52, %v3997_v9  ;;  %v4062_v1 = vadd.f32 %v4030_v22, %v3998_v63  ;;  %v4063_v7 = vadd.f32 %v4031_v6, %v3999_v8  ;;  %4085 = vst.msk [vmem:[%s8763_s7] sm:$0xff] %vm258_vm0, %v4053_v35  ;;  %v4050_v46 = vld [vmem:[%s5573_s28 + $0xe8] sm:$0xff]  ;;  %v4052_v8 = vld [vmem:[%s5573_s28 + $0xf8] sm:$0xff] }
 0x619   : > { %4086 = vst.msk [vmem:[%s8763_s7 + $0x8] sm:$0xff] %vm258_vm0, %v4054_v25  ;;  %4087 = vst.msk [vmem:[%s8763_s7 + $0x10] sm:$0xff] %vm258_vm0, %v4055_v10  ;;  %v4064_v14 = vadd.f32 %v4032_v40, %v4000_v19  ;;  %v4065_v28 = vadd.f32 %v4033_v59, %v4001_v58  ;;  %v4066_v9 = vadd.f32 %v4034_v11, %v4002_v41 }
 0x61a   : > { %v4067_v63 = vadd.f32 %v4035_v21, %v4003_v23  ;;  %4088 = vst.msk [vmem:[%s8763_s7 + $0x18] sm:$0xff] %vm258_vm0, %v4056_v18  ;;  %4089 = vst.msk [vmem:[%s8763_s7 + $0x20] sm:$0xff] %vm258_vm0, %v4057_v48  ;;  %v4068_v19 = vadd.f32 %v4036_v44, %v8769_v61  ;;  %v4069_v58 = vadd.f32 %v4037_v45, %v8772_v0 }
 0x61b   : > { %4090 = vst.msk [vmem:[%s8763_s7 + $0x28] sm:$0xff] %vm258_vm0, %v4058_v24  ;;  %4091 = vst.msk [vmem:[%s8763_s7 + $0x30] sm:$0xff] %vm258_vm0, %v4059_v12  ;;  %v4070_v41 = vadd.f32 %v4038_v38, %v8775_v26  ;;  %v4071_v27 = vadd.f32 %v4039_v50, %v4007_v47  ;;  %v4072_v53 = vadd.f32 %v4040_v31, %v8783_v13 }
 0x61c   : > { %4092 = vst.msk [vmem:[%s8763_s7 + $0x38] sm:$0xff] %vm258_vm0, %v4060_v36  ;;  %4093 = vst.msk [vmem:[%s8763_s7 + $0x40] sm:$0xff] %vm258_vm0, %v4061_v43  ;;  %v4073_v32 = vadd.f32 %v4041_v16, %v8786_v37  ;;  %v4074_v3 = vadd.f32 %v4042_v20, %v8789_v42  ;;  %v4075_v23 = vadd.f32 %v4043_v62, %v4011_v2 }
 0x61d   : > { %4094 = vst.msk [vmem:[%s8763_s7 + $0x48] sm:$0xff] %vm258_vm0, %v4062_v1  ;;  %4095 = vst.msk [vmem:[%s8763_s7 + $0x50] sm:$0xff] %vm258_vm0, %v4063_v7  ;;  %v4076_v61 = vadd.f32 %v4044_v17, %v8796_v29  ;;  %v4077_v0 = vadd.f32 %v4045_v49, %v8799_v56  ;;  %v4078_v26 = vadd.f32 %v4046_v30, %v8802_v54 }
 0x61e   : > { %4096 = vst.msk [vmem:[%s8763_s7 + $0x58] sm:$0xff] %vm258_vm0, %v4064_v14  ;;  %4097 = vst.msk [vmem:[%s8763_s7 + $0x60] sm:$0xff] %vm258_vm0, %v4065_v28  ;;  %v4079_v55 = vadd.f32 %v4047_v51, %v8808_v39  ;;  %v4080_v60 = vadd.f32 %v4048_v33, %v8811_v5  ;;  %v4081_v22 = vadd.f32 %v4049_v4, %v8814_v57 }
 0x61f   : > { %4098 = vst.msk [vmem:[%s8763_s7 + $0x68] sm:$0xff] %vm258_vm0, %v4066_v9  ;;  %4099 = vst.msk [vmem:[%s8763_s7 + $0x70] sm:$0xff] %vm258_vm0, %v4067_v63  ;;  %v4082_v52 = vadd.f32 %v4050_v46, %v8817_v15  ;;  %v4084_v47 = vadd.f32 %v4052_v8, %v8823_v34 }
 0x620   : > { %4100 = vst.msk [vmem:[%s8763_s7 + $0x78] sm:$0xff] %vm258_vm0, %v4068_v19  ;;  %4101 = vst.msk [vmem:[%s8763_s7 + $0x80] sm:$0xff] %vm258_vm0, %v4069_v58 }
 0x621   : > { %4102 = vst.msk [vmem:[%s8763_s7 + $0x88] sm:$0xff] %vm258_vm0, %v4070_v41  ;;  %4103 = vst.msk [vmem:[%s8763_s7 + $0x90] sm:$0xff] %vm258_vm0, %v4071_v27 }
 0x622   : > { %4104 = vst.msk [vmem:[%s8763_s7 + $0x98] sm:$0xff] %vm258_vm0, %v4072_v53  ;;  %4105 = vst.msk [vmem:[%s8763_s7 + $0xa0] sm:$0xff] %vm258_vm0, %v4073_v32 }
 0x623   : > { %4106 = vst.msk [vmem:[%s8763_s7 + $0xa8] sm:$0xff] %vm258_vm0, %v4074_v3  ;;  %4107 = vst.msk [vmem:[%s8763_s7 + $0xb0] sm:$0xff] %vm258_vm0, %v4075_v23 }
 0x624   : > { %4108 = vst.msk [vmem:[%s8763_s7 + $0xb8] sm:$0xff] %vm258_vm0, %v4076_v61  ;;  %4109 = vst.msk [vmem:[%s8763_s7 + $0xc0] sm:$0xff] %vm258_vm0, %v4077_v0 }
 0x625   : > { %4110 = vst.msk [vmem:[%s8763_s7 + $0xc8] sm:$0xff] %vm258_vm0, %v4078_v26  ;;  %4111 = vst.msk [vmem:[%s8763_s7 + $0xd0] sm:$0xff] %vm258_vm0, %v4079_v55 }
 0x626   : > { %4112 = vst.msk [vmem:[%s8763_s7 + $0xd8] sm:$0xff] %vm258_vm0, %v4080_v60  ;;  %4113 = vst.msk [vmem:[%s8763_s7 + $0xe0] sm:$0xff] %vm258_vm0, %v4081_v22 }
 0x627   : > { %4114 = vst.msk [vmem:[%s8763_s7 + $0xe8] sm:$0xff] %vm258_vm0, %v4082_v52  ;;  %4116 = vst.msk [vmem:[%s8763_s7 + $0xf8] sm:$0xff] %vm258_vm0, %v4084_v47 }
 0x628   : > { %5297 = shalt.err (!%p5294_p1)
}
 0x629   : > { %s5298_s21 = scalar_lea.hbm %s8892_s5, 4096  ;;  %s5302_s4 = scalar_lea.hbm %s8970_s3, 8192 }
 0x62a   : > { %p5299_p13 = scmp.ne.s32.totalorder %s8892_s5, %s5298_s21  ;;  %p5303_p4 = scmp.lt.u32.totalorder %s8892_s5, %s8970_s3 }
 0x62b   : > { %p5304_p5 = scmp.lt.u32.totalorder %s5302_s4, %s5298_s21  ;;  %p5306_p11 = scmp.lt.u32.totalorder %s5298_s21, %s8892_s5 }
 0x62c   : > { %p5300_p6 = pnand %p5299_p13, %p9160_p0 }
 0x62d   : > { %p5305_p8 = por %p5304_p5, %p5303_p4 }
 0x62e   : > { %p5301_p10 = pneg %p5300_p6 }
 0x62f   : > { %p5307_p2 = por %p5306_p11, %p5305_p8 }
 0x631   : > { %p5308_p3 = pnand %p5307_p2, %p5301_p10 }
 0x633   : > { %5311 = shalt.err (!%p5308_p3)
}
 0x634   : > { %s5365_s7 = smov 128  }
 0x635   : > { %5131 = dma.vmem_to_hbm [thread:$0]  (%p9160_p0), %s8906_s24, 4096, %s8892_s5, %s4118_s16, %s5365_s7, %s5365_s7, %s5362_s20  }
 0x636 PF: > { %s4146_s8 = sand.u32 1, %s5342_s12   ;;  %p9161_p7 = scmp.ne.s32.totalorder %s8977_s19, 0 }
 0x637   : > { %p9162_p9 = scmp.ge.s32.totalorder %s5354_s15, 2  ;;  %s4147_s27 = scalar_lea.sflag [#allocation5], %s4146_s8 }
 0x639   : > { %p5145_p12 = pnand %p9162_p9, %p9161_p7 }
 0x63b   : > { %5337 = dma.done.wait (!%p5145_p12), %s4147_s27, 4096  }
 0x63c   : > { %5339 = vsyncadd (!%p5145_p12), %s4147_s27, 4294963200  ;;  %p17_p1 = scmp.ge.s32.totalorder %s5502_s23, 4   ;;  %s9163_s12 = smov %s5346_s13 }
 0x63d   : > { %s9164_s13 = smov %s5350_s14  ;;  %s9165_s14 = smov %s5518_s9 }
 0x63e   : > { %s9166_s15 = smov %s5502_s23  ;;  %19 = sbr.rel (!%p17_p1) target bundleno = 6 (0x6), region = 91 }
 0x645   :  { %4152 = vsyncpa [#allocation4], 1 }
 0x646   :  { %4154 = vsyncpa [#allocation4 + $0x1], 1 }
 0x647   :  { %4155 = vsyncpa [#allocation7], 1 }
 0x648   :  { %4156 = vsyncpa [#allocation5], 1 }
 0x649   :  { %4158 = vsyncpa [#allocation5 + $0x1], 1 }

</bundles_post_ra>
